<compile_context>
chip_gen: v7x
topology: tpu7x:2x2x1
jax: 0.10.0
libtpu: 0.0.40
codegen_flags: <defaults>
</compile_context>

<pallas_src>
import functools

import numpy as np
import jax
import jax.numpy as jnp
from jax.experimental import pallas as pl
from jax.experimental.pallas import tpu as pltpu

LEAKY_SLOPE = 0.01   # nn.LeakyReLU() default
BN_EPS = 1e-5        # nn.BatchNorm2d default
LANE = 128

# Feed the MXU bf16 operands (f32 accumulation, f32 epilogues).
MATMUL_IN_BF16 = True

# Single-buffer the constant-index weight/bias blocks (their block index never
# changes across grid steps).  Flipped off automatically in __main__ if this
# jax/Mosaic build rejects pipeline_mode=pl.Buffered(1).
WEIGHT_SINGLE_BUFFER = True


def _round_up(x, m):
    return ((x + m - 1) // m) * m


# -----------------------------------------------------------------------------
# The single fused Pallas kernel: the whole VAE forward as a matmul chain.
# -----------------------------------------------------------------------------
def _vae_fused_kernel(x_ref, eps_ref, b_ref, *rest, acts, n_pads, eps_pad):
    """rest = (w_0, ..., w_{L-1}, recon_ref, ml_ref).

    acts[i] selects the epilogue of matmul i:
      "leaky" : LeakyReLU     (encoder convs, decoder convTs, post convT)
      "head"  : write [mu|logvar] block, reparameterize -> z
      "none"  : identity      (pre_process linear)
      "tanh"  : Tanh          (final post conv)
    """
    n_mats = len(acts)
    w_refs = rest[:n_mats]
    recon_ref, ml_ref = rest[n_mats:]

    h = x_ref[...]
    for i, act in enumerate(acts):
        w = w_refs[i][...]
        if w.dtype != h.dtype:                       # bf16 MXU operands
            h = h.astype(w.dtype)
        y = jnp.dot(h, w, preferred_element_type=jnp.float32)
        y = y + b_ref[i:i + 1, :n_pads[i]]           # single stacked-bias operand
        if act == "leaky":
            h = jnp.maximum(y, LEAKY_SLOPE * y)
        elif act == "tanh":
            h = jnp.tanh(y)
        elif act == "head":
            # y: (tile_m, 2*eps_pad) = [mu | 0.. | logvar | 0..]  (lane-dense)
            ml_ref[...] = y
            mu = y[:, :eps_pad]
            logvar = y[:, eps_pad:]
            # reparameterize; padded lanes of eps are zero -> z padding stays 0
            h = eps_ref[...] * jnp.exp(0.5 * logvar) + mu
        else:  # "none"
            h = y
    recon_ref[...] = h


def _choose_tile_m(n_rows):
    """Row-tile policy: sublane-aligned, >=2 grid steps whenever possible so the
    'parallel' axis shards across both v7x TensorCores, capped at 256 rows to
    stay inside v7x's 64 MiB / v5e's 16 MiB-scoped VMEM budgets."""
    if n_rows < 16:
        return _round_up(n_rows, 8)
    half = _round_up((n_rows + 1) // 2, 8)
    return int(min(256, half))


def vae_forward(packed, x, eps):
    """Fused forward.  x: (B, C, T, F) f32; eps: (B*T, latent) f32.
    Returns (recon, x, mu, logvar) like VAE.forward."""
    B, C, T, F = x.shape
    N = B * T
    latent = packed["latent_dim"]
    eps_pad = packed["eps_pad"]
    f_out, c_out = packed["f_out"], packed["c_out"]
    in_pad, out_pad = packed["in_pad"], packed["out_pad"]
    weights, bias_stack = packed["weights"], packed["bias_stack"]
    acts, n_pads = packed["acts"], packed["n_pads"]

    tile_m = _choose_tile_m(N)
    n_rows_pad = _round_up(N, tile_m)
    grid = (n_rows_pad // tile_m,)

    # Boundary-only layout glue: rows are (B*T, F*C) f-major/c-minor, zero
    # padded to lane-dense (n_rows_pad, in_pad) and cast to the MXU dtype.
    rows = jnp.transpose(x, (0, 2, 3, 1)).reshape(N, F * C)
    rows = jnp.pad(rows, ((0, n_rows_pad - N), (0, in_pad - F * C)))
    rows = rows.astype(jnp.bfloat16 if MATMUL_IN_BF16 else jnp.float32)

    eps_full = jnp.zeros((n_rows_pad, eps_pad), jnp.float32)
    eps_full = eps_full.at[:N, :latent].set(eps.astype(jnp.float32))

    def row_spec(width):
        return pl.BlockSpec((tile_m, width), lambda i: (i, 0))

    def const_spec(shape):
        if WEIGHT_SINGLE_BUFFER:
            return pl.BlockSpec(shape, lambda i: (0, 0),
                                pipeline_mode=pl.Buffered(1))
        return pl.BlockSpec(shape, lambda i: (0, 0))

    in_specs = [row_spec(in_pad), row_spec(eps_pad), const_spec(bias_stack.shape)]
    operands = [rows, eps_full, bias_stack]
    for w in weights:
        in_specs.append(const_spec(w.shape))
        operands.append(w)

    out_shape = (jax.ShapeDtypeStruct((n_rows_pad, out_pad), jnp.float32),
                 jax.ShapeDtypeStruct((n_rows_pad, 2 * eps_pad), jnp.float32))
    out_specs = (row_spec(out_pad), row_spec(2 * eps_pad))

    kernel = functools.partial(_vae_fused_kernel, acts=acts, n_pads=n_pads,
                               eps_pad=eps_pad)
    recon_flat, ml = pl.pallas_call(
        kernel,
        out_shape=out_shape,
        grid=grid,
        in_specs=in_specs,
        out_specs=out_specs,
        compiler_params=pltpu.CompilerParams(dimension_semantics=("parallel",)),
    )(*operands)

    recon = jnp.transpose(
        recon_flat[:N, :f_out * c_out].reshape(B, T, f_out, c_out), (0, 3, 1, 2))
    mu = ml[:N, :latent].reshape(B, T, latent)
    logvar = ml[:N, eps_pad:eps_pad + latent].reshape(B, T, latent)
    return recon, x, mu, logvar


# -----------------------------------------------------------------------------
# One-time host-side weight preparation (numpy / tiny): conv -> banded matmul,
# BN folding, head fusion, rearrange-permutation absorption, 128-lane padding.
# -----------------------------------------------------------------------------
def _conv_banded(w, fin, stride):
    """Conv2d weight (Cout, Cin, 1, 3), stride (1,s), pad (0,1) -> dense
    (Fin*Cin, Fout*Cout) operator on f-major/c-minor flattened rows."""
    w = np.asarray(w, np.float32)
    cout, cin, _, K = w.shape
    fout = (fin + 2 - K) // stride + 1
    mat = np.zeros((fin, cin, fout, cout), np.float32)
    for k in range(K):
        wk = w[:, :, 0, k].T                       # (cin, cout)
        for fo in range(fout):
            fi = stride * fo + k - 1
            if 0 <= fi < fin:
                mat[fi, :, fo, :] += wk
    return mat.reshape(fin * cin, fout * cout), fout


def _convT_banded(w, fin, stride):
    """ConvTranspose2d weight (Cin, Cout, 1, 3), stride (1,s), pad (0,1) -> dense
    (Fin*Cin, Fout*Cout) operator (no zero-dilation / kernel flip needed)."""
    w = np.asarray(w, np.float32)
    cin, cout, _, K = w.shape
    fout = (fin - 1) * stride - 2 + K
    mat = np.zeros((fin, cin, fout, cout), np.float32)
    for k in range(K):
        wk = w[:, :, 0, k]                         # (cin, cout)
        for fi in range(fin):
            fo = stride * fi + k - 1
            if 0 <= fo < fout:
                mat[fi, :, fo, :] += wk
    return mat.reshape(fin * cin, fout * cout), fout


def _fold_affine(mat, fout, scale, shift):
    """Fold per-channel BN scale into the banded weight; shift -> bias vector."""
    scale = np.asarray(scale, np.float32)
    shift = np.asarray(shift, np.float32)
    w = mat * np.tile(scale, fout)[None, :]
    b = np.tile(shift, fout)
    return w, b


def _pad2(a, rows, cols):
    out = np.zeros((rows, cols), np.float32)
    out[:a.shape[0], :a.shape[1]] = a
    return out


def pack_params(params, in_features):
    c_last, fbin, latent = params["c_last"], params["fbin"], params["latent_dim"]
    eps_pad = _round_up(latent, LANE)

    raw = []                       # (w (Kreal,Nreal), b (Nreal,), act)
    f = in_features
    for layer in params["encoder"]:
        mat, f = _conv_banded(layer["w"], f, layer["stride"])
        w, b = _fold_affine(mat, f, layer["scale"], layer["shift"])
        raw.append((w, b, "leaky"))
    assert f == fbin, (f, fbin)

    # fc_mu | fc_var fused into one matmul.  Rows permuted from PyTorch's
    # rearrange('b c t f -> b t (c f)') c-major order to the resident f-major
    # order; mu goes in lanes [0:latent], logvar in [eps_pad:eps_pad+latent],
    # so the reparameterize and the combined mu|logvar output stay lane-aligned.
    def rows_cmaj_to_fmaj(w):
        w = np.asarray(w, np.float32)
        L = w.shape[1]
        return w.reshape(c_last, fbin, L).transpose(1, 0, 2).reshape(c_last * fbin, L)

    cf = c_last * fbin
    w_head = np.zeros((cf, 2 * eps_pad), np.float32)
    w_head[:, :latent] = rows_cmaj_to_fmaj(params["fc_mu_w"])
    w_head[:, eps_pad:eps_pad + latent] = rows_cmaj_to_fmaj(params["fc_var_w"])
    b_head = np.zeros((2 * eps_pad,), np.float32)
    b_head[:latent] = np.asarray(params["fc_mu_b"], np.float32)
    b_head[eps_pad:eps_pad + latent] = np.asarray(params["fc_var_b"], np.float32)
    raw.append((w_head, b_head, "head"))

    # pre_process: input z lives in lanes [0:latent] of an eps_pad-wide block;
    # output columns permuted from (c f) c-major to the resident f-major order.
    pre_w = np.asarray(params["pre_w"], np.float32).reshape(latent, c_last, fbin)
    pre_w = pre_w.transpose(0, 2, 1).reshape(latent, cf)
    pre_b = np.asarray(params["pre_b"], np.float32).reshape(c_last, fbin).T.reshape(cf)
    raw.append((pre_w, pre_b, "none"))

    f = fbin
    for layer in params["decoder"] + [params["post_convT"]]:
        mat, f = _convT_banded(layer["w"], f, layer["stride"])
        w, b = _fold_affine(mat, f, layer["scale"], layer["shift"])
        raw.append((w, b, "leaky"))

    pc = params["post_conv"]
    mat, f = _conv_banded(pc["w"], f, 1)
    c_out = int(np.asarray(pc["w"]).shape[0])
    w, b = _fold_affine(mat, f, pc["scale"], pc["shift"])
    raw.append((w, b, "tanh"))
    assert f == in_features, (f, in_features)

    # Lane-pad every K / N to a multiple of 128: all in-kernel matmuls,
    # activations and outputs become lane-dense (no masked vld/vst, no relayouts).
    weights, n_pads, acts = [], [], []
    for w, b, act in raw:
        k_pad = _round_up(w.shape[0], LANE)
        n_pad = _round_up(w.shape[1], LANE)
        wp = _pad2(w, k_pad, n_pad)
        weights.append(jnp.asarray(
            wp, jnp.bfloat16 if MATMUL_IN_BF16 else jnp.float32))
        n_pads.append(n_pad)
        acts.append(act)

    # Stack all biases into ONE f32 operand (cuts ~10 tiny BlockSpecs/DMAs).
    bmax = max(n_pads)
    bias_stack = np.zeros((len(raw), bmax), np.float32)
    for i, (w, b, act) in enumerate(raw):
        bias_stack[i, :b.shape[0]] = b

    return {"weights": weights, "bias_stack": jnp.asarray(bias_stack),
            "acts": tuple(acts), "n_pads": tuple(n_pads),
            "latent_dim": latent, "eps_pad": eps_pad,
            "in_pad": int(weights[0].shape[0]), "out_pad": n_pads[-1],
            "f_out": f, "c_out": c_out}


# -----------------------------------------------------------------------------
# Deterministic parameter init (mirrors VAE.__init__ shapes, inference-mode BN)
# -----------------------------------------------------------------------------
def init_params(key, in_features=33, latent_dim=16,
                channels=(2, 8, 16, 32, 64), fstride=(2, 2, 2, 1)):
    keys = iter(jax.random.split(key, 128))

    def nrm(shape, s=0.1):
        return (s * jax.random.normal(next(keys), shape)).astype(jnp.float32)

    def bn_fold(cout, conv_bias):
        gamma = 1.0 + nrm((cout,))
        beta = nrm((cout,))
        rmean = nrm((cout,))
        rvar = 0.5 + jnp.abs(nrm((cout,)))
        scale = gamma / jnp.sqrt(rvar + BN_EPS)
        shift = beta + (conv_bias - rmean) * scale
        return scale, shift

    fbin = (in_features >> list(fstride).count(2)) + 1
    params = {"fbin": fbin, "c_last": channels[-1], "latent_dim": latent_dim}

    enc = []
    for cin, cout, step in zip(channels[:-1], channels[1:], fstride):
        w = nrm((cout, cin, 1, 3))          # Conv2d weight
        b = nrm((cout,))
        scale, shift = bn_fold(cout, b)
        enc.append(dict(w=w, scale=scale, shift=shift, stride=step))
    params["encoder"] = enc

    cf = channels[-1] * fbin
    params["fc_mu_w"] = nrm((cf, latent_dim))
    params["fc_mu_b"] = nrm((latent_dim,))
    params["fc_var_w"] = nrm((cf, latent_dim))
    params["fc_var_b"] = nrm((latent_dim,))
    params["pre_w"] = nrm((latent_dim, cf))
    params["pre_b"] = nrm((cf,))

    rch = list(channels[::-1])
    rst = list(fstride[::-1])
    dec = []
    for cin, cout, step in zip(rch[:-1], rch[1:-1], rst):
        w = nrm((cin, cout, 1, 3))          # ConvTranspose2d weight
        b = nrm((cout,))
        scale, shift = bn_fold(cout, b)
        dec.append(dict(w=w, scale=scale, shift=shift, stride=step))
    params["decoder"] = dec

    cin, cout = rch[-2], rch[-1]
    w = nrm((cin, cout, 1, 3))
    b = nrm((cout,))
    scale, shift = bn_fold(cout, b)
    params["post_convT"] = dict(w=w, scale=scale, shift=shift, stride=fstride[0])

    w2 = nrm((cout, cout, 1, 3))
    b2 = nrm((cout,))
    params["post_conv"] = dict(w=w2, scale=jnp.ones((cout,), jnp.float32), shift=b2)
    return params


# -----------------------------------------------------------------------------
# Plain-JAX reference (im2col formulation) used only for a numerical cross-check
# -----------------------------------------------------------------------------
def _ref_affine(x, w, scale, shift, act):
    y = jnp.dot(x, w, precision=jax.lax.Precision.HIGHEST)
    y = y * scale[None, :] + shift[None, :]
    if act == "leaky_relu":
        y = jnp.where(y > 0, y, LEAKY_SLOPE * y)
    elif act == "tanh":
        y = jnp.tanh(y)
    return y


def _ref_im2col(xp, fout, stride):
    n, _, cin = xp.shape
    cols = jnp.stack(
        [xp[:, k: k + stride * (fout - 1) + 1: stride, :] for k in range(3)], axis=2)
    return cols.reshape(n * fout, 3 * cin)


def _ref_conv(rows, w, scale, shift, stride, act):
    n, fin, cin = rows.shape
    cout = w.shape[0]
    fout = (fin + 2 - 3) // stride + 1
    xp = jnp.pad(rows, ((0, 0), (1, 1), (0, 0)))
    x_col = _ref_im2col(xp, fout, stride)
    w_col = jnp.transpose(w[:, :, 0, :], (2, 1, 0)).reshape(3 * cin, cout)
    return _ref_affine(x_col, w_col, scale, shift, act).reshape(n, fout, cout)


def _ref_convT(rows, w, scale, shift, stride, act):
    n, fin, cin = rows.shape
    cout = w.shape[1]
    if stride > 1:
        ld = (fin - 1) * stride + 1
        xd = jnp.zeros((n, ld, cin), rows.dtype).at[:, ::stride, :].set(rows)
    else:
        xd = rows
    fout = xd.shape[1]
    xp = jnp.pad(xd, ((0, 0), (1, 1), (0, 0)))
    x_col = _ref_im2col(xp, fout, 1)
    w_eq = jnp.transpose(w[:, :, 0, ::-1], (1, 0, 2))
    w_col = jnp.transpose(w_eq, (2, 1, 0)).reshape(3 * cin, cout)
    return _ref_affine(x_col, w_col, scale, shift, act).reshape(n, fout, cout)


def reference_forward(params, x, eps):
    B, C, T, F = x.shape
    N = B * T
    rows = jnp.transpose(x, (0, 2, 3, 1)).reshape(N, F, C)
    for p in params["encoder"]:
        rows = _ref_conv(rows, p["w"], p["scale"], p["shift"], p["stride"], "leaky_relu")
    c_last, fbin, latent = params["c_last"], params["fbin"], params["latent_dim"]
    feat = jnp.transpose(rows, (0, 2, 1)).reshape(N, c_last * fbin)
    mu = jnp.dot(feat, params["fc_mu_w"],
                 precision=jax.lax.Precision.HIGHEST) + params["fc_mu_b"]
    logvar = jnp.dot(feat, params["fc_var_w"],
                     precision=jax.lax.Precision.HIGHEST) + params["fc_var_b"]
    z = eps * jnp.exp(0.5 * logvar) + mu
    h = jnp.dot(z, params["pre_w"],
                precision=jax.lax.Precision.HIGHEST) + params["pre_b"]
    rows = jnp.transpose(h.reshape(N, c_last, fbin), (0, 2, 1))
    for p in params["decoder"]:
        rows = _ref_convT(rows, p["w"], p["scale"], p["shift"], p["stride"], "leaky_relu")
    pp = params["post_convT"]
    rows = _ref_convT(rows, pp["w"], pp["scale"], pp["shift"], pp["stride"], "leaky_relu")
    pc = params["post_conv"]
    rows = _ref_conv(rows, pc["w"], pc["scale"], pc["shift"], 1, "tanh")
    recon = jnp.transpose(rows.reshape(B, T, F, C), (0, 3, 1, 2))
    return recon, x, mu.reshape(B, T, latent), logvar.reshape(B, T, latent)


# -----------------------------------------------------------------------------
if __name__ == "__main__":
    key = jax.random.PRNGKey(0)
    k_par, k_x, k_eps = jax.random.split(key, 3)

    # Small config consistent with the module: in_features=33 -> fbin=5,
    # channels=[2,8,16,32,64], latent_dim=16, fstride=(2,2,2,1).
    # T=16 gives N=B*T=32 rows -> the row-tile policy yields a 2-step
    # "parallel" grid (both v7x TensorCores used).
    B, C, T, F = 2, 2, 16, 33
    LATENT = 16
    params = init_params(k_par, in_features=F, latent_dim=LATENT,
                         channels=(2, 8, 16, 32, 64), fstride=(2, 2, 2, 1))
    packed = pack_params(params, in_features=F)     # one-time host weight prep

    x = jax.random.normal(k_x, (B, C, T, F), dtype=jnp.float32)
    # TODO(synk): torch.randn_like eps kept as an explicit input for determinism
    # / reference parity (could be generated in-kernel via pltpu.prng_seed +
    # pltpu.stateful_normal to drop the operand entirely).
    eps = jax.random.normal(k_eps, (B * T, LATENT), dtype=jnp.float32)

    fwd = jax.jit(lambda xx, ee: vae_forward(packed, xx, ee))
    try:
        recon, x_out, mu, logvar = fwd(x, eps)
        jax.block_until_ready(recon)
    except Exception:
        # Fallback: this jax/Mosaic build rejects single-buffered constant
        # blocks (pipeline_mode=pl.Buffered(1)); retry with default buffering.
        WEIGHT_SINGLE_BUFFER = False
        fwd = jax.jit(lambda xx, ee: vae_forward(packed, xx, ee))
        recon, x_out, mu, logvar = fwd(x, eps)
        jax.block_until_ready(recon)

    assert recon.shape == (B, C, T, F), recon.shape
    assert mu.shape == (B, T, LATENT) and logvar.shape == (B, T, LATENT)
    assert bool(jnp.all(jnp.isfinite(recon)))

    # Structural sanity check of the fused Pallas forward against the plain-JAX
    # im2col reference (bf16 MXU operands -> loose tolerance; a wrong
    # permutation / banding bug produces O(0.3+) errors, well above this).
    tol = 1e-1 if MATMUL_IN_BF16 else 2e-2
    r_recon, _, r_mu, r_lv = reference_forward(params, x, eps)
    assert jnp.allclose(recon, r_recon, atol=tol, rtol=tol), \
        float(jnp.max(jnp.abs(recon - r_recon)))
    assert jnp.allclose(mu, r_mu, atol=tol, rtol=tol), \
        float(jnp.max(jnp.abs(mu - r_mu)))
    assert jnp.allclose(logvar, r_lv, atol=tol, rtol=tol), \
        float(jnp.max(jnp.abs(logvar - r_lv)))

    print("KERNEL_OK")
</pallas_src>

<mosaic_0001>
module attributes {stable_mosaic.version = 11 : i64} {
  func.func @_vae_fused_kernel(%arg0: i32, %arg1: memref<16x128xbf16, #tpu.memory_space<vmem>>, %arg2: memref<16x128xf32, #tpu.memory_space<vmem>>, %arg3: memref<11x384xf32, #tpu.memory_space<vmem>>, %arg4: memref<128x256xbf16, #tpu.memory_space<vmem>>, %arg5: memref<256x256xbf16, #tpu.memory_space<vmem>>, %arg6: memref<256x256xbf16, #tpu.memory_space<vmem>>, %arg7: memref<256x384xbf16, #tpu.memory_space<vmem>>, %arg8: memref<384x256xbf16, #tpu.memory_space<vmem>>, %arg9: memref<128x384xbf16, #tpu.memory_space<vmem>>, %arg10: memref<384x256xbf16, #tpu.memory_space<vmem>>, %arg11: memref<256x256xbf16, #tpu.memory_space<vmem>>, %arg12: memref<256x256xbf16, #tpu.memory_space<vmem>>, %arg13: memref<256x128xbf16, #tpu.memory_space<vmem>>, %arg14: memref<128x128xbf16, #tpu.memory_space<vmem>>, %arg15: memref<16x128xf32, #tpu.memory_space<vmem>>, %arg16: memref<16x256xf32, #tpu.memory_space<vmem>>) attributes {dimension_semantics = [#tpu.dimension_semantics<parallel>], iteration_bounds = array<i64: 2>, scalar_prefetch = 0 : i64, scratch_operands = 0 : i64, tpu.core_type = #tpu.core_type<tc>, window_params = [{transform_indices = @transform_0, window_bounds = array<i64: 16, 128>}, {transform_indices = @transform_1, window_bounds = array<i64: 16, 128>}, {pipeline_mode = #tpu.pipeline_mode<synchronous>, transform_indices = @transform_2, window_bounds = array<i64: 11, 384>}, {pipeline_mode = #tpu.pipeline_mode<synchronous>, transform_indices = @transform_3, window_bounds = array<i64: 128, 256>}, {pipeline_mode = #tpu.pipeline_mode<synchronous>, transform_indices = @transform_4, window_bounds = array<i64: 256, 256>}, {pipeline_mode = #tpu.pipeline_mode<synchronous>, transform_indices = @transform_5, window_bounds = array<i64: 256, 256>}, {pipeline_mode = #tpu.pipeline_mode<synchronous>, transform_indices = @transform_6, window_bounds = array<i64: 256, 384>}, {pipeline_mode = #tpu.pipeline_mode<synchronous>, transform_indices = @transform_7, window_bounds = array<i64: 384, 256>}, {pipeline_mode = #tpu.pipeline_mode<synchronous>, transform_indices = @transform_8, window_bounds = array<i64: 128, 384>}, {pipeline_mode = #tpu.pipeline_mode<synchronous>, transform_indices = @transform_9, window_bounds = array<i64: 384, 256>}, {pipeline_mode = #tpu.pipeline_mode<synchronous>, transform_indices = @transform_10, window_bounds = array<i64: 256, 256>}, {pipeline_mode = #tpu.pipeline_mode<synchronous>, transform_indices = @transform_11, window_bounds = array<i64: 256, 256>}, {pipeline_mode = #tpu.pipeline_mode<synchronous>, transform_indices = @transform_12, window_bounds = array<i64: 256, 128>}, {pipeline_mode = #tpu.pipeline_mode<synchronous>, transform_indices = @transform_13, window_bounds = array<i64: 128, 128>}, {transform_indices = @transform_14, window_bounds = array<i64: 16, 128>}, {transform_indices = @transform_15, window_bounds = array<i64: 16, 256>}]} {
    %c0 = arith.constant 0 : index
    %c0_0 = arith.constant 0 : index
    %0 = vector.load %arg1[%c0, %c0_0] : memref<16x128xbf16, #tpu.memory_space<vmem>>, vector<16x128xbf16>
    %c0_1 = arith.constant 0 : index
    %c0_2 = arith.constant 0 : index
    %1 = vector.load %arg4[%c0_1, %c0_2] : memref<128x256xbf16, #tpu.memory_space<vmem>>, vector<128x256xbf16>
    %cst = arith.constant dense<0.000000e+00> : vector<16x256xf32>
    %2 = tpu.matmul %0, %1, %cst {dimension_numbers = #tpu.dot_dimension_numbers<[1], [0], [0], [1], [0, 0, 1, 1], [], []>} : vector<16x128xbf16>, vector<128x256xbf16>, vector<16x256xf32> -> vector<16x256xf32>
    %c0_3 = arith.constant 0 : index
    %c0_4 = arith.constant 0 : index
    %3 = vector.load %arg3[%c0_3, %c0_4] : memref<11x384xf32, #tpu.memory_space<vmem>>, vector<1x256xf32>
    %4 = vector.broadcast %3 : vector<1x256xf32> to vector<16x256xf32>
    %5 = arith.addf %2, %4 : vector<16x256xf32>
    %cst_5 = arith.constant 0.00999999977 : f32
    %6 = vector.broadcast %cst_5 : f32 to vector<16x256xf32>
    %7 = arith.mulf %6, %5 : vector<16x256xf32>
    %8 = arith.maximumf %5, %7 : vector<16x256xf32>
    %c0_6 = arith.constant 0 : index
    %c0_7 = arith.constant 0 : index
    %9 = vector.load %arg5[%c0_6, %c0_7] : memref<256x256xbf16, #tpu.memory_space<vmem>>, vector<256x256xbf16>
    %10 = arith.truncf %8 : vector<16x256xf32> to vector<16x256xbf16>
    %cst_8 = arith.constant dense<0.000000e+00> : vector<16x256xf32>
    %11 = tpu.matmul %10, %9, %cst_8 {dimension_numbers = #tpu.dot_dimension_numbers<[1], [0], [0], [1], [0, 0, 1, 1], [], []>} : vector<16x256xbf16>, vector<256x256xbf16>, vector<16x256xf32> -> vector<16x256xf32>
    %c1 = arith.constant 1 : index
    %c0_9 = arith.constant 0 : index
    %12 = vector.load %arg3[%c1, %c0_9] : memref<11x384xf32, #tpu.memory_space<vmem>>, vector<1x256xf32>
    %13 = vector.broadcast %12 : vector<1x256xf32> to vector<16x256xf32>
    %14 = arith.addf %11, %13 : vector<16x256xf32>
    %cst_10 = arith.constant 0.00999999977 : f32
    %15 = vector.broadcast %cst_10 : f32 to vector<16x256xf32>
    %16 = arith.mulf %15, %14 : vector<16x256xf32>
    %17 = arith.maximumf %14, %16 : vector<16x256xf32>
    %c0_11 = arith.constant 0 : index
    %c0_12 = arith.constant 0 : index
    %18 = vector.load %arg6[%c0_11, %c0_12] : memref<256x256xbf16, #tpu.memory_space<vmem>>, vector<256x256xbf16>
    %19 = arith.truncf %17 : vector<16x256xf32> to vector<16x256xbf16>
    %cst_13 = arith.constant dense<0.000000e+00> : vector<16x256xf32>
    %20 = tpu.matmul %19, %18, %cst_13 {dimension_numbers = #tpu.dot_dimension_numbers<[1], [0], [0], [1], [0, 0, 1, 1], [], []>} : vector<16x256xbf16>, vector<256x256xbf16>, vector<16x256xf32> -> vector<16x256xf32>
    %c2 = arith.constant 2 : index
    %c0_14 = arith.constant 0 : index
    %21 = vector.load %arg3[%c2, %c0_14] : memref<11x384xf32, #tpu.memory_space<vmem>>, vector<1x256xf32>
    %22 = vector.broadcast %21 : vector<1x256xf32> to vector<16x256xf32>
    %23 = arith.addf %20, %22 : vector<16x256xf32>
    %cst_15 = arith.constant 0.00999999977 : f32
    %24 = vector.broadcast %cst_15 : f32 to vector<16x256xf32>
    %25 = arith.mulf %24, %23 : vector<16x256xf32>
    %26 = arith.maximumf %23, %25 : vector<16x256xf32>
    %c0_16 = arith.constant 0 : index
    %c0_17 = arith.constant 0 : index
    %27 = vector.load %arg7[%c0_16, %c0_17] : memref<256x384xbf16, #tpu.memory_space<vmem>>, vector<256x384xbf16>
    %28 = arith.truncf %26 : vector<16x256xf32> to vector<16x256xbf16>
    %cst_18 = arith.constant dense<0.000000e+00> : vector<16x384xf32>
    %29 = tpu.matmul %28, %27, %cst_18 {dimension_numbers = #tpu.dot_dimension_numbers<[1], [0], [0], [1], [0, 0, 1, 1], [], []>} : vector<16x256xbf16>, vector<256x384xbf16>, vector<16x384xf32> -> vector<16x384xf32>
    %c3 = arith.constant 3 : index
    %c0_19 = arith.constant 0 : index
    %30 = vector.load %arg3[%c3, %c0_19] : memref<11x384xf32, #tpu.memory_space<vmem>>, vector<1x384xf32>
    %31 = vector.broadcast %30 : vector<1x384xf32> to vector<16x384xf32>
    %32 = arith.addf %29, %31 : vector<16x384xf32>
    %cst_20 = arith.constant 0.00999999977 : f32
    %33 = vector.broadcast %cst_20 : f32 to vector<16x384xf32>
    %34 = arith.mulf %33, %32 : vector<16x384xf32>
    %35 = arith.maximumf %32, %34 : vector<16x384xf32>
    %c0_21 = arith.constant 0 : index
    %c0_22 = arith.constant 0 : index
    %36 = vector.load %arg8[%c0_21, %c0_22] : memref<384x256xbf16, #tpu.memory_space<vmem>>, vector<384x256xbf16>
    %37 = arith.truncf %35 : vector<16x384xf32> to vector<16x384xbf16>
    %cst_23 = arith.constant dense<0.000000e+00> : vector<16x256xf32>
    %38 = tpu.matmul %37, %36, %cst_23 {dimension_numbers = #tpu.dot_dimension_numbers<[1], [0], [0], [1], [0, 0, 1, 1], [], []>} : vector<16x384xbf16>, vector<384x256xbf16>, vector<16x256xf32> -> vector<16x256xf32>
    %c4 = arith.constant 4 : index
    %c0_24 = arith.constant 0 : index
    %39 = vector.load %arg3[%c4, %c0_24] : memref<11x384xf32, #tpu.memory_space<vmem>>, vector<1x256xf32>
    %40 = vector.broadcast %39 : vector<1x256xf32> to vector<16x256xf32>
    %41 = arith.addf %38, %40 : vector<16x256xf32>
    %c0_25 = arith.constant 0 : index
    %c0_26 = arith.constant 0 : index
    %42 = vector.load %arg16[%c0_25, %c0_26] : memref<16x256xf32, #tpu.memory_space<vmem>>, vector<16x256xf32>
    tpu.vector_store %arg16[%c0_25, %c0_26], %41 {strides = array<i32>} : memref<16x256xf32, #tpu.memory_space<vmem>>, vector<16x256xf32>,
    %43 = vector.extract_strided_slice %41 {offsets = [0, 0], sizes = [16, 128], strides = [1, 1]} : vector<16x256xf32> to vector<16x128xf32>
    %44 = vector.extract_strided_slice %41 {offsets = [0, 128], sizes = [16, 128], strides = [1, 1]} : vector<16x256xf32> to vector<16x128xf32>
    %c0_27 = arith.constant 0 : index
    %c0_28 = arith.constant 0 : index
    %45 = vector.load %arg2[%c0_27, %c0_28] : memref<16x128xf32, #tpu.memory_space<vmem>>, vector<16x128xf32>
    %cst_29 = arith.constant 5.000000e-01 : f32
    %46 = vector.broadcast %cst_29 : f32 to vector<16x128xf32>
    %47 = arith.mulf %46, %44 : vector<16x128xf32>
    %48 = math.exp %47 : vector<16x128xf32>
    %49 = arith.mulf %45, %48 : vector<16x128xf32>
    %50 = arith.addf %49, %43 : vector<16x128xf32>
    %c0_30 = arith.constant 0 : index
    %c0_31 = arith.constant 0 : index
    %51 = vector.load %arg9[%c0_30, %c0_31] : memref<128x384xbf16, #tpu.memory_space<vmem>>, vector<128x384xbf16>
    %52 = arith.truncf %50 : vector<16x128xf32> to vector<16x128xbf16>
    %cst_32 = arith.constant dense<0.000000e+00> : vector<16x384xf32>
    %53 = tpu.matmul %52, %51, %cst_32 {dimension_numbers = #tpu.dot_dimension_numbers<[1], [0], [0], [1], [0, 0, 1, 1], [], []>} : vector<16x128xbf16>, vector<128x384xbf16>, vector<16x384xf32> -> vector<16x384xf32>
    %c5 = arith.constant 5 : index
    %c0_33 = arith.constant 0 : index
    %54 = vector.load %arg3[%c5, %c0_33] : memref<11x384xf32, #tpu.memory_space<vmem>>, vector<1x384xf32>
    %55 = vector.broadcast %54 : vector<1x384xf32> to vector<16x384xf32>
    %56 = arith.addf %53, %55 : vector<16x384xf32>
    %c0_34 = arith.constant 0 : index
    %c0_35 = arith.constant 0 : index
    %57 = vector.load %arg10[%c0_34, %c0_35] : memref<384x256xbf16, #tpu.memory_space<vmem>>, vector<384x256xbf16>
    %58 = arith.truncf %56 : vector<16x384xf32> to vector<16x384xbf16>
    %cst_36 = arith.constant dense<0.000000e+00> : vector<16x256xf32>
    %59 = tpu.matmul %58, %57, %cst_36 {dimension_numbers = #tpu.dot_dimension_numbers<[1], [0], [0], [1], [0, 0, 1, 1], [], []>} : vector<16x384xbf16>, vector<384x256xbf16>, vector<16x256xf32> -> vector<16x256xf32>
    %c6 = arith.constant 6 : index
    %c0_37 = arith.constant 0 : index
    %60 = vector.load %arg3[%c6, %c0_37] : memref<11x384xf32, #tpu.memory_space<vmem>>, vector<1x256xf32>
    %61 = vector.broadcast %60 : vector<1x256xf32> to vector<16x256xf32>
    %62 = arith.addf %59, %61 : vector<16x256xf32>
    %cst_38 = arith.constant 0.00999999977 : f32
    %63 = vector.broadcast %cst_38 : f32 to vector<16x256xf32>
    %64 = arith.mulf %63, %62 : vector<16x256xf32>
    %65 = arith.maximumf %62, %64 : vector<16x256xf32>
    %c0_39 = arith.constant 0 : index
    %c0_40 = arith.constant 0 : index
    %66 = vector.load %arg11[%c0_39, %c0_40] : memref<256x256xbf16, #tpu.memory_space<vmem>>, vector<256x256xbf16>
    %67 = arith.truncf %65 : vector<16x256xf32> to vector<16x256xbf16>
    %cst_41 = arith.constant dense<0.000000e+00> : vector<16x256xf32>
    %68 = tpu.matmul %67, %66, %cst_41 {dimension_numbers = #tpu.dot_dimension_numbers<[1], [0], [0], [1], [0, 0, 1, 1], [], []>} : vector<16x256xbf16>, vector<256x256xbf16>, vector<16x256xf32> -> vector<16x256xf32>
    %c7 = arith.constant 7 : index
    %c0_42 = arith.constant 0 : index
    %69 = vector.load %arg3[%c7, %c0_42] : memref<11x384xf32, #tpu.memory_space<vmem>>, vector<1x256xf32>
    %70 = vector.broadcast %69 : vector<1x256xf32> to vector<16x256xf32>
    %71 = arith.addf %68, %70 : vector<16x256xf32>
    %cst_43 = arith.constant 0.00999999977 : f32
    %72 = vector.broadcast %cst_43 : f32 to vector<16x256xf32>
    %73 = arith.mulf %72, %71 : vector<16x256xf32>
    %74 = arith.maximumf %71, %73 : vector<16x256xf32>
    %c0_44 = arith.constant 0 : index
    %c0_45 = arith.constant 0 : index
    %75 = vector.load %arg12[%c0_44, %c0_45] : memref<256x256xbf16, #tpu.memory_space<vmem>>, vector<256x256xbf16>
    %76 = arith.truncf %74 : vector<16x256xf32> to vector<16x256xbf16>
    %cst_46 = arith.constant dense<0.000000e+00> : vector<16x256xf32>
    %77 = tpu.matmul %76, %75, %cst_46 {dimension_numbers = #tpu.dot_dimension_numbers<[1], [0], [0], [1], [0, 0, 1, 1], [], []>} : vector<16x256xbf16>, vector<256x256xbf16>, vector<16x256xf32> -> vector<16x256xf32>
    %c8 = arith.constant 8 : index
    %c0_47 = arith.constant 0 : index
    %78 = vector.load %arg3[%c8, %c0_47] : memref<11x384xf32, #tpu.memory_space<vmem>>, vector<1x256xf32>
    %79 = vector.broadcast %78 : vector<1x256xf32> to vector<16x256xf32>
    %80 = arith.addf %77, %79 : vector<16x256xf32>
    %cst_48 = arith.constant 0.00999999977 : f32
    %81 = vector.broadcast %cst_48 : f32 to vector<16x256xf32>
    %82 = arith.mulf %81, %80 : vector<16x256xf32>
    %83 = arith.maximumf %80, %82 : vector<16x256xf32>
    %c0_49 = arith.constant 0 : index
    %c0_50 = arith.constant 0 : index
    %84 = vector.load %arg13[%c0_49, %c0_50] : memref<256x128xbf16, #tpu.memory_space<vmem>>, vector<256x128xbf16>
    %85 = arith.truncf %83 : vector<16x256xf32> to vector<16x256xbf16>
    %cst_51 = arith.constant dense<0.000000e+00> : vector<16x128xf32>
    %86 = tpu.matmul %85, %84, %cst_51 {dimension_numbers = #tpu.dot_dimension_numbers<[1], [0], [0], [1], [0, 0, 1, 1], [], []>} : vector<16x256xbf16>, vector<256x128xbf16>, vector<16x128xf32> -> vector<16x128xf32>
    %c9 = arith.constant 9 : index
    %c0_52 = arith.constant 0 : index
    %87 = vector.load %arg3[%c9, %c0_52] : memref<11x384xf32, #tpu.memory_space<vmem>>, vector<1x128xf32>
    %88 = vector.broadcast %87 : vector<1x128xf32> to vector<16x128xf32>
    %89 = arith.addf %86, %88 : vector<16x128xf32>
    %cst_53 = arith.constant 0.00999999977 : f32
    %90 = vector.broadcast %cst_53 : f32 to vector<16x128xf32>
    %91 = arith.mulf %90, %89 : vector<16x128xf32>
    %92 = arith.maximumf %89, %91 : vector<16x128xf32>
    %c0_54 = arith.constant 0 : index
    %c0_55 = arith.constant 0 : index
    %93 = vector.load %arg14[%c0_54, %c0_55] : memref<128x128xbf16, #tpu.memory_space<vmem>>, vector<128x128xbf16>
    %94 = arith.truncf %92 : vector<16x128xf32> to vector<16x128xbf16>
    %cst_56 = arith.constant dense<0.000000e+00> : vector<16x128xf32>
    %95 = tpu.matmul %94, %93, %cst_56 {dimension_numbers = #tpu.dot_dimension_numbers<[1], [0], [0], [1], [0, 0, 1, 1], [], []>} : vector<16x128xbf16>, vector<128x128xbf16>, vector<16x128xf32> -> vector<16x128xf32>
    %c10 = arith.constant 10 : index
    %c0_57 = arith.constant 0 : index
    %96 = vector.load %arg3[%c10, %c0_57] : memref<11x384xf32, #tpu.memory_space<vmem>>, vector<1x128xf32>
    %97 = vector.broadcast %96 : vector<1x128xf32> to vector<16x128xf32>
    %98 = arith.addf %95, %97 : vector<16x128xf32>
    %99 = math.tanh %98 : vector<16x128xf32>
    %c0_58 = arith.constant 0 : index
    %c0_59 = arith.constant 0 : index
    %100 = vector.load %arg15[%c0_58, %c0_59] : memref<16x128xf32, #tpu.memory_space<vmem>>, vector<16x128xf32>
    tpu.vector_store %arg15[%c0_58, %c0_59], %99 {strides = array<i32>} : memref<16x128xf32, #tpu.memory_space<vmem>>, vector<16x128xf32>,
    return
  }
  func.func @transform_0(%arg0: i32) -> (i32, i32) {
    %c0_i32 = arith.constant 0 : i32
    %c0_i32_0 = arith.constant 0 : i32
    return %arg0, %c0_i32 : i32, i32
  }
  func.func @transform_1(%arg0: i32) -> (i32, i32) {
    %c0_i32 = arith.constant 0 : i32
    %c0_i32_0 = arith.constant 0 : i32
    return %arg0, %c0_i32 : i32, i32
  }
  func.func @transform_2(%arg0: i32) -> (i32, i32) {
    %c0_i32 = arith.constant 0 : i32
    %c0_i32_0 = arith.constant 0 : i32
    %c0_i32_1 = arith.constant 0 : i32
    return %c0_i32, %c0_i32_0 : i32, i32
  }
  func.func @transform_3(%arg0: i32) -> (i32, i32) {
    %c0_i32 = arith.constant 0 : i32
    %c0_i32_0 = arith.constant 0 : i32
    %c0_i32_1 = arith.constant 0 : i32
    return %c0_i32, %c0_i32_0 : i32, i32
  }
  func.func @transform_4(%arg0: i32) -> (i32, i32) {
    %c0_i32 = arith.constant 0 : i32
    %c0_i32_0 = arith.constant 0 : i32
    %c0_i32_1 = arith.constant 0 : i32
    return %c0_i32, %c0_i32_0 : i32, i32
  }
  func.func @transform_5(%arg0: i32) -> (i32, i32) {
    %c0_i32 = arith.constant 0 : i32
    %c0_i32_0 = arith.constant 0 : i32
    %c0_i32_1 = arith.constant 0 : i32
    return %c0_i32, %c0_i32_0 : i32, i32
  }
  func.func @transform_6(%arg0: i32) -> (i32, i32) {
    %c0_i32 = arith.constant 0 : i32
    %c0_i32_0 = arith.constant 0 : i32
    %c0_i32_1 = arith.constant 0 : i32
    return %c0_i32, %c0_i32_0 : i32, i32
  }
  func.func @transform_7(%arg0: i32) -> (i32, i32) {
    %c0_i32 = arith.constant 0 : i32
    %c0_i32_0 = arith.constant 0 : i32
    %c0_i32_1 = arith.constant 0 : i32
    return %c0_i32, %c0_i32_0 : i32, i32
  }
  func.func @transform_8(%arg0: i32) -> (i32, i32) {
    %c0_i32 = arith.constant 0 : i32
    %c0_i32_0 = arith.constant 0 : i32
    %c0_i32_1 = arith.constant 0 : i32
    return %c0_i32, %c0_i32_0 : i32, i32
  }
  func.func @transform_9(%arg0: i32) -> (i32, i32) {
    %c0_i32 = arith.constant 0 : i32
    %c0_i32_0 = arith.constant 0 : i32
    %c0_i32_1 = arith.constant 0 : i32
    return %c0_i32, %c0_i32_0 : i32, i32
  }
  func.func @transform_10(%arg0: i32) -> (i32, i32) {
    %c0_i32 = arith.constant 0 : i32
    %c0_i32_0 = arith.constant 0 : i32
    %c0_i32_1 = arith.constant 0 : i32
    return %c0_i32, %c0_i32_0 : i32, i32
  }
  func.func @transform_11(%arg0: i32) -> (i32, i32) {
    %c0_i32 = arith.constant 0 : i32
    %c0_i32_0 = arith.constant 0 : i32
    %c0_i32_1 = arith.constant 0 : i32
    return %c0_i32, %c0_i32_0 : i32, i32
  }
  func.func @transform_12(%arg0: i32) -> (i32, i32) {
    %c0_i32 = arith.constant 0 : i32
    %c0_i32_0 = arith.constant 0 : i32
    %c0_i32_1 = arith.constant 0 : i32
    return %c0_i32, %c0_i32_0 : i32, i32
  }
  func.func @transform_13(%arg0: i32) -> (i32, i32) {
    %c0_i32 = arith.constant 0 : i32
    %c0_i32_0 = arith.constant 0 : i32
    %c0_i32_1 = arith.constant 0 : i32
    return %c0_i32, %c0_i32_0 : i32, i32
  }
  func.func @transform_14(%arg0: i32) -> (i32, i32) {
    %c0_i32 = arith.constant 0 : i32
    %c0_i32_0 = arith.constant 0 : i32
    return %arg0, %c0_i32 : i32, i32
  }
  func.func @transform_15(%arg0: i32) -> (i32, i32) {
    %c0_i32 = arith.constant 0 : i32
    %c0_i32_0 = arith.constant 0 : i32
    return %arg0, %c0_i32 : i32, i32
  }
}

module attributes {stable_mosaic.version = 11 : i64} {
  func.func @_vae_fused_kernel(%arg0: i32, %arg1: memref<16x128xbf16, #tpu.memory_space<vmem>>, %arg2: memref<16x128xf32, #tpu.memory_space<vmem>>, %arg3: memref<11x384xf32, #tpu.memory_space<vmem>>, %arg4: memref<128x256xbf16, #tpu.memory_space<vmem>>, %arg5: memref<256x256xbf16, #tpu.memory_space<vmem>>, %arg6: memref<256x256xbf16, #tpu.memory_space<vmem>>, %arg7: memref<256x384xbf16, #tpu.memory_space<vmem>>, %arg8: memref<384x256xbf16, #tpu.memory_space<vmem>>, %arg9: memref<128x384xbf16, #tpu.memory_space<vmem>>, %arg10: memref<384x256xbf16, #tpu.memory_space<vmem>>, %arg11: memref<256x256xbf16, #tpu.memory_space<vmem>>, %arg12: memref<256x256xbf16, #tpu.memory_space<vmem>>, %arg13: memref<256x128xbf16, #tpu.memory_space<vmem>>, %arg14: memref<128x128xbf16, #tpu.memory_space<vmem>>, %arg15: memref<16x128xf32, #tpu.memory_space<vmem>>, %arg16: memref<16x256xf32, #tpu.memory_space<vmem>>) attributes {dimension_semantics = [#tpu.dimension_semantics<parallel>], iteration_bounds = array<i64: 2>, scalar_prefetch = 0 : i64, scratch_operands = 0 : i64, tpu.core_type = #tpu.core_type<tc>, window_params = [{transform_indices = @transform_0, window_bounds = array<i64: 16, 128>}, {transform_indices = @transform_1, window_bounds = array<i64: 16, 128>}, {pipeline_mode = #tpu.pipeline_mode<synchronous>, transform_indices = @transform_2, window_bounds = array<i64: 11, 384>}, {pipeline_mode = #tpu.pipeline_mode<synchronous>, transform_indices = @transform_3, window_bounds = array<i64: 128, 256>}, {pipeline_mode = #tpu.pipeline_mode<synchronous>, transform_indices = @transform_4, window_bounds = array<i64: 256, 256>}, {pipeline_mode = #tpu.pipeline_mode<synchronous>, transform_indices = @transform_5, window_bounds = array<i64: 256, 256>}, {pipeline_mode = #tpu.pipeline_mode<synchronous>, transform_indices = @transform_6, window_bounds = array<i64: 256, 384>}, {pipeline_mode = #tpu.pipeline_mode<synchronous>, transform_indices = @transform_7, window_bounds = array<i64: 384, 256>}, {pipeline_mode = #tpu.pipeline_mode<synchronous>, transform_indices = @transform_8, window_bounds = array<i64: 128, 384>}, {pipeline_mode = #tpu.pipeline_mode<synchronous>, transform_indices = @transform_9, window_bounds = array<i64: 384, 256>}, {pipeline_mode = #tpu.pipeline_mode<synchronous>, transform_indices = @transform_10, window_bounds = array<i64: 256, 256>}, {pipeline_mode = #tpu.pipeline_mode<synchronous>, transform_indices = @transform_11, window_bounds = array<i64: 256, 256>}, {pipeline_mode = #tpu.pipeline_mode<synchronous>, transform_indices = @transform_12, window_bounds = array<i64: 256, 128>}, {pipeline_mode = #tpu.pipeline_mode<synchronous>, transform_indices = @transform_13, window_bounds = array<i64: 128, 128>}, {transform_indices = @transform_14, window_bounds = array<i64: 16, 128>}, {transform_indices = @transform_15, window_bounds = array<i64: 16, 256>}]} {
    %c0 = arith.constant 0 : index
    %c0_0 = arith.constant 0 : index
    %0 = vector.load %arg1[%c0, %c0_0] : memref<16x128xbf16, #tpu.memory_space<vmem>>, vector<16x128xbf16>
    %c0_1 = arith.constant 0 : index
    %c0_2 = arith.constant 0 : index
    %1 = vector.load %arg4[%c0_1, %c0_2] : memref<128x256xbf16, #tpu.memory_space<vmem>>, vector<128x256xbf16>
    %cst = arith.constant dense<0.000000e+00> : vector<16x256xf32>
    %2 = tpu.matmul %0, %1, %cst {dimension_numbers = #tpu.dot_dimension_numbers<[1], [0], [0], [1], [0, 0, 1, 1], [], []>} : vector<16x128xbf16>, vector<128x256xbf16>, vector<16x256xf32> -> vector<16x256xf32>
    %c0_3 = arith.constant 0 : index
    %c0_4 = arith.constant 0 : index
    %3 = vector.load %arg3[%c0_3, %c0_4] : memref<11x384xf32, #tpu.memory_space<vmem>>, vector<1x256xf32>
    %4 = vector.broadcast %3 : vector<1x256xf32> to vector<16x256xf32>
    %5 = arith.addf %2, %4 : vector<16x256xf32>
    %cst_5 = arith.constant 0.00999999977 : f32
    %6 = vector.broadcast %cst_5 : f32 to vector<16x256xf32>
    %7 = arith.mulf %6, %5 : vector<16x256xf32>
    %8 = arith.maximumf %5, %7 : vector<16x256xf32>
    %c0_6 = arith.constant 0 : index
    %c0_7 = arith.constant 0 : index
    %9 = vector.load %arg5[%c0_6, %c0_7] : memref<256x256xbf16, #tpu.memory_space<vmem>>, vector<256x256xbf16>
    %10 = arith.truncf %8 : vector<16x256xf32> to vector<16x256xbf16>
    %cst_8 = arith.constant dense<0.000000e+00> : vector<16x256xf32>
    %11 = tpu.matmul %10, %9, %cst_8 {dimension_numbers = #tpu.dot_dimension_numbers<[1], [0], [0], [1], [0, 0, 1, 1], [], []>} : vector<16x256xbf16>, vector<256x256xbf16>, vector<16x256xf32> -> vector<16x256xf32>
    %c1 = arith.constant 1 : index
    %c0_9 = arith.constant 0 : index
    %12 = vector.load %arg3[%c1, %c0_9] : memref<11x384xf32, #tpu.memory_space<vmem>>, vector<1x256xf32>
    %13 = vector.broadcast %12 : vector<1x256xf32> to vector<16x256xf32>
    %14 = arith.addf %11, %13 : vector<16x256xf32>
    %cst_10 = arith.constant 0.00999999977 : f32
    %15 = vector.broadcast %cst_10 : f32 to vector<16x256xf32>
    %16 = arith.mulf %15, %14 : vector<16x256xf32>
    %17 = arith.maximumf %14, %16 : vector<16x256xf32>
    %c0_11 = arith.constant 0 : index
    %c0_12 = arith.constant 0 : index
    %18 = vector.load %arg6[%c0_11, %c0_12] : memref<256x256xbf16, #tpu.memory_space<vmem>>, vector<256x256xbf16>
    %19 = arith.truncf %17 : vector<16x256xf32> to vector<16x256xbf16>
    %cst_13 = arith.constant dense<0.000000e+00> : vector<16x256xf32>
    %20 = tpu.matmul %19, %18, %cst_13 {dimension_numbers = #tpu.dot_dimension_numbers<[1], [0], [0], [1], [0, 0, 1, 1], [], []>} : vector<16x256xbf16>, vector<256x256xbf16>, vector<16x256xf32> -> vector<16x256xf32>
    %c2 = arith.constant 2 : index
    %c0_14 = arith.constant 0 : index
    %21 = vector.load %arg3[%c2, %c0_14] : memref<11x384xf32, #tpu.memory_space<vmem>>, vector<1x256xf32>
    %22 = vector.broadcast %21 : vector<1x256xf32> to vector<16x256xf32>
    %23 = arith.addf %20, %22 : vector<16x256xf32>
    %cst_15 = arith.constant 0.00999999977 : f32
    %24 = vector.broadcast %cst_15 : f32 to vector<16x256xf32>
    %25 = arith.mulf %24, %23 : vector<16x256xf32>
    %26 = arith.maximumf %23, %25 : vector<16x256xf32>
    %c0_16 = arith.constant 0 : index
    %c0_17 = arith.constant 0 : index
    %27 = vector.load %arg7[%c0_16, %c0_17] : memref<256x384xbf16, #tpu.memory_space<vmem>>, vector<256x384xbf16>
    %28 = arith.truncf %26 : vector<16x256xf32> to vector<16x256xbf16>
    %cst_18 = arith.constant dense<0.000000e+00> : vector<16x384xf32>
    %29 = tpu.matmul %28, %27, %cst_18 {dimension_numbers = #tpu.dot_dimension_numbers<[1], [0], [0], [1], [0, 0, 1, 1], [], []>} : vector<16x256xbf16>, vector<256x384xbf16>, vector<16x384xf32> -> vector<16x384xf32>
    %c3 = arith.constant 3 : index
    %c0_19 = arith.constant 0 : index
    %30 = vector.load %arg3[%c3, %c0_19] : memref<11x384xf32, #tpu.memory_space<vmem>>, vector<1x384xf32>
    %31 = vector.broadcast %30 : vector<1x384xf32> to vector<16x384xf32>
    %32 = arith.addf %29, %31 : vector<16x384xf32>
    %cst_20 = arith.constant 0.00999999977 : f32
    %33 = vector.broadcast %cst_20 : f32 to vector<16x384xf32>
    %34 = arith.mulf %33, %32 : vector<16x384xf32>
    %35 = arith.maximumf %32, %34 : vector<16x384xf32>
    %c0_21 = arith.constant 0 : index
    %c0_22 = arith.constant 0 : index
    %36 = vector.load %arg8[%c0_21, %c0_22] : memref<384x256xbf16, #tpu.memory_space<vmem>>, vector<384x256xbf16>
    %37 = arith.truncf %35 : vector<16x384xf32> to vector<16x384xbf16>
    %cst_23 = arith.constant dense<0.000000e+00> : vector<16x256xf32>
    %38 = tpu.matmul %37, %36, %cst_23 {dimension_numbers = #tpu.dot_dimension_numbers<[1], [0], [0], [1], [0, 0, 1, 1], [], []>} : vector<16x384xbf16>, vector<384x256xbf16>, vector<16x256xf32> -> vector<16x256xf32>
    %c4 = arith.constant 4 : index
    %c0_24 = arith.constant 0 : index
    %39 = vector.load %arg3[%c4, %c0_24] : memref<11x384xf32, #tpu.memory_space<vmem>>, vector<1x256xf32>
    %40 = vector.broadcast %39 : vector<1x256xf32> to vector<16x256xf32>
    %41 = arith.addf %38, %40 : vector<16x256xf32>
    %c0_25 = arith.constant 0 : index
    %c0_26 = arith.constant 0 : index
    %42 = vector.load %arg16[%c0_25, %c0_26] : memref<16x256xf32, #tpu.memory_space<vmem>>, vector<16x256xf32>
    tpu.vector_store %arg16[%c0_25, %c0_26], %41 {strides = array<i32>} : memref<16x256xf32, #tpu.memory_space<vmem>>, vector<16x256xf32>,
    %43 = vector.extract_strided_slice %41 {offsets = [0, 0], sizes = [16, 128], strides = [1, 1]} : vector<16x256xf32> to vector<16x128xf32>
    %44 = vector.extract_strided_slice %41 {offsets = [0, 128], sizes = [16, 128], strides = [1, 1]} : vector<16x256xf32> to vector<16x128xf32>
    %c0_27 = arith.constant 0 : index
    %c0_28 = arith.constant 0 : index
    %45 = vector.load %arg2[%c0_27, %c0_28] : memref<16x128xf32, #tpu.memory_space<vmem>>, vector<16x128xf32>
    %cst_29 = arith.constant 5.000000e-01 : f32
    %46 = vector.broadcast %cst_29 : f32 to vector<16x128xf32>
    %47 = arith.mulf %46, %44 : vector<16x128xf32>
    %48 = math.exp %47 : vector<16x128xf32>
    %49 = arith.mulf %45, %48 : vector<16x128xf32>
    %50 = arith.addf %49, %43 : vector<16x128xf32>
    %c0_30 = arith.constant 0 : index
    %c0_31 = arith.constant 0 : index
    %51 = vector.load %arg9[%c0_30, %c0_31] : memref<128x384xbf16, #tpu.memory_space<vmem>>, vector<128x384xbf16>
    %52 = arith.truncf %50 : vector<16x128xf32> to vector<16x128xbf16>
    %cst_32 = arith.constant dense<0.000000e+00> : vector<16x384xf32>
    %53 = tpu.matmul %52, %51, %cst_32 {dimension_numbers = #tpu.dot_dimension_numbers<[1], [0], [0], [1], [0, 0, 1, 1], [], []>} : vector<16x128xbf16>, vector<128x384xbf16>, vector<16x384xf32> -> vector<16x384xf32>
    %c5 = arith.constant 5 : index
    %c0_33 = arith.constant 0 : index
    %54 = vector.load %arg3[%c5, %c0_33] : memref<11x384xf32, #tpu.memory_space<vmem>>, vector<1x384xf32>
    %55 = vector.broadcast %54 : vector<1x384xf32> to vector<16x384xf32>
    %56 = arith.addf %53, %55 : vector<16x384xf32>
    %c0_34 = arith.constant 0 : index
    %c0_35 = arith.constant 0 : index
    %57 = vector.load %arg10[%c0_34, %c0_35] : memref<384x256xbf16, #tpu.memory_space<vmem>>, vector<384x256xbf16>
    %58 = arith.truncf %56 : vector<16x384xf32> to vector<16x384xbf16>
    %cst_36 = arith.constant dense<0.000000e+00> : vector<16x256xf32>
    %59 = tpu.matmul %58, %57, %cst_36 {dimension_numbers = #tpu.dot_dimension_numbers<[1], [0], [0], [1], [0, 0, 1, 1], [], []>} : vector<16x384xbf16>, vector<384x256xbf16>, vector<16x256xf32> -> vector<16x256xf32>
    %c6 = arith.constant 6 : index
    %c0_37 = arith.constant 0 : index
    %60 = vector.load %arg3[%c6, %c0_37] : memref<11x384xf32, #tpu.memory_space<vmem>>, vector<1x256xf32>
    %61 = vector.broadcast %60 : vector<1x256xf32> to vector<16x256xf32>
    %62 = arith.addf %59, %61 : vector<16x256xf32>
    %cst_38 = arith.constant 0.00999999977 : f32
    %63 = vector.broadcast %cst_38 : f32 to vector<16x256xf32>
    %64 = arith.mulf %63, %62 : vector<16x256xf32>
    %65 = arith.maximumf %62, %64 : vector<16x256xf32>
    %c0_39 = arith.constant 0 : index
    %c0_40 = arith.constant 0 : index
    %66 = vector.load %arg11[%c0_39, %c0_40] : memref<256x256xbf16, #tpu.memory_space<vmem>>, vector<256x256xbf16>
    %67 = arith.truncf %65 : vector<16x256xf32> to vector<16x256xbf16>
    %cst_41 = arith.constant dense<0.000000e+00> : vector<16x256xf32>
    %68 = tpu.matmul %67, %66, %cst_41 {dimension_numbers = #tpu.dot_dimension_numbers<[1], [0], [0], [1], [0, 0, 1, 1], [], []>} : vector<16x256xbf16>, vector<256x256xbf16>, vector<16x256xf32> -> vector<16x256xf32>
    %c7 = arith.constant 7 : index
    %c0_42 = arith.constant 0 : index
    %69 = vector.load %arg3[%c7, %c0_42] : memref<11x384xf32, #tpu.memory_space<vmem>>, vector<1x256xf32>
    %70 = vector.broadcast %69 : vector<1x256xf32> to vector<16x256xf32>
    %71 = arith.addf %68, %70 : vector<16x256xf32>
    %cst_43 = arith.constant 0.00999999977 : f32
    %72 = vector.broadcast %cst_43 : f32 to vector<16x256xf32>
    %73 = arith.mulf %72, %71 : vector<16x256xf32>
    %74 = arith.maximumf %71, %73 : vector<16x256xf32>
    %c0_44 = arith.constant 0 : index
    %c0_45 = arith.constant 0 : index
    %75 = vector.load %arg12[%c0_44, %c0_45] : memref<256x256xbf16, #tpu.memory_space<vmem>>, vector<256x256xbf16>
    %76 = arith.truncf %74 : vector<16x256xf32> to vector<16x256xbf16>
    %cst_46 = arith.constant dense<0.000000e+00> : vector<16x256xf32>
    %77 = tpu.matmul %76, %75, %cst_46 {dimension_numbers = #tpu.dot_dimension_numbers<[1], [0], [0], [1], [0, 0, 1, 1], [], []>} : vector<16x256xbf16>, vector<256x256xbf16>, vector<16x256xf32> -> vector<16x256xf32>
    %c8 = arith.constant 8 : index
    %c0_47 = arith.constant 0 : index
    %78 = vector.load %arg3[%c8, %c0_47] : memref<11x384xf32, #tpu.memory_space<vmem>>, vector<1x256xf32>
    %79 = vector.broadcast %78 : vector<1x256xf32> to vector<16x256xf32>
    %80 = arith.addf %77, %79 : vector<16x256xf32>
    %cst_48 = arith.constant 0.00999999977 : f32
    %81 = vector.broadcast %cst_48 : f32 to vector<16x256xf32>
    %82 = arith.mulf %81, %80 : vector<16x256xf32>
    %83 = arith.maximumf %80, %82 : vector<16x256xf32>
    %c0_49 = arith.constant 0 : index
    %c0_50 = arith.constant 0 : index
    %84 = vector.load %arg13[%c0_49, %c0_50] : memref<256x128xbf16, #tpu.memory_space<vmem>>, vector<256x128xbf16>
    %85 = arith.truncf %83 : vector<16x256xf32> to vector<16x256xbf16>
    %cst_51 = arith.constant dense<0.000000e+00> : vector<16x128xf32>
    %86 = tpu.matmul %85, %84, %cst_51 {dimension_numbers = #tpu.dot_dimension_numbers<[1], [0], [0], [1], [0, 0, 1, 1], [], []>} : vector<16x256xbf16>, vector<256x128xbf16>, vector<16x128xf32> -> vector<16x128xf32>
    %c9 = arith.constant 9 : index
    %c0_52 = arith.constant 0 : index
    %87 = vector.load %arg3[%c9, %c0_52] : memref<11x384xf32, #tpu.memory_space<vmem>>, vector<1x128xf32>
    %88 = vector.broadcast %87 : vector<1x128xf32> to vector<16x128xf32>
    %89 = arith.addf %86, %88 : vector<16x128xf32>
    %cst_53 = arith.constant 0.00999999977 : f32
    %90 = vector.broadcast %cst_53 : f32 to vector<16x128xf32>
    %91 = arith.mulf %90, %89 : vector<16x128xf32>
    %92 = arith.maximumf %89, %91 : vector<16x128xf32>
    %c0_54 = arith.constant 0 : index
    %c0_55 = arith.constant 0 : index
    %93 = vector.load %arg14[%c0_54, %c0_55] : memref<128x128xbf16, #tpu.memory_space<vmem>>, vector<128x128xbf16>
    %94 = arith.truncf %92 : vector<16x128xf32> to vector<16x128xbf16>
    %cst_56 = arith.constant dense<0.000000e+00> : vector<16x128xf32>
    %95 = tpu.matmul %94, %93, %cst_56 {dimension_numbers = #tpu.dot_dimension_numbers<[1], [0], [0], [1], [0, 0, 1, 1], [], []>} : vector<16x128xbf16>, vector<128x128xbf16>, vector<16x128xf32> -> vector<16x128xf32>
    %c10 = arith.constant 10 : index
    %c0_57 = arith.constant 0 : index
    %96 = vector.load %arg3[%c10, %c0_57] : memref<11x384xf32, #tpu.memory_space<vmem>>, vector<1x128xf32>
    %97 = vector.broadcast %96 : vector<1x128xf32> to vector<16x128xf32>
    %98 = arith.addf %95, %97 : vector<16x128xf32>
    %99 = math.tanh %98 : vector<16x128xf32>
    %c0_58 = arith.constant 0 : index
    %c0_59 = arith.constant 0 : index
    %100 = vector.load %arg15[%c0_58, %c0_59] : memref<16x128xf32, #tpu.memory_space<vmem>>, vector<16x128xf32>
    tpu.vector_store %arg15[%c0_58, %c0_59], %99 {strides = array<i32>} : memref<16x128xf32, #tpu.memory_space<vmem>>, vector<16x128xf32>,
    return
  }
  func.func @transform_0(%arg0: i32) -> (i32, i32) {
    %c0_i32 = arith.constant 0 : i32
    %c0_i32_0 = arith.constant 0 : i32
    return %arg0, %c0_i32 : i32, i32
  }
  func.func @transform_1(%arg0: i32) -> (i32, i32) {
    %c0_i32 = arith.constant 0 : i32
    %c0_i32_0 = arith.constant 0 : i32
    return %arg0, %c0_i32 : i32, i32
  }
  func.func @transform_2(%arg0: i32) -> (i32, i32) {
    %c0_i32 = arith.constant 0 : i32
    %c0_i32_0 = arith.constant 0 : i32
    %c0_i32_1 = arith.constant 0 : i32
    return %c0_i32, %c0_i32_0 : i32, i32
  }
  func.func @transform_3(%arg0: i32) -> (i32, i32) {
    %c0_i32 = arith.constant 0 : i32
    %c0_i32_0 = arith.constant 0 : i32
    %c0_i32_1 = arith.constant 0 : i32
    return %c0_i32, %c0_i32_0 : i32, i32
  }
  func.func @transform_4(%arg0: i32) -> (i32, i32) {
    %c0_i32 = arith.constant 0 : i32
    %c0_i32_0 = arith.constant 0 : i32
    %c0_i32_1 = arith.constant 0 : i32
    return %c0_i32, %c0_i32_0 : i32, i32
  }
  func.func @transform_5(%arg0: i32) -> (i32, i32) {
    %c0_i32 = arith.constant 0 : i32
    %c0_i32_0 = arith.constant 0 : i32
    %c0_i32_1 = arith.constant 0 : i32
    return %c0_i32, %c0_i32_0 : i32, i32
  }
  func.func @transform_6(%arg0: i32) -> (i32, i32) {
    %c0_i32 = arith.constant 0 : i32
    %c0_i32_0 = arith.constant 0 : i32
    %c0_i32_1 = arith.constant 0 : i32
    return %c0_i32, %c0_i32_0 : i32, i32
  }
  func.func @transform_7(%arg0: i32) -> (i32, i32) {
    %c0_i32 = arith.constant 0 : i32
    %c0_i32_0 = arith.constant 0 : i32
    %c0_i32_1 = arith.constant 0 : i32
    return %c0_i32, %c0_i32_0 : i32, i32
  }
  func.func @transform_8(%arg0: i32) -> (i32, i32) {
    %c0_i32 = arith.constant 0 : i32
    %c0_i32_0 = arith.constant 0 : i32
    %c0_i32_1 = arith.constant 0 : i32
    return %c0_i32, %c0_i32_0 : i32, i32
  }
  func.func @transform_9(%arg0: i32) -> (i32, i32) {
    %c0_i32 = arith.constant 0 : i32
    %c0_i32_0 = arith.constant 0 : i32
    %c0_i32_1 = arith.constant 0 : i32
    return %c0_i32, %c0_i32_0 : i32, i32
  }
  func.func @transform_10(%arg0: i32) -> (i32, i32) {
    %c0_i32 = arith.constant 0 : i32
    %c0_i32_0 = arith.constant 0 : i32
    %c0_i32_1 = arith.constant 0 : i32
    return %c0_i32, %c0_i32_0 : i32, i32
  }
  func.func @transform_11(%arg0: i32) -> (i32, i32) {
    %c0_i32 = arith.constant 0 : i32
    %c0_i32_0 = arith.constant 0 : i32
    %c0_i32_1 = arith.constant 0 : i32
    return %c0_i32, %c0_i32_0 : i32, i32
  }
  func.func @transform_12(%arg0: i32) -> (i32, i32) {
    %c0_i32 = arith.constant 0 : i32
    %c0_i32_0 = arith.constant 0 : i32
    %c0_i32_1 = arith.constant 0 : i32
    return %c0_i32, %c0_i32_0 : i32, i32
  }
  func.func @transform_13(%arg0: i32) -> (i32, i32) {
    %c0_i32 = arith.constant 0 : i32
    %c0_i32_0 = arith.constant 0 : i32
    %c0_i32_1 = arith.constant 0 : i32
    return %c0_i32, %c0_i32_0 : i32, i32
  }
  func.func @transform_14(%arg0: i32) -> (i32, i32) {
    %c0_i32 = arith.constant 0 : i32
    %c0_i32_0 = arith.constant 0 : i32
    return %arg0, %c0_i32 : i32, i32
  }
  func.func @transform_15(%arg0: i32) -> (i32, i32) {
    %c0_i32 = arith.constant 0 : i32
    %c0_i32_0 = arith.constant 0 : i32
    return %arg0, %c0_i32 : i32, i32
  }
}

</mosaic_0001>

<bundles_post_ra>
// kernel: _lambda_.1
= control target key start
LH: loop header
LB: loop body
LE: loop exit
PB: predicated region body
PF: predicated region fallthrough
CT: control target
= control target key end

     0   :  { %s4701_s18 = smov 0   ;;  %s5832_s0 = inlined_call_operand.vmem [shape: bf16[32,128], index: 0, kind: input, shape index: {}]   ;;  %s5833_s1 = inlined_call_operand.vmem [shape: f32[32,128], index: 1, kind: input, shape index: {}]   ;;  %s5834_s2 = inlined_call_operand.vmem [shape: f32[11,384], index: 2, kind: input, shape index: {}]   ;;  %s5835_s3 = inlined_call_operand.vmem [shape: bf16[128,256], index: 3, kind: input, shape index: {}]   ;;  %s5836_s4 = inlined_call_operand.vmem [shape: bf16[256,256], index: 4, kind: input, shape index: {}]   ;;  %s5837_s5 = inlined_call_operand.vmem [shape: bf16[256,256], index: 5, kind: input, shape index: {}]   ;;  %s5838_s6 = inlined_call_operand.vmem [shape: bf16[256,384], index: 6, kind: input, shape index: {}]   ;;  %s5839_s7 = inlined_call_operand.vmem [shape: bf16[384,256], index: 7, kind: input, shape index: {}]   ;;  %s5840_s8 = inlined_call_operand.vmem [shape: bf16[128,384], index: 8, kind: input, shape index: {}]   ;;  %s5841_s9 = inlined_call_operand.vmem [shape: bf16[384,256], index: 9, kind: input, shape index: {}]   ;;  %s5842_s10 = inlined_call_operand.vmem [shape: bf16[256,256], index: 10, kind: input, shape index: {}]   ;;  %s5843_s11 = inlined_call_operand.vmem [shape: bf16[256,256], index: 11, kind: input, shape index: {}]   ;;  %s5844_s12 = inlined_call_operand.vmem [shape: bf16[256,128], index: 12, kind: input, shape index: {}]   ;;  %s5845_s13 = inlined_call_operand.vmem [shape: bf16[128,128], index: 13, kind: input, shape index: {}]   ;;  %s5846_s14 = inlined_call_operand.vmem [shape: f32[32,128], index: 14, kind: output, shape index: {0}]   ;;  %s5847_s15 = inlined_call_operand.vmem [shape: f32[32,256], index: 15, kind: output, shape index: {1}]  }
   0x1 LB: > { %s3630_s19 = sadd.s32 4294967295, %s4616_s18   ;;  %p3634_p0 = scmp.ge.s32.totalorder %s4616_s18, 1  ;;  %s4616_s18 = sphi %s4701_s18, %s26_s18  }
   0x2   : > { %p452_p1 = scmp.lt.s32.totalorder %s4616_s18, 3 }
   0x4   : > { %p453_p2 = pnand %p3634_p0, %p452_p1 }
   0x5   : > { %v4121_v0 = vld [vmem:[%s5835_s3 + $0x4] ss:$8 sps:$4 sm:$0xff] (!%p453_p2)   ;;  %s3635_s22 = sshll.u32 (!%p453_p2), %s3630_s19, 1  ;;  %v4123_v1 = vld [vmem:[%s5835_s3] ss:$8 sps:$4 sm:$0xff] (!%p453_p2)   ;;  %v4618_v2 = vmov (!%p453_p2), 0  }
   0x6   : > { %456 = sbr.rel (%p453_p2) target bundleno = 2581 (0xa15), region = 76  ;;  %685 = vmatprep.mubr.bf16.mxu0 (!%p453_p2), %v4618_v2  ;;  %p512_p3 = scmp.lt.s32.totalorder (!%p453_p2), %s3635_s22, 3  ;;  %653 = vmatprep.subr.bf16.mxu0 (!%p453_p2), %v4121_v0  ;;  %v4124_v3 = vld [vmem:[%s5835_s3 + $0x14] ss:$8 sps:$4 sm:$0xff] (!%p453_p2)   ;;  %v4126_v4 = vld [vmem:[%s5835_s3 + $0x10] ss:$8 sps:$4 sm:$0xff] (!%p453_p2)  }
   0x7   : > { %654 = vmatpush1.bf16.msra.mxu0 (!%p453_p2), %v4123_v1  ;;  %v4127_v5 = vld [vmem:[%s5835_s3 + $0x24] ss:$8 sps:$4 sm:$0xff] (!%p453_p2)   ;;  %v4129_v6 = vld [vmem:[%s5835_s3 + $0x20] ss:$8 sps:$4 sm:$0xff] (!%p453_p2)   ;;  %v4130_v7 = vld [vmem:[%s5835_s3 + $0x34] ss:$8 sps:$4 sm:$0xff] (!%p453_p2)  }
   0x8   : > { %655 = vmatprep.subr.bf16.mxu0 (!%p453_p2), %v4124_v3  ;;  %v4132_v8 = vld [vmem:[%s5835_s3 + $0x30] ss:$8 sps:$4 sm:$0xff] (!%p453_p2)   ;;  %v4133_v9 = vld [vmem:[%s5835_s3 + $0x44] ss:$8 sps:$4 sm:$0xff] (!%p453_p2)   ;;  %v4148_v11 = vld [vmem:[%s5836_s4] ss:$8 sps:$4 sm:$0xff] (!%p453_p2)  }
   0x9   : > { %v4146_v10 = vld [vmem:[%s5836_s4 + $0x4] ss:$8 sps:$4 sm:$0xff] (!%p453_p2)   ;;  %v4149_v12 = vld [vmem:[%s5836_s4 + $0x14] ss:$8 sps:$4 sm:$0xff] (!%p453_p2)   ;;  %v4135_v13 = vld [vmem:[%s5835_s3 + $0x40] ss:$8 sps:$4 sm:$0xff] (!%p453_p2)  }
   0xa   : > { %911 = vmatprep.subr.bf16.mxu1 (!%p453_p2), %v4146_v10  ;;  %v4151_v14 = vld [vmem:[%s5836_s4 + $0x10] ss:$8 sps:$4 sm:$0xff] (!%p453_p2)   ;;  %v4136_v15 = vld [vmem:[%s5835_s3 + $0x54] ss:$8 sps:$4 sm:$0xff] (!%p453_p2)   ;;  %v4152_v16 = vld [vmem:[%s5836_s4 + $0x24] ss:$8 sps:$4 sm:$0xff] (!%p453_p2)  }
   0xb   : > { %656 = vmatpush1.bf16.msra.mxu0 (!%p453_p2), %v4126_v4  ;;  %912 = vmatpush1.bf16.msra.mxu1 (!%p453_p2), %v4148_v11  ;;  %v4138_v17 = vld [vmem:[%s5835_s3 + $0x50] ss:$8 sps:$4 sm:$0xff] (!%p453_p2)   ;;  %v4154_v18 = vld [vmem:[%s5836_s4 + $0x20] ss:$8 sps:$4 sm:$0xff] (!%p453_p2)   ;;  %v4139_v19 = vld [vmem:[%s5835_s3 + $0x64] ss:$8 sps:$4 sm:$0xff] (!%p453_p2)  }
   0xc   : > { %657 = vmatprep.subr.bf16.mxu0 (!%p453_p2), %v4127_v5  ;;  %913 = vmatprep.subr.bf16.mxu1 (!%p453_p2), %v4149_v12  ;;  %v4155_v20 = vld [vmem:[%s5836_s4 + $0x34] ss:$8 sps:$4 sm:$0xff] (!%p453_p2)   ;;  %v4141_v21 = vld [vmem:[%s5835_s3 + $0x60] ss:$8 sps:$4 sm:$0xff] (!%p453_p2)   ;;  %v4157_v22 = vld [vmem:[%s5836_s4 + $0x30] ss:$8 sps:$4 sm:$0xff] (!%p453_p2)  }
   0xd   : > { %s5849_s22 = smov (!%p512_p3, %s3635_s22), 3  ;;  %v4142_v23 = vld [vmem:[%s5835_s3 + $0x74] ss:$8 sps:$4 sm:$0xff]   ;;  %v4158_v24 = vld [vmem:[%s5836_s4 + $0x44] ss:$8 sps:$4 sm:$0xff]   ;;  %vm4620_vm0 = vmmov 0  }
   0xe   : > { %s3636_s16 = sshll.u32 %s5849_s22, 2  ;;  %v4144_v25 = vld [vmem:[%s5835_s3 + $0x70] ss:$8 sps:$4 sm:$0xff]   ;;  %v4160_v26 = vld [vmem:[%s5836_s4 + $0x40] ss:$8 sps:$4 sm:$0xff]   ;;  %s3991_s19 = sshll.u32 %s5849_s22, 4 }
   0xf   : > { %s4737_s25 = scalar_lea.vmem %s5832_s0, %s3636_s16  ;;  %658 = vmatpush1.bf16.msra.mxu0 %v4129_v6  ;;  %914 = vmatpush1.bf16.msra.mxu1 %v4151_v14  ;;  %v4161_v28 = vld [vmem:[%s5836_s4 + $0x54] ss:$8 sps:$4 sm:$0xff]   ;;  %v4163_v29 = vld [vmem:[%s5836_s4 + $0x50] ss:$8 sps:$4 sm:$0xff]   ;;  %v4164_v30 = vld [vmem:[%s5836_s4 + $0x64] ss:$8 sps:$4 sm:$0xff]   ;;  %s534_s21 = scalar_lea.vmem %s5847_s15, %s3991_s19 }
  0x10   : > { %659 = vmatprep.subr.bf16.mxu0 %v4130_v7  ;;  %915 = vmatprep.subr.bf16.mxu1 %v4152_v16  ;;  %v4145_v27 = vld [vmem:[%s4737_s25] sm:$0xff]   ;;  %v4167_v32 = vld [vmem:[%s5836_s4 + $0x74] ss:$8 sps:$4 sm:$0xff]   ;;  %v4169_v33 = vld [vmem:[%s5836_s4 + $0x70] ss:$8 sps:$4 sm:$0xff]   ;;  %s3638_s25 = sshll.u32 %s5849_s22, 3 }
  0x11   : > { %v4166_v31 = vld [vmem:[%s5836_s4 + $0x60] ss:$8 sps:$4 sm:$0xff]   ;;  %v4170_v34 = vld [vmem:[%s5836_s4 + $0x84] ss:$8 sps:$4 sm:$0xff]   ;;  %v4173_v36 = vld [vmem:[%s5836_s4 + $0x94] ss:$8 sps:$4 sm:$0xff]   ;;  %s521_s26 = scalar_lea.vmem %s5833_s1, %s3638_s25  ;;  %s527_s29 = scalar_lea.vmem %s5846_s14, %s3638_s25 }
  0x12   : > { %v4172_v35 = vld [vmem:[%s5836_s4 + $0x80] ss:$8 sps:$4 sm:$0xff]   ;;  %v4175_v37 = vld [vmem:[%s5836_s4 + $0x90] ss:$8 sps:$4 sm:$0xff]   ;;  %v4176_v38 = vld [vmem:[%s5836_s4 + $0xa4] ss:$8 sps:$4 sm:$0xff]  }
  0x13   : > { %660 = vmatpush1.bf16.msra.mxu0 %v4132_v8  ;;  %916 = vmatpush1.bf16.msra.mxu1 %v4154_v18  ;;  %v4178_v39 = vld [vmem:[%s5836_s4 + $0xa0] ss:$8 sps:$4 sm:$0xff]   ;;  %v4179_v40 = vld [vmem:[%s5836_s4 + $0xb4] ss:$8 sps:$4 sm:$0xff]   ;;  %v4181_v41 = vld [vmem:[%s5836_s4 + $0xb0] ss:$8 sps:$4 sm:$0xff]  }
  0x14   : > { %661 = vmatprep.subr.bf16.mxu0 %v4133_v9  ;;  %917 = vmatprep.subr.bf16.mxu1 %v4155_v20  ;;  %v4182_v42 = vld [vmem:[%s5836_s4 + $0xc4] ss:$8 sps:$4 sm:$0xff]   ;;  %v4184_v43 = vld [vmem:[%s5836_s4 + $0xc0] ss:$8 sps:$4 sm:$0xff]   ;;  %v4185_v44 = vld [vmem:[%s5836_s4 + $0xd4] ss:$8 sps:$4 sm:$0xff]  }
  0x15   : > { %v4187_v45 = vld [vmem:[%s5836_s4 + $0xd0] ss:$8 sps:$4 sm:$0xff]   ;;  %v4188_v46 = vld [vmem:[%s5836_s4 + $0xe4] ss:$8 sps:$4 sm:$0xff]   ;;  %v4190_v47 = vld [vmem:[%s5836_s4 + $0xe0] ss:$8 sps:$4 sm:$0xff]  }
  0x16   : > { %v4191_v48 = vld [vmem:[%s5836_s4 + $0xf4] ss:$8 sps:$4 sm:$0xff]   ;;  %v4193_v49 = vld [vmem:[%s5836_s4 + $0xf0] ss:$8 sps:$4 sm:$0xff]   ;;  %v4194_v50 = vld [vmem:[%s5837_s5] ss:$8 sps:$4 sm:$0xff]  }
  0x17   : > { %662 = vmatpush1.bf16.msra.mxu0 %v4135_v13  ;;  %918 = vmatpush1.bf16.msra.mxu1 %v4157_v22  ;;  %v4196_v51 = vld [vmem:[%s5837_s5 + $0x4] ss:$8 sps:$4 sm:$0xff]   ;;  %v4199_v52 = vld [vmem:[%s5837_s5 + $0x14] ss:$8 sps:$4 sm:$0xff]   ;;  %v4197_v53 = vld [vmem:[%s5837_s5 + $0x10] ss:$8 sps:$4 sm:$0xff]   ;;  %v557_v13 = vlaneseq }
  0x18   : > { %663 = vmatprep.subr.bf16.mxu0 %v4136_v15  ;;  %919 = vmatprep.subr.bf16.mxu1 %v4158_v24  ;;  %v4202_v54 = vld [vmem:[%s5837_s5 + $0x24] ss:$8 sps:$4 sm:$0xff]   ;;  %v4200_v55 = vld [vmem:[%s5837_s5 + $0x20] ss:$8 sps:$4 sm:$0xff]   ;;  %v4205_v56 = vld [vmem:[%s5837_s5 + $0x34] ss:$8 sps:$4 sm:$0xff]  }
  0x19   : > { %v4203_v57 = vld [vmem:[%s5837_s5 + $0x30] ss:$8 sps:$4 sm:$0xff]   ;;  %v4208_v58 = vld [vmem:[%s5837_s5 + $0x44] ss:$8 sps:$4 sm:$0xff]   ;;  %v4206_v59 = vld [vmem:[%s5837_s5 + $0x40] ss:$8 sps:$4 sm:$0xff]  }
  0x1a   : > { %v4211_v60 = vld [vmem:[%s5837_s5 + $0x54] ss:$8 sps:$4 sm:$0xff]   ;;  %v4209_v61 = vld [vmem:[%s5837_s5 + $0x50] ss:$8 sps:$4 sm:$0xff]   ;;  %v4214_v62 = vld [vmem:[%s5837_s5 + $0x64] ss:$8 sps:$4 sm:$0xff]  }
  0x1b   : > { %664 = vmatpush1.bf16.msra.mxu0 %v4138_v17  ;;  %920 = vmatpush1.bf16.msra.mxu1 %v4160_v26  ;;  %v4212_v63 = vld [vmem:[%s5837_s5 + $0x60] ss:$8 sps:$4 sm:$0xff]   ;;  %v4217_v0 = vld [vmem:[%s5837_s5 + $0x74] ss:$8 sps:$4 sm:$0xff]   ;;  %v4215_v1 = vld [vmem:[%s5837_s5 + $0x70] ss:$8 sps:$4 sm:$0xff]  }
  0x1c   : > { %665 = vmatprep.subr.bf16.mxu0 %v4139_v19  ;;  %921 = vmatprep.subr.bf16.mxu1 %v4161_v28  ;;  %v4220_v3 = vld [vmem:[%s5837_s5 + $0x84] ss:$8 sps:$4 sm:$0xff]   ;;  %v4218_v4 = vld [vmem:[%s5837_s5 + $0x80] ss:$8 sps:$4 sm:$0xff]   ;;  %v4223_v5 = vld [vmem:[%s5837_s5 + $0x94] ss:$8 sps:$4 sm:$0xff]  }
  0x1d   : > { %v4221_v6 = vld [vmem:[%s5837_s5 + $0x90] ss:$8 sps:$4 sm:$0xff]   ;;  %v4226_v7 = vld [vmem:[%s5837_s5 + $0xa4] ss:$8 sps:$4 sm:$0xff]   ;;  %v4224_v8 = vld [vmem:[%s5837_s5 + $0xa0] ss:$8 sps:$4 sm:$0xff]  }
  0x1e   : > { %v4229_v9 = vld [vmem:[%s5837_s5 + $0xb4] ss:$8 sps:$4 sm:$0xff]   ;;  %v4227_v10 = vld [vmem:[%s5837_s5 + $0xb0] ss:$8 sps:$4 sm:$0xff]   ;;  %v4232_v11 = vld [vmem:[%s5837_s5 + $0xc4] ss:$8 sps:$4 sm:$0xff]  }
  0x1f   : > { %666 = vmatpush1.bf16.msra.mxu0 %v4141_v21  ;;  %922 = vmatpush1.bf16.msra.mxu1 %v4163_v29  ;;  %v4230_v12 = vld [vmem:[%s5837_s5 + $0xc0] ss:$8 sps:$4 sm:$0xff]   ;;  %v4941_v14 = vshrl.u32 %v557_v13, 7 }
  0x20   : > { %667 = vmatprep.subr.bf16.mxu0 %v4142_v23  ;;  %923 = vmatprep.subr.bf16.mxu1 %v4164_v30  ;;  %v555_v16 = vld [vmem:[%s5834_s2] ss:$8 sm:$0x3] }
  0x21   : > { %v4944_v15 = vsub.s32 0, %v4941_v14  ;;  %v4950_v17 = vsub.s32 1, %v4941_v14 }
  0x23   : > { %668 = vmatpush1.bf16.msra.mxu0 %v4144_v25  ;;  %924 = vmatpush1.bf16.msra.mxu1 %v4166_v31  ;;  %v560_v18 = vrot.slane %v555_v16, %v4944_v15  ;;  %v564_v19 = vrot.slane %v555_v16, %v4950_v17 }
  0x24   : > { %925 = vmatprep.subr.bf16.mxu1 %v4167_v32  ;;  %1169 = vmatprep.subr.bf16.mxu0 %v4196_v51  ;;  %v4253_v51 = vld [vmem:[%s5838_s6 + $0x4c] ss:$12 sps:$4 sm:$0xff]  }
  0x26   : > { %686 = vmatmul.mubr.bf16.vlgmr.msra.gmra.mrb[0].mxu0 %v4145_v27 }
  0x27   : > { %926 = vmatpush1.bf16.msra.mxu1 %v4169_v33  ;;  %1170 = vmatpush1.bf16.msra.mxu0 %v4194_v50  ;;  %v4248_v50 = vld [vmem:[%s5838_s6 + $0x30] ss:$12 sps:$4 sm:$0xff]  }
  0x28   : > { %927 = vmatprep.subr.bf16.mxu1 %v4170_v34  ;;  %1171 = vmatprep.subr.bf16.mxu0 %v4199_v52  ;;  %v4251_v52 = vld [vmem:[%s5838_s6 + $0x48] ss:$12 sps:$4 sm:$0xff]  }
  0x2b   : > { %928 = vmatpush1.bf16.msra.mxu1 %v4172_v35  ;;  %1172 = vmatpush1.bf16.msra.mxu0 %v4197_v53  ;;  %v4256_v53 = vld [vmem:[%s5838_s6 + $0x64] ss:$12 sps:$4 sm:$0xff]  }
  0x2c   : > { %929 = vmatprep.subr.bf16.mxu1 %v4173_v36  ;;  %1173 = vmatprep.subr.bf16.mxu0 %v4202_v54  ;;  %v4254_v54 = vld [vmem:[%s5838_s6 + $0x60] ss:$12 sps:$4 sm:$0xff]  }
  0x2f   : > { %930 = vmatpush1.bf16.msra.mxu1 %v4175_v37  ;;  %1174 = vmatpush1.bf16.msra.mxu0 %v4200_v55  ;;  %v4259_v55 = vld [vmem:[%s5838_s6 + $0x7c] ss:$12 sps:$4 sm:$0xff]  }
  0x30   : > { %931 = vmatprep.subr.bf16.mxu1 %v4176_v38  ;;  %1175 = vmatprep.subr.bf16.mxu0 %v4205_v56  ;;  %v4235_v38 = vld [vmem:[%s5837_s5 + $0xd4] ss:$8 sps:$4 sm:$0xff]   ;;  %v4257_v56 = vld [vmem:[%s5838_s6 + $0x78] ss:$12 sps:$4 sm:$0xff]  }
  0x33   : > { %932 = vmatpush1.bf16.msra.mxu1 %v4178_v39  ;;  %1176 = vmatpush1.bf16.msra.mxu0 %v4203_v57  ;;  %v4233_v39 = vld [vmem:[%s5837_s5 + $0xd0] ss:$8 sps:$4 sm:$0xff]   ;;  %v4262_v57 = vld [vmem:[%s5838_s6 + $0x94] ss:$12 sps:$4 sm:$0xff]  }
  0x34   : > { %933 = vmatprep.subr.bf16.mxu1 %v4179_v40  ;;  %1177 = vmatprep.subr.bf16.mxu0 %v4208_v58  ;;  %v4238_v40 = vld [vmem:[%s5837_s5 + $0xe4] ss:$8 sps:$4 sm:$0xff]   ;;  %v4260_v58 = vld [vmem:[%s5838_s6 + $0x90] ss:$12 sps:$4 sm:$0xff]  }
  0x37   : > { %934 = vmatpush1.bf16.msra.mxu1 %v4181_v41  ;;  %1178 = vmatpush1.bf16.msra.mxu0 %v4206_v59  ;;  %v4236_v41 = vld [vmem:[%s5837_s5 + $0xe0] ss:$8 sps:$4 sm:$0xff]   ;;  %v4265_v59 = vld [vmem:[%s5838_s6 + $0xac] ss:$12 sps:$4 sm:$0xff]  }
  0x38   : > { %935 = vmatprep.subr.bf16.mxu1 %v4182_v42  ;;  %1179 = vmatprep.subr.bf16.mxu0 %v4211_v60  ;;  %v4241_v42 = vld [vmem:[%s5837_s5 + $0xf4] ss:$8 sps:$4 sm:$0xff]  }
  0x39   : > { %v4263_v60 = vld [vmem:[%s5838_s6 + $0xa8] ss:$12 sps:$4 sm:$0xff]  }
  0x3b   : > { %936 = vmatpush1.bf16.msra.mxu1 %v4184_v43  ;;  %1180 = vmatpush1.bf16.msra.mxu0 %v4209_v61  ;;  %v4239_v43 = vld [vmem:[%s5837_s5 + $0xf0] ss:$8 sps:$4 sm:$0xff]  }
  0x3c   : > { %937 = vmatprep.subr.bf16.mxu1 %v4185_v44  ;;  %1181 = vmatprep.subr.bf16.mxu0 %v4214_v62  ;;  %v4242_v44 = vld [vmem:[%s5838_s6] ss:$12 sps:$4 sm:$0xff]   ;;  %v4268_v61 = vld [vmem:[%s5838_s6 + $0xc4] ss:$12 sps:$4 sm:$0xff]  }
  0x3d   : > { %v4266_v62 = vld [vmem:[%s5838_s6 + $0xc0] ss:$12 sps:$4 sm:$0xff]  }
  0x3f   : > { %938 = vmatpush1.bf16.msra.mxu1 %v4187_v45  ;;  %1182 = vmatpush1.bf16.msra.mxu0 %v4212_v63  ;;  %v4244_v45 = vld [vmem:[%s5838_s6 + $0x4] ss:$12 sps:$4 sm:$0xff]   ;;  %v4273_v63 = vld [vmem:[%s5838_s6 + $0xdc] ss:$12 sps:$4 sm:$0xff]  }
  0x40   : > { %939 = vmatprep.subr.bf16.mxu1 %v4188_v46  ;;  %1183 = vmatprep.subr.bf16.mxu0 %v4217_v0  ;;  %v4247_v46 = vld [vmem:[%s5838_s6 + $0x1c] ss:$12 sps:$4 sm:$0xff]   ;;  %v4271_v0 = vld [vmem:[%s5838_s6 + $0xd8] ss:$12 sps:$4 sm:$0xff]  }
  0x43   : > { %940 = vmatpush1.bf16.msra.mxu1 %v4190_v47  ;;  %1184 = vmatpush1.bf16.msra.mxu0 %v4215_v1  ;;  %v4245_v47 = vld [vmem:[%s5838_s6 + $0x18] ss:$12 sps:$4 sm:$0xff]   ;;  %v4278_v1 = vld [vmem:[%s5838_s6 + $0xf4] ss:$12 sps:$4 sm:$0xff]  }
  0x44   : > { %941 = vmatprep.subr.bf16.mxu1 %v4191_v48  ;;  %1185 = vmatprep.subr.bf16.mxu0 %v4220_v3  ;;  %v4250_v48 = vld [vmem:[%s5838_s6 + $0x34] ss:$12 sps:$4 sm:$0xff]   ;;  %v4276_v3 = vld [vmem:[%s5838_s6 + $0xf0] ss:$12 sps:$4 sm:$0xff]  }
  0x47   : > { %942 = vmatpush1.bf16.msra.mxu1 %v4193_v49  ;;  %1186 = vmatpush1.bf16.msra.mxu0 %v4218_v4  ;;  %v4269_v49 = vld [vmem:[%s5838_s6 + $0xc8] ss:$12 sps:$4 sm:$0xff]   ;;  %v4283_v4 = vld [vmem:[%s5838_s6 + $0x10c] ss:$12 sps:$4 sm:$0xff]  }
  0x48   : > { %1187 = vmatprep.subr.bf16.mxu0 %v4223_v5  ;;  %1560 = vmatprep.subr.bf16.mxu1 %v4244_v45  ;;  %v4281_v5 = vld [vmem:[%s5838_s6 + $0x108] ss:$12 sps:$4 sm:$0xff]  }
  0x49   : > { %v4298_v45 = vld [vmem:[%s5838_s6 + $0x154] ss:$12 sps:$4 sm:$0xff]  }
  0x4b   : > { %1188 = vmatpush1.bf16.msra.mxu0 %v4221_v6  ;;  %v4288_v6 = vld [vmem:[%s5838_s6 + $0x124] ss:$12 sps:$4 sm:$0xff]  }
  0x4c   : > { %1189 = vmatprep.subr.bf16.mxu0 %v4226_v7  ;;  %v4286_v7 = vld [vmem:[%s5838_s6 + $0x120] ss:$12 sps:$4 sm:$0xff]  }
  0x4f   : > { %1190 = vmatpush1.bf16.msra.mxu0 %v4224_v8  ;;  %v3661_v8 = vld [vmem:[%s5834_s2 + $0x1] ss:$8 sm:$0x3] }
  0x50   : > { %1191 = vmatprep.subr.bf16.mxu0 %v4229_v9  ;;  %v744_v9 = vrot.slane %v3661_v8, %v4944_v15 }
  0x53   : > { %1192 = vmatpush1.bf16.msra.mxu0 %v4227_v10  ;;  %v748_v10 = vrot.slane %v3661_v8, %v4950_v17 }
  0x54   : > { %1193 = vmatprep.subr.bf16.mxu0 %v4232_v11 }
  0x57   : > { %1194 = vmatpush1.bf16.msra.mxu0 %v4230_v12 }
  0x58   : > { %1195 = vmatprep.subr.bf16.mxu0 %v4235_v38  ;;  %v4285_v38 = vld [vmem:[%s5838_s6 + $0x50] ss:$12 sps:$4 sm:$0xff]  }
  0x5b   : > { %1196 = vmatpush1.bf16.msra.mxu0 %v4233_v39  ;;  %v4289_v39 = vld [vmem:[%s5838_s6 + $0x128] ss:$12 sps:$4 sm:$0xff]  }
  0x5c   : > { %1197 = vmatprep.subr.bf16.mxu0 %v4238_v40  ;;  %v4290_v40 = vld [vmem:[%s5838_s6 + $0x68] ss:$12 sps:$4 sm:$0xff]  }
  0x5f   : > { %1198 = vmatpush1.bf16.msra.mxu0 %v4236_v41  ;;  %v4293_v41 = vld [vmem:[%s5838_s6 + $0x13c] ss:$12 sps:$4 sm:$0xff]  }
  0x60   : > { %1199 = vmatprep.subr.bf16.mxu0 %v4241_v42  ;;  %v4294_v42 = vld [vmem:[%s5838_s6 + $0x140] ss:$12 sps:$4 sm:$0xff]  }
  0x63   : > { %1200 = vmatpush1.bf16.msra.mxu0 %v4239_v43  ;;  %v4291_v43 = vld [vmem:[%s5838_s6 + $0x138] ss:$12 sps:$4 sm:$0xff]  }
  0x64   : > { %3992 = vmatprep.subr.bf16.mxu0 %v4269_v49  ;;  %v4303_v49 = vld [vmem:[%s5838_s6 + $0x16c] ss:$12 sps:$4 sm:$0xff]  }
  0xf9   : > { %v687_v20 = vpop.f32.mrb[0].mxu0 }
  0xfa   : > { %v688_v21 = vadd.f32 %v687_v20, %v560_v18  ;;  %v689_v22 = vpop.f32.mrb[1].mxu0 }
  0xfb   : > { %v690_v23 = vadd.f32 %v689_v22, %v564_v19  ;;  %v691_v24 = vpop.f32.mrb[2].mxu0 }
  0xfc   : > { %v696_v25 = vmul.f32 0.01, %v688_v21  ;;  %v692_v26 = vadd.f32 %v691_v24, %v560_v18  ;;  %v693_v27 = vpop.f32.mrb[3].mxu0 }
  0xfd   : > { %v697_v28 = vmul.f32 0.01, %v690_v23  ;;  %v694_v29 = vadd.f32 %v693_v27, %v564_v19 }
  0xfe   : > { %v698_v30 = vmul.f32 0.01, %v692_v26  ;;  %v700_v32 = vmax.f32 %v688_v21, %v696_v25 }
  0xff   : > { %v699_v31 = vmul.f32 0.01, %v694_v29  ;;  %v701_v34 = vmax.f32 %v690_v23, %v697_v28 }
 0x100   : > { %v702_v33 = vmax.f32 %v692_v26, %v698_v30 }
 0x101   : > { %v703_v35 = vmax.f32 %v694_v29, %v699_v31 }
 0x102   : > { %v736_v36 = vpack.c.bf16 %v702_v33, %v700_v32  ;;  %v4270_v32 = vld [vmem:[%s5838_s6 + $0x8] ss:$12 sps:$4 sm:$0xff]   ;;  %v4274_v33 = vld [vmem:[%s5838_s6 + $0xe0] ss:$12 sps:$4 sm:$0xff]  }
 0x103   : > { %v737_v37 = vpack.c.bf16 %v703_v35, %v701_v34  ;;  %v4275_v34 = vld [vmem:[%s5838_s6 + $0x20] ss:$12 sps:$4 sm:$0xff]   ;;  %v4279_v35 = vld [vmem:[%s5838_s6 + $0xf8] ss:$12 sps:$4 sm:$0xff]  }
 0x105   : > { %943 = vmatprep.mubr.bf16.mxu1 %v737_v37  ;;  %v4284_v37 = vld [vmem:[%s5838_s6 + $0x110] ss:$12 sps:$4 sm:$0xff]  }
 0x106   : > { %944 = vmatmul.mubr.bf16.vlgmr.msra.gmra.mrb[0].mxu1 %v736_v36  ;;  %v4280_v36 = vld [vmem:[%s5838_s6 + $0x38] ss:$12 sps:$4 sm:$0xff]  }
 0x107   : > { %1561 = vmatpush1.bf16.msra.mxu1 %v4242_v44  ;;  %v4295_v44 = vld [vmem:[%s5838_s6 + $0x80] ss:$12 sps:$4 sm:$0xff]  }
 0x108   : > { %1562 = vmatprep.subr.bf16.mxu1 %v4247_v46  ;;  %v4299_v46 = vld [vmem:[%s5838_s6 + $0x158] ss:$12 sps:$4 sm:$0xff]  }
 0x10b   : > { %1563 = vmatpush1.bf16.msra.mxu1 %v4245_v47  ;;  %v4296_v47 = vld [vmem:[%s5838_s6 + $0x150] ss:$12 sps:$4 sm:$0xff]  }
 0x10c   : > { %1564 = vmatprep.subr.bf16.mxu1 %v4250_v48  ;;  %v4300_v48 = vld [vmem:[%s5838_s6 + $0x98] ss:$12 sps:$4 sm:$0xff]  }
 0x10f   : > { %1565 = vmatpush1.bf16.msra.mxu1 %v4248_v50  ;;  %v4304_v50 = vld [vmem:[%s5838_s6 + $0x170] ss:$12 sps:$4 sm:$0xff]  }
 0x110   : > { %1566 = vmatprep.subr.bf16.mxu1 %v4253_v51  ;;  %v4301_v51 = vld [vmem:[%s5838_s6 + $0x168] ss:$12 sps:$4 sm:$0xff]  }
 0x113   : > { %1567 = vmatpush1.bf16.msra.mxu1 %v4251_v52  ;;  %v4305_v52 = vld [vmem:[%s5838_s6 + $0xb0] ss:$12 sps:$4 sm:$0xff]  }
 0x114   : > { %1568 = vmatprep.subr.bf16.mxu1 %v4256_v53  ;;  %v4308_v53 = vld [vmem:[%s5839_s7 + $0x4] ss:$8 sps:$4 sm:$0xff]  }
 0x117   : > { %1569 = vmatpush1.bf16.msra.mxu1 %v4254_v54  ;;  %v3694_v54 = vld [vmem:[%s5834_s2 + $0x2] ss:$8 sm:$0x3] }
 0x118   : > { %1570 = vmatprep.subr.bf16.mxu1 %v4259_v55  ;;  %v1002_v55 = vrot.slane %v3694_v54, %v4944_v15 }
 0x11b   : > { %1571 = vmatpush1.bf16.msra.mxu1 %v4257_v56  ;;  %v1006_v56 = vrot.slane %v3694_v54, %v4950_v17 }
 0x11c   : > { %1572 = vmatprep.subr.bf16.mxu1 %v4262_v57 }
 0x11f   : > { %1573 = vmatpush1.bf16.msra.mxu1 %v4260_v58 }
 0x120   : > { %1574 = vmatprep.subr.bf16.mxu1 %v4265_v59 }
 0x123   : > { %1575 = vmatpush1.bf16.msra.mxu1 %v4263_v60 }
 0x124   : > { %1576 = vmatprep.subr.bf16.mxu1 %v4268_v61 }
 0x127   : > { %1577 = vmatpush1.bf16.msra.mxu1 %v4266_v62 }
 0x128   : > { %1578 = vmatprep.subr.bf16.mxu1 %v4273_v63 }
 0x12b   : > { %1579 = vmatpush1.bf16.msra.mxu1 %v4271_v0 }
 0x12c   : > { %1580 = vmatprep.subr.bf16.mxu1 %v4278_v1 }
 0x12f   : > { %1581 = vmatpush1.bf16.msra.mxu1 %v4276_v3 }
 0x130   : > { %1582 = vmatprep.subr.bf16.mxu1 %v4283_v4 }
 0x133   : > { %1583 = vmatpush1.bf16.msra.mxu1 %v4281_v5 }
 0x134   : > { %1584 = vmatprep.subr.bf16.mxu1 %v4288_v6 }
 0x137   : > { %1585 = vmatpush1.bf16.msra.mxu1 %v4286_v7 }
 0x138   : > { %1586 = vmatprep.subr.bf16.mxu1 %v4293_v41  ;;  %v4345_v41 = vld [vmem:[%s5839_s7 + $0xd0] ss:$8 sps:$4 sm:$0xff]  }
 0x13b   : > { %1587 = vmatpush1.bf16.msra.mxu1 %v4291_v43  ;;  %v4348_v43 = vld [vmem:[%s5839_s7 + $0xe0] ss:$8 sps:$4 sm:$0xff]  }
 0x13c   : > { %1588 = vmatprep.subr.bf16.mxu1 %v4298_v45  ;;  %v4351_v45 = vld [vmem:[%s5839_s7 + $0xf0] ss:$8 sps:$4 sm:$0xff]  }
 0x13f   : > { %1589 = vmatpush1.bf16.msra.mxu1 %v4296_v47  ;;  %v4378_v47 = vld [vmem:[%s5840_s8] ss:$12 sps:$4 sm:$0xff]  }
 0x140   : > { %1590 = vmatprep.subr.bf16.mxu1 %v4303_v49  ;;  %v4383_v49 = vld [vmem:[%s5840_s8 + $0x1c] ss:$12 sps:$4 sm:$0xff]  }
 0x143   : > { %1591 = vmatpush1.bf16.msra.mxu1 %v4301_v51  ;;  %v3727_v51 = vld [vmem:[%s5834_s2 + $0x3] ss:$8 sm:$0x7] }
 0x144   : > { %v1296_v54 = vrot.slane %v3727_v51, %v4950_v17 }
 0x1d9   : > { %v945_v11 = vpop.f32.mrb[0].mxu1 }
 0x1da   : > { %v946_v12 = vadd.f32 %v945_v11, %v744_v9  ;;  %v947_v13 = vpop.f32.mrb[1].mxu1 }
 0x1db   : > { %v948_v16 = vadd.f32 %v947_v13, %v748_v10  ;;  %v949_v18 = vpop.f32.mrb[2].mxu1  ;;  %v4311_v13 = vld [vmem:[%s5839_s7 + $0x14] ss:$8 sps:$4 sm:$0xff]  }
 0x1dc   : > { %v954_v19 = vmul.f32 0.01, %v946_v12  ;;  %v950_v20 = vadd.f32 %v949_v18, %v744_v9  ;;  %v951_v21 = vpop.f32.mrb[3].mxu1  ;;  %v4314_v18 = vld [vmem:[%s5839_s7 + $0x24] ss:$8 sps:$4 sm:$0xff]  }
 0x1dd   : > { %v955_v22 = vmul.f32 0.01, %v948_v16  ;;  %v952_v23 = vadd.f32 %v951_v21, %v748_v10  ;;  %v4315_v21 = vld [vmem:[%s5839_s7 + $0x30] ss:$8 sps:$4 sm:$0xff]  }
 0x1de   : > { %v956_v24 = vmul.f32 0.01, %v950_v20  ;;  %v958_v26 = vmax.f32 %v946_v12, %v954_v19  ;;  %v4306_v12 = vld [vmem:[%s5839_s7] ss:$8 sps:$4 sm:$0xff]  }
 0x1df   : > { %v957_v25 = vmul.f32 0.01, %v952_v23  ;;  %v959_v28 = vmax.f32 %v948_v16, %v955_v22  ;;  %v4309_v16 = vld [vmem:[%s5839_s7 + $0x10] ss:$8 sps:$4 sm:$0xff]   ;;  %v4312_v19 = vld [vmem:[%s5839_s7 + $0x20] ss:$8 sps:$4 sm:$0xff]  }
 0x1e0   : > { %v960_v27 = vmax.f32 %v950_v20, %v956_v24  ;;  %v4317_v20 = vld [vmem:[%s5839_s7 + $0x34] ss:$8 sps:$4 sm:$0xff]   ;;  %v4320_v22 = vld [vmem:[%s5839_s7 + $0x44] ss:$8 sps:$4 sm:$0xff]  }
 0x1e1   : > { %v961_v29 = vmax.f32 %v952_v23, %v957_v25  ;;  %v4318_v23 = vld [vmem:[%s5839_s7 + $0x40] ss:$8 sps:$4 sm:$0xff]   ;;  %v4323_v24 = vld [vmem:[%s5839_s7 + $0x54] ss:$8 sps:$4 sm:$0xff]   ;;  %v4321_v25 = vld [vmem:[%s5839_s7 + $0x50] ss:$8 sps:$4 sm:$0xff]  }
 0x1e2   : > { %v994_v30 = vpack.c.bf16 %v960_v27, %v958_v26  ;;  %v4326_v26 = vld [vmem:[%s5839_s7 + $0x64] ss:$8 sps:$4 sm:$0xff]   ;;  %v4324_v27 = vld [vmem:[%s5839_s7 + $0x60] ss:$8 sps:$4 sm:$0xff]  }
 0x1e3   : > { %v995_v31 = vpack.c.bf16 %v961_v29, %v959_v28  ;;  %v4329_v28 = vld [vmem:[%s5839_s7 + $0x74] ss:$8 sps:$4 sm:$0xff]   ;;  %v4327_v29 = vld [vmem:[%s5839_s7 + $0x70] ss:$8 sps:$4 sm:$0xff]  }
 0x1e5   : > { %1201 = vmatprep.mubr.bf16.mxu0 %v995_v31  ;;  %v4330_v31 = vld [vmem:[%s5839_s7 + $0x80] ss:$8 sps:$4 sm:$0xff]  }
 0x1e6   : > { %1202 = vmatmul.mubr.bf16.vlgmr.msra.gmra.mrb[4].mxu0 %v994_v30  ;;  %v4332_v30 = vld [vmem:[%s5839_s7 + $0x84] ss:$8 sps:$4 sm:$0xff]  }
 0x1e7   : > { %3993 = vmatpush3.bf16.msra.mxu0 %v4270_v32  ;;  %v4335_v32 = vld [vmem:[%s5839_s7 + $0x94] ss:$8 sps:$4 sm:$0xff]  }
 0x1e8   : > { %3994 = vmatprep.subr.bf16.mxu0 %v4274_v33  ;;  %v4333_v33 = vld [vmem:[%s5839_s7 + $0x90] ss:$8 sps:$4 sm:$0xff]  }
 0x1eb   : > { %3995 = vmatpush3.bf16.msra.mxu0 %v4275_v34  ;;  %v4338_v34 = vld [vmem:[%s5839_s7 + $0xa4] ss:$8 sps:$4 sm:$0xff]  }
 0x1ec   : > { %3996 = vmatprep.subr.bf16.mxu0 %v4279_v35  ;;  %v4336_v35 = vld [vmem:[%s5839_s7 + $0xa0] ss:$8 sps:$4 sm:$0xff]  }
 0x1ef   : > { %3997 = vmatpush3.bf16.msra.mxu0 %v4280_v36  ;;  %v4341_v36 = vld [vmem:[%s5839_s7 + $0xb4] ss:$8 sps:$4 sm:$0xff]  }
 0x1f0   : > { %3998 = vmatprep.subr.bf16.mxu0 %v4284_v37  ;;  %v4339_v37 = vld [vmem:[%s5839_s7 + $0xb0] ss:$8 sps:$4 sm:$0xff]  }
 0x1f3   : > { %3999 = vmatpush3.bf16.msra.mxu0 %v4285_v38  ;;  %v4344_v38 = vld [vmem:[%s5839_s7 + $0xc4] ss:$8 sps:$4 sm:$0xff]  }
 0x1f4   : > { %4000 = vmatprep.subr.bf16.mxu0 %v4289_v39  ;;  %v4342_v39 = vld [vmem:[%s5839_s7 + $0xc0] ss:$8 sps:$4 sm:$0xff]  }
 0x1f7   : > { %4001 = vmatpush3.bf16.msra.mxu0 %v4290_v40  ;;  %v4347_v40 = vld [vmem:[%s5839_s7 + $0xd4] ss:$8 sps:$4 sm:$0xff]  }
 0x1f8   : > { %4002 = vmatprep.subr.bf16.mxu0 %v4294_v42  ;;  %v4350_v42 = vld [vmem:[%s5839_s7 + $0xe4] ss:$8 sps:$4 sm:$0xff]  }
 0x1fb   : > { %4003 = vmatpush3.bf16.msra.mxu0 %v4295_v44  ;;  %v4353_v44 = vld [vmem:[%s5839_s7 + $0xf4] ss:$8 sps:$4 sm:$0xff]  }
 0x1fc   : > { %4004 = vmatprep.subr.bf16.mxu0 %v4299_v46  ;;  %v4356_v46 = vld [vmem:[%s5839_s7 + $0x104] ss:$8 sps:$4 sm:$0xff]  }
 0x1ff   : > { %4005 = vmatpush3.bf16.msra.mxu0 %v4300_v48  ;;  %v4380_v48 = vld [vmem:[%s5840_s8 + $0x4] ss:$12 sps:$4 sm:$0xff]  }
 0x200   : > { %4006 = vmatprep.subr.bf16.mxu0 %v4304_v50  ;;  %2241 = vmatprep.subr.bf16.mxu1 %v4380_v48  ;;  %v4381_v50 = vld [vmem:[%s5840_s8 + $0x18] ss:$12 sps:$4 sm:$0xff]   ;;  %v4395_v48 = vld [vmem:[%s5840_s8 + $0x7c] ss:$12 sps:$4 sm:$0xff]  }
 0x203   : > { %4007 = vmatpush3.bf16.msra.mxu0 %v4305_v52  ;;  %v1299_v52 = vsub.s32 2, %v4941_v14  ;;  %v4523_v14 = vld [vmem:[%s5842_s10 + $0xd4] ss:$8 sps:$4 sm:$0xff]  }
 0x204   : > { %1960 = vmatprep.subr.bf16.mxu0 %v4308_v53  ;;  %v1292_v53 = vrot.slane %v3727_v51, %v4944_v15 }
 0x2b9   : > { %v1203_v57 = vpop.f32.mrb[4].mxu0 }
 0x2ba   : > { %v1204_v58 = vadd.f32 %v1203_v57, %v1002_v55  ;;  %v1205_v59 = vpop.f32.mrb[5].mxu0  ;;  %v1300_v57 = vrot.slane %v3727_v51, %v1299_v52  ;;  %v4396_v51 = vld [vmem:[%s5840_s8 + $0x90] ss:$12 sps:$4 sm:$0xff]  }
 0x2bb   : > { %v1206_v60 = vadd.f32 %v1205_v59, %v1006_v56  ;;  %v1207_v61 = vpop.f32.mrb[6].mxu0 }
 0x2bc   : > { %v1212_v62 = vmul.f32 0.01, %v1204_v58  ;;  %v1208_v63 = vadd.f32 %v1207_v61, %v1002_v55  ;;  %v1209_v0 = vpop.f32.mrb[7].mxu0 }
 0x2bd   : > { %v1213_v1 = vmul.f32 0.01, %v1206_v60  ;;  %v1210_v3 = vadd.f32 %v1209_v0, %v1006_v56 }
 0x2be   : > { %v1214_v4 = vmul.f32 0.01, %v1208_v63  ;;  %v1216_v6 = vmax.f32 %v1204_v58, %v1212_v62 }
 0x2bf   : > { %v1215_v5 = vmul.f32 0.01, %v1210_v3  ;;  %v1217_v8 = vmax.f32 %v1206_v60, %v1213_v1 }
 0x2c0   : > { %v1218_v7 = vmax.f32 %v1208_v63, %v1214_v4 }
 0x2c1   : > { %v1219_v9 = vmax.f32 %v1210_v3, %v1215_v5 }
 0x2c2   : > { %v1284_v10 = vpack.c.bf16 %v1218_v7, %v1216_v6 }
 0x2c3   : > { %v1285_v11 = vpack.c.bf16 %v1219_v9, %v1217_v8 }
 0x2c5   : > { %1592 = vmatprep.mubr.bf16.mxu1 %v1285_v11  ;;  %1635 = vmatprep.mubr.bf16.mxu0 %v1285_v11 }
 0x2c6   : > { %1593 = vmatmul.mubr.bf16.vlgmr.msra.gmra.mrb[4].mxu1 %v1284_v10  ;;  %1636 = vmatmul.mubr.bf16.vlgmr.msra.gmra.mrb[8].mxu0 %v1284_v10 }
 0x2c7   : > { %1961 = vmatpush1.bf16.msra.mxu0 %v4306_v12  ;;  %2273 = vmatprep.mubr.bf16.mxu1 %v4618_v2 }
 0x2c8   : > { %1962 = vmatprep.subr.bf16.mxu0 %v4311_v13  ;;  %2242 = vmatpush1.bf16.msra.mxu1 %v4378_v47  ;;  %v4390_v47 = vld [vmem:[%s5840_s8 + $0x60] ss:$12 sps:$4 sm:$0xff]  }
 0x2c9   : > { %2243 = vmatprep.subr.bf16.mxu1 %v4383_v49  ;;  %v4393_v49 = vld [vmem:[%s5840_s8 + $0x78] ss:$12 sps:$4 sm:$0xff]  }
 0x2cb   : > { %1963 = vmatpush1.bf16.msra.mxu0 %v4309_v16 }
 0x2cc   : > { %1964 = vmatprep.subr.bf16.mxu0 %v4314_v18  ;;  %2244 = vmatpush1.bf16.msra.mxu1 %v4381_v50  ;;  %v4398_v50 = vld [vmem:[%s5840_s8 + $0x94] ss:$12 sps:$4 sm:$0xff]  }
 0x2cf   : > { %1965 = vmatpush1.bf16.msra.mxu0 %v4312_v19 }
 0x2d0   : > { %1966 = vmatprep.subr.bf16.mxu0 %v4317_v20 }
 0x2d3   : > { %1967 = vmatpush1.bf16.msra.mxu0 %v4315_v21 }
 0x2d4   : > { %1968 = vmatprep.subr.bf16.mxu0 %v4320_v22 }
 0x2d7   : > { %1969 = vmatpush1.bf16.msra.mxu0 %v4318_v23 }
 0x2d8   : > { %1970 = vmatprep.subr.bf16.mxu0 %v4323_v24 }
 0x2db   : > { %1971 = vmatpush1.bf16.msra.mxu0 %v4321_v25 }
 0x2dc   : > { %1972 = vmatprep.subr.bf16.mxu0 %v4326_v26  ;;  %v4354_v26 = vld [vmem:[%s5839_s7 + $0x100] ss:$8 sps:$4 sm:$0xff]  }
 0x2df   : > { %1973 = vmatpush1.bf16.msra.mxu0 %v4324_v27  ;;  %v4359_v27 = vld [vmem:[%s5839_s7 + $0x114] ss:$8 sps:$4 sm:$0xff]  }
 0x2e0   : > { %1974 = vmatprep.subr.bf16.mxu0 %v4329_v28 }
 0x2e3   : > { %1975 = vmatpush1.bf16.msra.mxu0 %v4327_v29  ;;  %v4357_v29 = vld [vmem:[%s5839_s7 + $0x110] ss:$8 sps:$4 sm:$0xff]  }
 0x2e4   : > { %1976 = vmatprep.subr.bf16.mxu0 %v4332_v30  ;;  %v4362_v30 = vld [vmem:[%s5839_s7 + $0x124] ss:$8 sps:$4 sm:$0xff]  }
 0x2e7   : > { %1977 = vmatpush1.bf16.msra.mxu0 %v4330_v31  ;;  %v4360_v31 = vld [vmem:[%s5839_s7 + $0x120] ss:$8 sps:$4 sm:$0xff]  }
 0x2e8   : > { %1978 = vmatprep.subr.bf16.mxu0 %v4335_v32  ;;  %v4365_v32 = vld [vmem:[%s5839_s7 + $0x134] ss:$8 sps:$4 sm:$0xff]  }
 0x2eb   : > { %1979 = vmatpush1.bf16.msra.mxu0 %v4333_v33  ;;  %v4363_v33 = vld [vmem:[%s5839_s7 + $0x130] ss:$8 sps:$4 sm:$0xff]  }
 0x2ec   : > { %1980 = vmatprep.subr.bf16.mxu0 %v4338_v34  ;;  %v4368_v34 = vld [vmem:[%s5839_s7 + $0x144] ss:$8 sps:$4 sm:$0xff]  }
 0x2ef   : > { %1981 = vmatpush1.bf16.msra.mxu0 %v4336_v35  ;;  %v4366_v35 = vld [vmem:[%s5839_s7 + $0x140] ss:$8 sps:$4 sm:$0xff]  }
 0x2f0   : > { %1982 = vmatprep.subr.bf16.mxu0 %v4341_v36  ;;  %v4371_v36 = vld [vmem:[%s5839_s7 + $0x154] ss:$8 sps:$4 sm:$0xff]  }
 0x2f3   : > { %1983 = vmatpush1.bf16.msra.mxu0 %v4339_v37  ;;  %v4369_v37 = vld [vmem:[%s5839_s7 + $0x150] ss:$8 sps:$4 sm:$0xff]  }
 0x2f4   : > { %1984 = vmatprep.subr.bf16.mxu0 %v4344_v38  ;;  %v4374_v38 = vld [vmem:[%s5839_s7 + $0x164] ss:$8 sps:$4 sm:$0xff]  }
 0x2f7   : > { %1985 = vmatpush1.bf16.msra.mxu0 %v4342_v39  ;;  %v4372_v39 = vld [vmem:[%s5839_s7 + $0x160] ss:$8 sps:$4 sm:$0xff]  }
 0x2f8   : > { %1986 = vmatprep.subr.bf16.mxu0 %v4347_v40  ;;  %v4377_v40 = vld [vmem:[%s5839_s7 + $0x174] ss:$8 sps:$4 sm:$0xff]  }
 0x2fb   : > { %1987 = vmatpush1.bf16.msra.mxu0 %v4345_v41  ;;  %v4375_v41 = vld [vmem:[%s5839_s7 + $0x170] ss:$8 sps:$4 sm:$0xff]  }
 0x2fc   : > { %1988 = vmatprep.subr.bf16.mxu0 %v4350_v42  ;;  %v4386_v42 = vld [vmem:[%s5840_s8 + $0x34] ss:$12 sps:$4 sm:$0xff]  }
 0x2fd   : > { %2245 = vmatprep.subr.bf16.mxu1 %v4386_v42  ;;  %v4433_v42 = vld [vmem:[%s5841_s9 + $0x74] ss:$8 sps:$4 sm:$0xff]  }
 0x2ff   : > { %1989 = vmatpush1.bf16.msra.mxu0 %v4348_v43  ;;  %v4384_v43 = vld [vmem:[%s5840_s8 + $0x30] ss:$12 sps:$4 sm:$0xff]  }
 0x300   : > { %1990 = vmatprep.subr.bf16.mxu0 %v4353_v44  ;;  %2246 = vmatpush1.bf16.msra.mxu1 %v4384_v43  ;;  %v4389_v44 = vld [vmem:[%s5840_s8 + $0x4c] ss:$12 sps:$4 sm:$0xff]  }
 0x301   : > { %2247 = vmatprep.subr.bf16.mxu1 %v4389_v44  ;;  %v4431_v43 = vld [vmem:[%s5841_s9 + $0x70] ss:$8 sps:$4 sm:$0xff]   ;;  %v4436_v44 = vld [vmem:[%s5841_s9 + $0x84] ss:$8 sps:$4 sm:$0xff]  }
 0x303   : > { %1991 = vmatpush1.bf16.msra.mxu0 %v4351_v45  ;;  %v4387_v45 = vld [vmem:[%s5840_s8 + $0x48] ss:$12 sps:$4 sm:$0xff]  }
 0x304   : > { %2003 = vmatprep.subr.bf16.mxu0 %v4356_v46  ;;  %2248 = vmatpush1.bf16.msra.mxu1 %v4387_v45  ;;  %v4392_v46 = vld [vmem:[%s5840_s8 + $0x64] ss:$12 sps:$4 sm:$0xff]   ;;  %v4434_v45 = vld [vmem:[%s5841_s9 + $0x80] ss:$8 sps:$4 sm:$0xff]  }
 0x305   : > { %2249 = vmatprep.subr.bf16.mxu1 %v4392_v46  ;;  %v4439_v46 = vld [vmem:[%s5841_s9 + $0x94] ss:$8 sps:$4 sm:$0xff]  }
 0x308   : > { %2250 = vmatpush1.bf16.msra.mxu1 %v4390_v47  ;;  %v4437_v47 = vld [vmem:[%s5841_s9 + $0x90] ss:$8 sps:$4 sm:$0xff]  }
 0x309   : > { %2251 = vmatprep.subr.bf16.mxu1 %v4395_v48  ;;  %v4442_v48 = vld [vmem:[%s5841_s9 + $0xa4] ss:$8 sps:$4 sm:$0xff]  }
 0x30c   : > { %2252 = vmatpush1.bf16.msra.mxu1 %v4393_v49  ;;  %v4440_v49 = vld [vmem:[%s5841_s9 + $0xa0] ss:$8 sps:$4 sm:$0xff]  }
 0x30d   : > { %2253 = vmatprep.subr.bf16.mxu1 %v4398_v50  ;;  %v4445_v50 = vld [vmem:[%s5841_s9 + $0xb4] ss:$8 sps:$4 sm:$0xff]  }
 0x310   : > { %2254 = vmatpush1.bf16.msra.mxu1 %v4396_v51  ;;  %v4443_v51 = vld [vmem:[%s5841_s9 + $0xb0] ss:$8 sps:$4 sm:$0xff]  }
 0x399   : > { %v1594_v55 = vpop.f32.mrb[4].mxu1  ;;  %v4008_v56 = vpop.f32.mrb[8].mxu0 }
 0x39a   : > { %v1595_v58 = vadd.f32 %v1594_v55, %v1292_v53  ;;  %v1596_v59 = vpop.f32.mrb[5].mxu1  ;;  %v4009_v60 = vpop.f32.mrb[9].mxu0  ;;  %v4619_v55 = vmov 0.0  }
 0x39b   : > { %v1597_v61 = vadd.f32 %v1596_v59, %v1296_v54  ;;  %v4010_v62 = vadd.f32 %v4009_v60, %v4008_v56  ;;  %v1598_v63 = vpop.f32.mrb[6].mxu1  ;;  %v4011_v0 = vpop.f32.mrb[10].mxu0  ;;  %v3776_v56 = vld [vmem:[%s5834_s2 + $0x4] ss:$8 sm:$0x3] }
 0x39c   : > { %v1644_v1 = vmul.f32 0.01, %v1595_v58  ;;  %v1599_v3 = vadd.f32 %v1598_v63, %v1292_v53  ;;  %v1600_v4 = vpop.f32.mrb[7].mxu1  ;;  %v4012_v5 = vpop.f32.mrb[11].mxu0  ;;  %v4401_v53 = vld [vmem:[%s5840_s8 + $0xac] ss:$12 sps:$4 sm:$0xff]  }
 0x39d   : > { %v1645_v6 = vmul.f32 0.01, %v1597_v61  ;;  %v1638_v7 = vadd.f32 %v4010_v62, %v1300_v57  ;;  %v1601_v8 = vadd.f32 %v1600_v4, %v1296_v54  ;;  %v4013_v9 = vadd.f32 %v4012_v5, %v4011_v0  ;;  %v4399_v54 = vld [vmem:[%s5840_s8 + $0xa8] ss:$12 sps:$4 sm:$0xff]   ;;  %2255 = vmatprep.subr.bf16.mxu1 %v4401_v53  ;;  %v4448_v53 = vld [vmem:[%s5841_s9 + $0xc4] ss:$8 sps:$4 sm:$0xff]  }
 0x39e   : > { %v1647_v10 = vmul.f32 0.01, %v1599_v3  ;;  %v1650_v16 = vmax.f32 %v1595_v58, %v1644_v1  ;;  %2256 = vmatpush1.bf16.msra.mxu1 %v4399_v54  ;;  %v1717_v58 = vrot.slane %v3776_v56, %v4950_v17  ;;  %v4446_v54 = vld [vmem:[%s5841_s9 + $0xc0] ss:$8 sps:$4 sm:$0xff]  }
 0x39f   : > { %v1646_v11 = vmul.f32 0.01, %v1638_v7  ;;  %v1648_v12 = vmul.f32 0.01, %v1601_v8  ;;  %v1641_v13 = vadd.f32 %v4013_v9, %v1300_v57  ;;  %v1651_v19 = vmax.f32 %v1597_v61, %v1645_v6  ;;  %4054 = vmatprep.subr.bf16.mxu1 %v4619_v55 }
 0x3a0   : > { %v1653_v18 = vmax.f32 %v1599_v3, %v1647_v10  ;;  %v1713_v57 = vrot.slane %v3776_v56, %v4944_v15  ;;  %v2051_v10 = vld [vmem:[%s521_s26 + $0x8] sm:$0xff]  ;;  %v4451_v56 = vld [vmem:[%s5841_s9 + $0xd4] ss:$8 sps:$4 sm:$0xff]  }
 0x3a1   : > { %v1654_v20 = vmax.f32 %v1601_v8, %v1648_v12  ;;  %v1649_v21 = vmul.f32 0.01, %v1641_v13  ;;  %v1652_v23 = vmax.f32 %v1638_v7, %v1646_v11  ;;  %v2050_v8 = vld [vmem:[%s521_s26] sm:$0xff] }
 0x3a2   : > { %v1704_v22 = vpack.c.bf16 %v1653_v18, %v1650_v16 }
 0x3a3   : > { %v1655_v24 = vmax.f32 %v1641_v13, %v1649_v21  ;;  %v1705_v25 = vpack.c.bf16 %v1654_v20, %v1651_v19  ;;  %v4402_v19 = vld [vmem:[%s5840_s8 + $0x8] ss:$12 sps:$4 sm:$0xff]   ;;  %v4403_v21 = vld [vmem:[%s5840_s8 + $0x20] ss:$12 sps:$4 sm:$0xff]  }
 0x3a5   : > { %v1706_v28 = vpack.c.bf16 %v1655_v24, %v1652_v23  ;;  %1992 = vmatprep.mubr.bf16.mxu0 %v1705_v25  ;;  %v4405_v23 = vld [vmem:[%s5840_s8 + $0x50] ss:$12 sps:$4 sm:$0xff]   ;;  %v4406_v24 = vld [vmem:[%s5840_s8 + $0x68] ss:$12 sps:$4 sm:$0xff]   ;;  %v4407_v25 = vld [vmem:[%s5840_s8 + $0x80] ss:$12 sps:$4 sm:$0xff]  }
 0x3a6   : > { %1993 = vmatmul.mubr.bf16.vlgmr.msra.gmra.mrb[12].mxu0 %v1704_v22  ;;  %v4404_v22 = vld [vmem:[%s5840_s8 + $0x38] ss:$12 sps:$4 sm:$0xff]  }
 0x3a7   : > { %2004 = vmatpush1.bf16.msra.mxu0 %v4354_v26  ;;  %2035 = vmatprep.mubr.bf16.mxu0 %v4618_v2  ;;  %v4408_v26 = vld [vmem:[%s5840_s8 + $0x98] ss:$12 sps:$4 sm:$0xff]  }
 0x3a8   : > { %2005 = vmatprep.subr.bf16.mxu0 %v4359_v27  ;;  %v4409_v27 = vld [vmem:[%s5840_s8 + $0xb0] ss:$12 sps:$4 sm:$0xff]  }
 0x3ab   : > { %2006 = vmatpush1.bf16.msra.mxu0 %v4357_v29  ;;  %v4410_v29 = vld [vmem:[%s5841_s9] ss:$8 sps:$4 sm:$0xff]  }
 0x3ac   : > { %2007 = vmatprep.subr.bf16.mxu0 %v4362_v30  ;;  %v4415_v30 = vld [vmem:[%s5841_s9 + $0x14] ss:$8 sps:$4 sm:$0xff]  }
 0x3af   : > { %2008 = vmatpush1.bf16.msra.mxu0 %v4360_v31  ;;  %v4413_v31 = vld [vmem:[%s5841_s9 + $0x10] ss:$8 sps:$4 sm:$0xff]  }
 0x3b0   : > { %2009 = vmatprep.subr.bf16.mxu0 %v4365_v32  ;;  %v4418_v32 = vld [vmem:[%s5841_s9 + $0x24] ss:$8 sps:$4 sm:$0xff]  }
 0x3b3   : > { %2010 = vmatpush1.bf16.msra.mxu0 %v4363_v33  ;;  %v4416_v33 = vld [vmem:[%s5841_s9 + $0x20] ss:$8 sps:$4 sm:$0xff]  }
 0x3b4   : > { %2011 = vmatprep.subr.bf16.mxu0 %v4368_v34  ;;  %v4421_v34 = vld [vmem:[%s5841_s9 + $0x34] ss:$8 sps:$4 sm:$0xff]  }
 0x3b7   : > { %2012 = vmatpush1.bf16.msra.mxu0 %v4366_v35  ;;  %v4419_v35 = vld [vmem:[%s5841_s9 + $0x30] ss:$8 sps:$4 sm:$0xff]  }
 0x3b8   : > { %2013 = vmatprep.subr.bf16.mxu0 %v4371_v36  ;;  %v4424_v36 = vld [vmem:[%s5841_s9 + $0x44] ss:$8 sps:$4 sm:$0xff]  }
 0x3bb   : > { %2014 = vmatpush1.bf16.msra.mxu0 %v4369_v37  ;;  %v4422_v37 = vld [vmem:[%s5841_s9 + $0x40] ss:$8 sps:$4 sm:$0xff]  }
 0x3bc   : > { %2015 = vmatprep.subr.bf16.mxu0 %v4374_v38  ;;  %v4427_v38 = vld [vmem:[%s5841_s9 + $0x54] ss:$8 sps:$4 sm:$0xff]  }
 0x3bf   : > { %2016 = vmatpush1.bf16.msra.mxu0 %v4372_v39  ;;  %v4425_v39 = vld [vmem:[%s5841_s9 + $0x50] ss:$8 sps:$4 sm:$0xff]  }
 0x3c0   : > { %2017 = vmatprep.subr.bf16.mxu0 %v4377_v40  ;;  %v4430_v40 = vld [vmem:[%s5841_s9 + $0x64] ss:$8 sps:$4 sm:$0xff]  }
 0x3c3   : > { %2018 = vmatpush1.bf16.msra.mxu0 %v4375_v41  ;;  %v4428_v41 = vld [vmem:[%s5841_s9 + $0x60] ss:$8 sps:$4 sm:$0xff]  }
 0x3c6   : > { %2036 = vmatmul.mubr.bf16.vlgmr.msra.gmra.mrb[12].mxu0 %v1706_v28  ;;  %v4412_v28 = vld [vmem:[%s5841_s9 + $0x4] ss:$8 sps:$4 sm:$0xff]  }
 0x499   : > { %v2037_v59 = vpop.f32.mrb[12].mxu0 }
 0x49a   : > { %v4094_v60 = vadd.f32 %v2037_v59, %v1713_v57  ;;  %v2039_v61 = vpop.f32.mrb[13].mxu0  ;;  %v4452_v59 = vld [vmem:[%s5841_s9 + $0xe0] ss:$8 sps:$4 sm:$0xff]  }
 0x49b   : > { %v4095_v62 = vadd.f32 %v2039_v61, %v1717_v58  ;;  %v2041_v63 = vpop.f32.mrb[14].mxu0  ;;  %v4455_v61 = vld [vmem:[%s5841_s9 + $0xf0] ss:$8 sps:$4 sm:$0xff]  }
 0x49c   : > { %2046 = vst [vmem:[%s534_s21] sm:$0xff] %v4094_v60  ;;  %v4096_v0 = vadd.f32 %v2041_v63, %v1713_v57  ;;  %v2043_v1 = vpop.f32.mrb[15].mxu0  ;;  %v4449_v57 = vld [vmem:[%s5841_s9 + $0xd0] ss:$8 sps:$4 sm:$0xff]   ;;  %v4482_v63 = vld [vmem:[%s5842_s10] ss:$8 sps:$4 sm:$0xff]  }
 0x49d   : > { %2047 = vst [vmem:[%s534_s21 + $0x8] sm:$0xff] %v4095_v62  ;;  %v2052_v3 = vmul.f32 0.5, %v4095_v62  ;;  %v4097_v4 = vadd.f32 %v2043_v1, %v1717_v58  ;;  %v4454_v58 = vld [vmem:[%s5841_s9 + $0xe4] ss:$8 sps:$4 sm:$0xff]   ;;  %v4487_v1 = vld [vmem:[%s5842_s10 + $0x14] ss:$8 sps:$4 sm:$0xff]  }
 0x49e   : > { %2048 = vst [vmem:[%s534_s21 + $0x10] sm:$0xff] %v4096_v0  ;;  %v4460_v62 = vld [vmem:[%s5841_s9 + $0x104] ss:$8 sps:$4 sm:$0xff]  }
 0x49f   : > { %v2054_v5 = vmul.f32 1.442695, %v2052_v3  ;;  %2049 = vst [vmem:[%s534_s21 + $0x18] sm:$0xff] %v4097_v4  ;;  %v2053_v6 = vmul.f32 0.5, %v4097_v4  ;;  %v4485_v3 = vld [vmem:[%s5842_s10 + $0x10] ss:$8 sps:$4 sm:$0xff]  }
 0x4a0   : > { %v4490_v4 = vld [vmem:[%s5842_s10 + $0x24] ss:$8 sps:$4 sm:$0xff]  }
 0x4a1   : > { %4602 = vpow2.f32 %v2054_v5  ;;  %v2056_v7 = vmul.f32 1.442695, %v2053_v6  ;;  %v4488_v5 = vld [vmem:[%s5842_s10 + $0x20] ss:$8 sps:$4 sm:$0xff]   ;;  %v4493_v6 = vld [vmem:[%s5842_s10 + $0x34] ss:$8 sps:$4 sm:$0xff]  }
 0x4a3   : > { %4604 = vpow2.f32 %v2056_v7  ;;  %v4491_v7 = vld [vmem:[%s5842_s10 + $0x30] ss:$8 sps:$4 sm:$0xff]  }
 0x4ab   : > { %v4603_v9 = vpop.eup %4602 }
 0x4ac   : > { %v2058_v11 = vmul.f32 %v4603_v9, %v2050_v8  ;;  %v4496_v8 = vld [vmem:[%s5842_s10 + $0x44] ss:$8 sps:$4 sm:$0xff]   ;;  %v4494_v9 = vld [vmem:[%s5842_s10 + $0x40] ss:$8 sps:$4 sm:$0xff]  }
 0x4ad   : > { %v4605_v12 = vpop.eup %4604 }
 0x4ae   : > { %v2059_v13 = vmul.f32 %v4605_v12, %v2051_v10  ;;  %v2060_v16 = vadd.f32 %v4094_v60, %v2058_v11  ;;  %v4457_v60 = vld [vmem:[%s5841_s9 + $0xf4] ss:$8 sps:$4 sm:$0xff]   ;;  %v4497_v11 = vld [vmem:[%s5842_s10 + $0x50] ss:$8 sps:$4 sm:$0xff]   ;;  %v4502_v12 = vld [vmem:[%s5842_s10 + $0x64] ss:$8 sps:$4 sm:$0xff]  }
 0x4af   : > { %v4499_v10 = vld [vmem:[%s5842_s10 + $0x54] ss:$8 sps:$4 sm:$0xff]  }
 0x4b0   : > { %v2061_v18 = vadd.f32 %v4096_v0, %v2059_v13  ;;  %v4484_v0 = vld [vmem:[%s5842_s10 + $0x4] ss:$8 sps:$4 sm:$0xff]   ;;  %v4500_v13 = vld [vmem:[%s5842_s10 + $0x60] ss:$8 sps:$4 sm:$0xff]  }
 0x4b1   : > { %2930 = vmatprep.subr.bf16.mxu0 %v4484_v0 }
 0x4b2   : > { %v2094_v20 = vpack.c.bf16 %v2061_v18, %v2060_v16  ;;  %2931 = vmatpush1.bf16.msra.mxu0 %v4482_v63  ;;  %v4505_v16 = vld [vmem:[%s5842_s10 + $0x74] ss:$8 sps:$4 sm:$0xff]   ;;  %v4503_v18 = vld [vmem:[%s5842_s10 + $0x70] ss:$8 sps:$4 sm:$0xff]  }
 0x4b3   : > { %2932 = vmatprep.subr.bf16.mxu0 %v4487_v1 }
 0x4b4   : > { %2274 = vmatmul.mubr.bf16.vlgmr.msra.gmra.mrb[8].mxu1 %v2094_v20 }
 0x4b5   : > { %4055 = vmatpush3.bf16.msra.mxu1 %v4402_v19  ;;  %4070 = vmatprep.mubr.msk.bf16.mxu1 %vm4620_vm0, %v4619_v55  ;;  %v4508_v19 = vld [vmem:[%s5842_s10 + $0x84] ss:$8 sps:$4 sm:$0xff]  }
 0x4b6   : > { %4056 = vmatprep.subr.bf16.mxu1 %v4619_v55  ;;  %2933 = vmatpush1.bf16.msra.mxu0 %v4485_v3  ;;  %v4526_v3 = vld [vmem:[%s5842_s10 + $0xe4] ss:$8 sps:$4 sm:$0xff]  }
 0x4b7   : > { %2934 = vmatprep.subr.bf16.mxu0 %v4490_v4  ;;  %v4524_v4 = vld [vmem:[%s5842_s10 + $0xe0] ss:$8 sps:$4 sm:$0xff]  }
 0x4b9   : > { %4057 = vmatpush3.bf16.msra.mxu1 %v4403_v21  ;;  %v4511_v21 = vld [vmem:[%s5842_s10 + $0x94] ss:$8 sps:$4 sm:$0xff]  }
 0x4ba   : > { %4058 = vmatprep.subr.bf16.mxu1 %v4619_v55  ;;  %2935 = vmatpush1.bf16.msra.mxu0 %v4488_v5  ;;  %v4529_v5 = vld [vmem:[%s5842_s10 + $0xf4] ss:$8 sps:$4 sm:$0xff]  }
 0x4bb   : > { %2936 = vmatprep.subr.bf16.mxu0 %v4493_v6  ;;  %v4527_v6 = vld [vmem:[%s5842_s10 + $0xf0] ss:$8 sps:$4 sm:$0xff]  }
 0x4bd   : > { %4059 = vmatpush3.bf16.msra.mxu1 %v4404_v22  ;;  %v4509_v22 = vld [vmem:[%s5842_s10 + $0x90] ss:$8 sps:$4 sm:$0xff]  }
 0x4be   : > { %4060 = vmatprep.subr.bf16.mxu1 %v4619_v55  ;;  %2937 = vmatpush1.bf16.msra.mxu0 %v4491_v7  ;;  %v4532_v7 = vld [vmem:[%s5843_s11 + $0x4] ss:$8 sps:$4 sm:$0xff]  }
 0x4bf   : > { %2938 = vmatprep.subr.bf16.mxu0 %v4496_v8  ;;  %v3850_v8 = vld [vmem:[%s5834_s2 + $0x6] ss:$8 sm:$0x3] }
 0x4c1   : > { %4061 = vmatpush3.bf16.msra.mxu1 %v4405_v23  ;;  %v4514_v23 = vld [vmem:[%s5842_s10 + $0xa4] ss:$8 sps:$4 sm:$0xff]  }
 0x4c2   : > { %4062 = vmatprep.subr.bf16.mxu1 %v4619_v55  ;;  %2939 = vmatpush1.bf16.msra.mxu0 %v4494_v9  ;;  %v2382_v9 = vrot.slane %v3850_v8, %v4944_v15 }
 0x4c3   : > { %2940 = vmatprep.subr.bf16.mxu0 %v4499_v10  ;;  %v2386_v10 = vrot.slane %v3850_v8, %v4950_v17  ;;  %v4587_v8 = vld [vmem:[%s5844_s12 + $0x20] sm:$0xff]  }
 0x4c5   : > { %4063 = vmatpush3.bf16.msra.mxu1 %v4406_v24  ;;  %v4512_v24 = vld [vmem:[%s5842_s10 + $0xa0] ss:$8 sps:$4 sm:$0xff]  }
 0x4c6   : > { %4064 = vmatprep.subr.bf16.mxu1 %v4619_v55  ;;  %2941 = vmatpush1.bf16.msra.mxu0 %v4497_v11 }
 0x4c7   : > { %2942 = vmatprep.subr.bf16.mxu0 %v4502_v12 }
 0x4c9   : > { %4065 = vmatpush3.bf16.msra.mxu1 %v4407_v25  ;;  %v4517_v25 = vld [vmem:[%s5842_s10 + $0xb4] ss:$8 sps:$4 sm:$0xff]  }
 0x4ca   : > { %4066 = vmatprep.subr.bf16.mxu1 %v4619_v55  ;;  %2943 = vmatpush1.bf16.msra.mxu0 %v4500_v13 }
 0x4cb   : > { %2944 = vmatprep.subr.bf16.mxu0 %v4505_v16 }
 0x4cd   : > { %4067 = vmatpush3.bf16.msra.mxu1 %v4408_v26  ;;  %v4515_v26 = vld [vmem:[%s5842_s10 + $0xb0] ss:$8 sps:$4 sm:$0xff]  }
 0x4ce   : > { %4068 = vmatprep.subr.bf16.mxu1 %v4619_v55  ;;  %2945 = vmatpush1.bf16.msra.mxu0 %v4503_v18 }
 0x4cf   : > { %2946 = vmatprep.subr.bf16.mxu0 %v4508_v19 }
 0x4d1   : > { %4069 = vmatpush3.bf16.msra.mxu1 %v4409_v27  ;;  %v4520_v27 = vld [vmem:[%s5842_s10 + $0xc4] ss:$8 sps:$4 sm:$0xff]  }
 0x4d2   : > { %2629 = vmatprep.subr.bf16.mxu1 %v4412_v28  ;;  %v4518_v28 = vld [vmem:[%s5842_s10 + $0xc0] ss:$8 sps:$4 sm:$0xff]  }
 0x4d4   : > { %4071 = vmatmul.mubr.bf16.vlgmr.msra.gmra.mrb[12].mxu1 %v2094_v20  ;;  %v4506_v20 = vld [vmem:[%s5842_s10 + $0x80] ss:$8 sps:$4 sm:$0xff]  }
 0x4d5   : > { %2630 = vmatpush1.bf16.msra.mxu1 %v4410_v29  ;;  %2947 = vmatpush1.bf16.msra.mxu0 %v4506_v20  ;;  %v3825_v29 = vld [vmem:[%s5834_s2 + $0x5] ss:$8 sm:$0x7] }
 0x4d6   : > { %2631 = vmatprep.subr.bf16.mxu1 %v4415_v30  ;;  %2948 = vmatprep.subr.bf16.mxu0 %v4511_v21  ;;  %v2101_v30 = vrot.slane %v3825_v29, %v4944_v15 }
 0x4d9   : > { %2632 = vmatpush1.bf16.msra.mxu1 %v4413_v31  ;;  %2949 = vmatpush1.bf16.msra.mxu0 %v4509_v22 }
 0x4da   : > { %2633 = vmatprep.subr.bf16.mxu1 %v4418_v32  ;;  %2950 = vmatprep.subr.bf16.mxu0 %v4514_v23  ;;  %v2105_v32 = vrot.slane %v3825_v29, %v4950_v17 }
 0x4dd   : > { %2634 = vmatpush1.bf16.msra.mxu1 %v4416_v33  ;;  %2951 = vmatpush1.bf16.msra.mxu0 %v4512_v24 }
 0x4de   : > { %2635 = vmatprep.subr.bf16.mxu1 %v4421_v34  ;;  %2952 = vmatprep.subr.bf16.mxu0 %v4517_v25 }
 0x4e1   : > { %2636 = vmatpush1.bf16.msra.mxu1 %v4419_v35  ;;  %2953 = vmatpush1.bf16.msra.mxu0 %v4515_v26 }
 0x4e2   : > { %2637 = vmatprep.subr.bf16.mxu1 %v4424_v36  ;;  %2954 = vmatprep.subr.bf16.mxu0 %v4520_v27 }
 0x4e5   : > { %2638 = vmatpush1.bf16.msra.mxu1 %v4422_v37  ;;  %2955 = vmatpush1.bf16.msra.mxu0 %v4518_v28 }
 0x4e6   : > { %2639 = vmatprep.subr.bf16.mxu1 %v4427_v38  ;;  %2956 = vmatprep.subr.bf16.mxu0 %v4523_v14  ;;  %v4580_v14 = vld [vmem:[%s5844_s12 + $0x48] sm:$0xff]  }
 0x4e9   : > { %2640 = vmatpush1.bf16.msra.mxu1 %v4425_v39 }
 0x4ea   : > { %2641 = vmatprep.subr.bf16.mxu1 %v4430_v40 }
 0x4ed   : > { %2642 = vmatpush1.bf16.msra.mxu1 %v4428_v41 }
 0x4ee   : > { %2643 = vmatprep.subr.bf16.mxu1 %v4433_v42  ;;  %v4458_v42 = vld [vmem:[%s5841_s9 + $0x100] ss:$8 sps:$4 sm:$0xff]  }
 0x4f1   : > { %2644 = vmatpush1.bf16.msra.mxu1 %v4431_v43  ;;  %v4463_v43 = vld [vmem:[%s5841_s9 + $0x114] ss:$8 sps:$4 sm:$0xff]  }
 0x4f2   : > { %2645 = vmatprep.subr.bf16.mxu1 %v4436_v44  ;;  %v4461_v44 = vld [vmem:[%s5841_s9 + $0x110] ss:$8 sps:$4 sm:$0xff]  }
 0x4f5   : > { %2646 = vmatpush1.bf16.msra.mxu1 %v4434_v45  ;;  %v4466_v45 = vld [vmem:[%s5841_s9 + $0x124] ss:$8 sps:$4 sm:$0xff]  }
 0x4f6   : > { %2647 = vmatprep.subr.bf16.mxu1 %v4439_v46  ;;  %v4464_v46 = vld [vmem:[%s5841_s9 + $0x120] ss:$8 sps:$4 sm:$0xff]  }
 0x4f9   : > { %2648 = vmatpush1.bf16.msra.mxu1 %v4437_v47  ;;  %v4469_v47 = vld [vmem:[%s5841_s9 + $0x134] ss:$8 sps:$4 sm:$0xff]  }
 0x4fa   : > { %2649 = vmatprep.subr.bf16.mxu1 %v4442_v48  ;;  %v4472_v48 = vld [vmem:[%s5841_s9 + $0x144] ss:$8 sps:$4 sm:$0xff]  }
 0x4fd   : > { %2650 = vmatpush1.bf16.msra.mxu1 %v4440_v49  ;;  %v4470_v49 = vld [vmem:[%s5841_s9 + $0x140] ss:$8 sps:$4 sm:$0xff]  }
 0x4fe   : > { %2651 = vmatprep.subr.bf16.mxu1 %v4445_v50  ;;  %v4475_v50 = vld [vmem:[%s5841_s9 + $0x154] ss:$8 sps:$4 sm:$0xff]  }
 0x501   : > { %2652 = vmatpush1.bf16.msra.mxu1 %v4443_v51  ;;  %v4473_v51 = vld [vmem:[%s5841_s9 + $0x150] ss:$8 sps:$4 sm:$0xff]  }
 0x502   : > { %2653 = vmatprep.subr.bf16.mxu1 %v4448_v53  ;;  %v4478_v53 = vld [vmem:[%s5841_s9 + $0x164] ss:$8 sps:$4 sm:$0xff]  }
 0x505   : > { %2654 = vmatpush1.bf16.msra.mxu1 %v4446_v54  ;;  %v4476_v54 = vld [vmem:[%s5841_s9 + $0x160] ss:$8 sps:$4 sm:$0xff]  }
 0x506   : > { %2655 = vmatprep.subr.bf16.mxu1 %v4451_v56  ;;  %v2109_v56 = vrot.slane %v3825_v29, %v1299_v52  ;;  %v4521_v52 = vld [vmem:[%s5842_s10 + $0xd0] ss:$8 sps:$4 sm:$0xff]  }
 0x507   : > { %2957 = vmatpush1.bf16.msra.mxu0 %v4521_v52  ;;  %v4581_v52 = vld [vmem:[%s5844_s12 + $0x8] sm:$0xff]  }
 0x508   : > { %2958 = vmatprep.subr.bf16.mxu0 %v4526_v3  ;;  %v4582_v3 = vld [vmem:[%s5844_s12 + $0x50] sm:$0xff]  }
 0x509   : > { %2656 = vmatpush1.bf16.msra.mxu1 %v4449_v57  ;;  %v4481_v57 = vld [vmem:[%s5841_s9 + $0x174] ss:$8 sps:$4 sm:$0xff]  }
 0x50a   : > { %2657 = vmatprep.subr.bf16.mxu1 %v4454_v58 }
 0x50b   : > { %2959 = vmatpush1.bf16.msra.mxu0 %v4524_v4  ;;  %v4583_v4 = vld [vmem:[%s5844_s12 + $0x10] sm:$0xff]  }
 0x50c   : > { %2960 = vmatprep.subr.bf16.mxu0 %v4529_v5  ;;  %v4584_v5 = vld [vmem:[%s5844_s12 + $0x58] sm:$0xff]  }
 0x50d   : > { %2658 = vmatpush1.bf16.msra.mxu1 %v4452_v59 }
 0x50e   : > { %2659 = vmatprep.subr.bf16.mxu1 %v4457_v60 }
 0x50f   : > { %2961 = vmatpush1.bf16.msra.mxu0 %v4527_v6  ;;  %v4585_v6 = vld [vmem:[%s5844_s12 + $0x18] sm:$0xff]  }
 0x510   : > { %3188 = vmatprep.subr.bf16.mxu0 %v4532_v7  ;;  %v4586_v7 = vld [vmem:[%s5844_s12 + $0x60] sm:$0xff]  }
 0x511   : > { %2660 = vmatpush1.bf16.msra.mxu1 %v4455_v61  ;;  %v4479_v61 = vld [vmem:[%s5841_s9 + $0x170] ss:$8 sps:$4 sm:$0xff]  }
 0x512   : > { %2672 = vmatprep.subr.bf16.mxu1 %v4460_v62 }
 0x587   : > { %v2275_v31 = vpop.f32.mrb[8].mxu1 }
 0x588   : > { %v2277_v33 = vpop.f32.mrb[9].mxu1  ;;  %v2276_v35 = vadd.f32 %v2275_v31, %v2101_v30 }
 0x589   : > { %v2279_v34 = vpop.f32.mrb[10].mxu1  ;;  %v2278_v38 = vadd.f32 %v2277_v33, %v2105_v32  ;;  %v4535_v33 = vld [vmem:[%s5843_s11 + $0x14] ss:$8 sps:$4 sm:$0xff]  }
 0x58a   : > { %v2280_v36 = vadd.f32 %v2279_v34, %v2101_v30  ;;  %v2281_v37 = vpop.f32.mrb[11].mxu1  ;;  %v4533_v34 = vld [vmem:[%s5843_s11 + $0x10] ss:$8 sps:$4 sm:$0xff]  }
 0x58b   : > { %v2282_v39 = vadd.f32 %v2281_v37, %v2105_v32  ;;  %v4530_v32 = vld [vmem:[%s5843_s11] ss:$8 sps:$4 sm:$0xff]   ;;  %v4541_v37 = vld [vmem:[%s5843_s11 + $0x34] ss:$8 sps:$4 sm:$0xff]  }
 0x58c   : > { %v2373_v40 = vpack.c.bf16 %v2280_v36, %v2276_v35  ;;  %v4538_v35 = vld [vmem:[%s5843_s11 + $0x24] ss:$8 sps:$4 sm:$0xff]   ;;  %v4536_v36 = vld [vmem:[%s5843_s11 + $0x20] ss:$8 sps:$4 sm:$0xff]  }
 0x58d   : > { %v2374_v41 = vpack.c.bf16 %v2282_v39, %v2278_v38  ;;  %v4539_v38 = vld [vmem:[%s5843_s11 + $0x30] ss:$8 sps:$4 sm:$0xff]   ;;  %v4544_v39 = vld [vmem:[%s5843_s11 + $0x44] ss:$8 sps:$4 sm:$0xff]  }
 0x58f   : > { %2661 = vmatprep.mubr.bf16.mxu1 %v2374_v41  ;;  %v4547_v41 = vld [vmem:[%s5843_s11 + $0x54] ss:$8 sps:$4 sm:$0xff]  }
 0x590   : > { %2662 = vmatmul.mubr.bf16.vlgmr.msra.gmra.mrb[16].mxu1 %v2373_v40  ;;  %v4542_v40 = vld [vmem:[%s5843_s11 + $0x40] ss:$8 sps:$4 sm:$0xff]  }
 0x591   : > { %2673 = vmatpush1.bf16.msra.mxu1 %v4458_v42  ;;  %2704 = vmatprep.mubr.bf16.mxu1 %v4618_v2  ;;  %v4467_v2 = vld [vmem:[%s5841_s9 + $0x130] ss:$8 sps:$4 sm:$0xff]  }
 0x592   : > { %2674 = vmatprep.subr.bf16.mxu1 %v4463_v43  ;;  %v4545_v42 = vld [vmem:[%s5843_s11 + $0x50] ss:$8 sps:$4 sm:$0xff]   ;;  %v4550_v43 = vld [vmem:[%s5843_s11 + $0x64] ss:$8 sps:$4 sm:$0xff]  }
 0x595   : > { %2675 = vmatpush1.bf16.msra.mxu1 %v4461_v44  ;;  %v4548_v44 = vld [vmem:[%s5843_s11 + $0x60] ss:$8 sps:$4 sm:$0xff]  }
 0x596   : > { %2676 = vmatprep.subr.bf16.mxu1 %v4466_v45  ;;  %v4553_v45 = vld [vmem:[%s5843_s11 + $0x74] ss:$8 sps:$4 sm:$0xff]  }
 0x599   : > { %2677 = vmatpush1.bf16.msra.mxu1 %v4464_v46  ;;  %v4551_v46 = vld [vmem:[%s5843_s11 + $0x70] ss:$8 sps:$4 sm:$0xff]  }
 0x59a   : > { %2678 = vmatprep.subr.bf16.mxu1 %v4469_v47  ;;  %v4556_v47 = vld [vmem:[%s5843_s11 + $0x84] ss:$8 sps:$4 sm:$0xff]  }
 0x59d   : > { %2679 = vmatpush1.bf16.msra.mxu1 %v4467_v2  ;;  %v4554_v2 = vld [vmem:[%s5843_s11 + $0x80] ss:$8 sps:$4 sm:$0xff]  }
 0x59e   : > { %2680 = vmatprep.subr.bf16.mxu1 %v4472_v48  ;;  %v4559_v48 = vld [vmem:[%s5843_s11 + $0x94] ss:$8 sps:$4 sm:$0xff]  }
 0x5a1   : > { %2681 = vmatpush1.bf16.msra.mxu1 %v4470_v49  ;;  %v4557_v49 = vld [vmem:[%s5843_s11 + $0x90] ss:$8 sps:$4 sm:$0xff]  }
 0x5a2   : > { %2682 = vmatprep.subr.bf16.mxu1 %v4475_v50  ;;  %v4562_v50 = vld [vmem:[%s5843_s11 + $0xa4] ss:$8 sps:$4 sm:$0xff]  }
 0x5a5   : > { %2683 = vmatpush1.bf16.msra.mxu1 %v4473_v51  ;;  %v4560_v51 = vld [vmem:[%s5843_s11 + $0xa0] ss:$8 sps:$4 sm:$0xff]  }
 0x5a6   : > { %2684 = vmatprep.subr.bf16.mxu1 %v4478_v53  ;;  %v4565_v53 = vld [vmem:[%s5843_s11 + $0xb4] ss:$8 sps:$4 sm:$0xff]  }
 0x5a7   : > { %v2318_v58 = vpop.f32.mrb[12].mxu1 }
 0x5a8   : > { %v4072_v59 = vpop.f32.mrb[13].mxu1  ;;  %v2319_v62 = vadd.f32 %v2318_v58, %v2109_v56  ;;  %v4571_v58 = vld [vmem:[%s5843_s11 + $0xd4] ss:$8 sps:$4 sm:$0xff]  }
 0x5a9   : > { %v2321_v60 = vpop.f32.mrb[14].mxu1  ;;  %2685 = vmatpush1.bf16.msra.mxu1 %v4476_v54  ;;  %v4563_v54 = vld [vmem:[%s5843_s11 + $0xb0] ss:$8 sps:$4 sm:$0xff]  }
 0x5aa   : > { %v2322_v63 = vadd.f32 %v2321_v60, %v2109_v56  ;;  %v4073_v0 = vpop.f32.mrb[15].mxu1  ;;  %2686 = vmatprep.subr.bf16.mxu1 %v4481_v57  ;;  %v4568_v56 = vld [vmem:[%s5843_s11 + $0xc4] ss:$8 sps:$4 sm:$0xff]   ;;  %v4566_v57 = vld [vmem:[%s5843_s11 + $0xc0] ss:$8 sps:$4 sm:$0xff]  }
 0x5ab   : > { %v4569_v59 = vld [vmem:[%s5843_s11 + $0xd0] ss:$8 sps:$4 sm:$0xff]   ;;  %v4574_v60 = vld [vmem:[%s5843_s11 + $0xe4] ss:$8 sps:$4 sm:$0xff]  }
 0x5ac   : > { %v2375_v1 = vpack.c.bf16 %v2322_v63, %v2319_v62  ;;  %v4577_v62 = vld [vmem:[%s5843_s11 + $0xf4] ss:$8 sps:$4 sm:$0xff]   ;;  %v4575_v63 = vld [vmem:[%s5843_s11 + $0xf0] ss:$8 sps:$4 sm:$0xff]   ;;  %v4578_v0 = vld [vmem:[%s5844_s12 + $0x40] sm:$0xff]  }
 0x5ad   : > { %2687 = vmatpush1.bf16.msra.mxu1 %v4479_v61  ;;  %v4572_v61 = vld [vmem:[%s5843_s11 + $0xe0] ss:$8 sps:$4 sm:$0xff]  }
 0x5ae   : > { %4023 = vmatprep.subr.bf16.mxu1 %v4578_v0  ;;  %v4599_v0 = vld [vmem:[%s5845_s13 + $0x28] sm:$0xff]  }
 0x5b0   : > { %2705 = vmatmul.mubr.bf16.vlgmr.msra.gmra.mrb[16].mxu1 %v2375_v1  ;;  %v4579_v1 = vld [vmem:[%s5844_s12] sm:$0xff]  }
 0x5b1   : > { %4024 = vmatpush3.bf16.msra.mxu1 %v4579_v1  ;;  %v4600_v1 = vld [vmem:[%s5845_s13 + $0x30] sm:$0xff]  }
 0x5b2   : > { %4025 = vmatprep.subr.bf16.mxu1 %v4580_v14  ;;  %v4601_v14 = vld [vmem:[%s5845_s13 + $0x38] sm:$0xff]  }
 0x5b5   : > { %4026 = vmatpush3.bf16.msra.mxu1 %v4581_v52 }
 0x5b6   : > { %4027 = vmatprep.subr.bf16.mxu1 %v4582_v3  ;;  %v3273_v3 = vld [vmem:[%s5834_s2 + $0x19] ss:$0 sm:$0xff] }
 0x5b9   : > { %4028 = vmatpush3.bf16.msra.mxu1 %v4583_v4 }
 0x5ba   : > { %4029 = vmatprep.subr.bf16.mxu1 %v4584_v5 }
 0x5bd   : > { %4030 = vmatpush3.bf16.msra.mxu1 %v4585_v6 }
 0x5be   : > { %4031 = vmatprep.subr.bf16.mxu1 %v4586_v7 }
 0x5c1   : > { %4032 = vmatpush3.bf16.msra.mxu1 %v4587_v8 }
 0x683   : > { %v2706_v11 = vpop.f32.mrb[16].mxu1 }
 0x684   : > { %v4098_v12 = vadd.f32 %v2706_v11, %v2382_v9  ;;  %v2708_v13 = vpop.f32.mrb[17].mxu1 }
 0x685   : > { %v4099_v16 = vadd.f32 %v2708_v13, %v2386_v10  ;;  %v2710_v18 = vpop.f32.mrb[18].mxu1 }
 0x686   : > { %v2715_v19 = vmul.f32 0.01, %v4098_v12  ;;  %v4100_v20 = vadd.f32 %v2710_v18, %v2382_v9  ;;  %v2712_v21 = vpop.f32.mrb[19].mxu1  ;;  %v3899_v9 = vld [vmem:[%s5834_s2 + $0x7] ss:$8 sm:$0x3] }
 0x687   : > { %v2716_v22 = vmul.f32 0.01, %v4099_v16  ;;  %v4101_v23 = vadd.f32 %v2712_v21, %v2386_v10  ;;  %v2763_v10 = vrot.slane %v3899_v9, %v4944_v15  ;;  %v2767_v11 = vrot.slane %v3899_v9, %v4950_v17 }
 0x688   : > { %v2717_v24 = vmul.f32 0.01, %v4100_v20  ;;  %v2719_v26 = vmax.f32 %v4098_v12, %v2715_v19 }
 0x689   : > { %v2718_v25 = vmul.f32 0.01, %v4101_v23  ;;  %v2720_v28 = vmax.f32 %v4099_v16, %v2716_v22 }
 0x68a   : > { %v2721_v27 = vmax.f32 %v4100_v20, %v2717_v24 }
 0x68b   : > { %v2722_v29 = vmax.f32 %v4101_v23, %v2718_v25 }
 0x68c   : > { %v2755_v30 = vpack.c.bf16 %v2721_v27, %v2719_v26 }
 0x68d   : > { %v2756_v31 = vpack.c.bf16 %v2722_v29, %v2720_v28 }
 0x68f   : > { %2962 = vmatprep.mubr.bf16.mxu0 %v2756_v31 }
 0x690   : > { %2963 = vmatmul.mubr.bf16.vlgmr.msra.gmra.mrb[16].mxu0 %v2755_v30 }
 0x691   : > { %3189 = vmatpush1.bf16.msra.mxu0 %v4530_v32 }
 0x692   : > { %3190 = vmatprep.subr.bf16.mxu0 %v4535_v33  ;;  %v4588_v33 = vld [vmem:[%s5844_s12 + $0x68] sm:$0xff]  }
 0x693   : > { %4033 = vmatprep.subr.bf16.mxu1 %v4588_v33 }
 0x695   : > { %3191 = vmatpush1.bf16.msra.mxu0 %v4533_v34  ;;  %v4589_v34 = vld [vmem:[%s5844_s12 + $0x28] sm:$0xff]  }
 0x696   : > { %3192 = vmatprep.subr.bf16.mxu0 %v4538_v35  ;;  %4034 = vmatpush3.bf16.msra.mxu1 %v4589_v34  ;;  %v4590_v35 = vld [vmem:[%s5844_s12 + $0x70] sm:$0xff]  }
 0x697   : > { %4035 = vmatprep.subr.bf16.mxu1 %v4590_v35 }
 0x699   : > { %3193 = vmatpush1.bf16.msra.mxu0 %v4536_v36  ;;  %v4591_v36 = vld [vmem:[%s5844_s12 + $0x30] sm:$0xff]  }
 0x69a   : > { %3194 = vmatprep.subr.bf16.mxu0 %v4541_v37  ;;  %4036 = vmatpush3.bf16.msra.mxu1 %v4591_v36  ;;  %v4592_v37 = vld [vmem:[%s5844_s12 + $0x78] sm:$0xff]  }
 0x69b   : > { %4037 = vmatprep.subr.bf16.mxu1 %v4592_v37 }
 0x69d   : > { %3195 = vmatpush1.bf16.msra.mxu0 %v4539_v38  ;;  %v4593_v38 = vld [vmem:[%s5844_s12 + $0x38] sm:$0xff]  }
 0x69e   : > { %3196 = vmatprep.subr.bf16.mxu0 %v4544_v39  ;;  %4038 = vmatpush3.bf16.msra.mxu1 %v4593_v38  ;;  %v3932_v39 = vld [vmem:[%s5834_s2 + $0x18] ss:$8 sm:$0x3] }
 0x69f   : > { %4074 = vmatprep.subr.bf16.mxu1 %v4619_v55 }
 0x6a1   : > { %3197 = vmatpush1.bf16.msra.mxu0 %v4542_v40  ;;  %v3021_v40 = vrot.slane %v3932_v39, %v4944_v15 }
 0x6a2   : > { %3198 = vmatprep.subr.bf16.mxu0 %v4547_v41  ;;  %v3025_v41 = vrot.slane %v3932_v39, %v4950_v17  ;;  %v4594_v17 = vld [vmem:[%s5845_s13] sm:$0xff]  }
 0x6a5   : > { %3199 = vmatpush1.bf16.msra.mxu0 %v4545_v42 }
 0x6a6   : > { %3200 = vmatprep.subr.bf16.mxu0 %v4550_v43 }
 0x6a9   : > { %3201 = vmatpush1.bf16.msra.mxu0 %v4548_v44 }
 0x6aa   : > { %3202 = vmatprep.subr.bf16.mxu0 %v4553_v45 }
 0x6ad   : > { %3203 = vmatpush1.bf16.msra.mxu0 %v4551_v46 }
 0x6ae   : > { %3204 = vmatprep.subr.bf16.mxu0 %v4556_v47 }
 0x6b1   : > { %3205 = vmatpush1.bf16.msra.mxu0 %v4554_v2 }
 0x6b2   : > { %3206 = vmatprep.subr.bf16.mxu0 %v4559_v48 }
 0x6b5   : > { %3207 = vmatpush1.bf16.msra.mxu0 %v4557_v49 }
 0x6b6   : > { %3208 = vmatprep.subr.bf16.mxu0 %v4562_v50 }
 0x6b9   : > { %3209 = vmatpush1.bf16.msra.mxu0 %v4560_v51 }
 0x6ba   : > { %3210 = vmatprep.subr.bf16.mxu0 %v4565_v53 }
 0x6bd   : > { %3211 = vmatpush1.bf16.msra.mxu0 %v4563_v54 }
 0x6be   : > { %3212 = vmatprep.subr.bf16.mxu0 %v4568_v56 }
 0x6c1   : > { %3213 = vmatpush1.bf16.msra.mxu0 %v4566_v57 }
 0x6c2   : > { %3214 = vmatprep.subr.bf16.mxu0 %v4571_v58 }
 0x6c5   : > { %3215 = vmatpush1.bf16.msra.mxu0 %v4569_v59 }
 0x6c6   : > { %3216 = vmatprep.subr.bf16.mxu0 %v4574_v60  ;;  %v4595_v60 = vld [vmem:[%s5845_s13 + $0x8] sm:$0xff]  }
 0x6c9   : > { %3217 = vmatpush1.bf16.msra.mxu0 %v4572_v61  ;;  %v4596_v61 = vld [vmem:[%s5845_s13 + $0x10] sm:$0xff]  }
 0x6ca   : > { %3218 = vmatprep.subr.bf16.mxu0 %v4577_v62  ;;  %v4597_v62 = vld [vmem:[%s5845_s13 + $0x18] sm:$0xff]  }
 0x6cd   : > { %3219 = vmatpush1.bf16.msra.mxu0 %v4575_v63  ;;  %v4598_v63 = vld [vmem:[%s5845_s13 + $0x20] sm:$0xff]  }
 0x763   : > { %v2964_v12 = vpop.f32.mrb[16].mxu0 }
 0x764   : > { %v2965_v13 = vadd.f32 %v2964_v12, %v2763_v10  ;;  %v2966_v16 = vpop.f32.mrb[17].mxu0 }
 0x765   : > { %v2967_v18 = vadd.f32 %v2966_v16, %v2767_v11  ;;  %v2968_v19 = vpop.f32.mrb[18].mxu0 }
 0x766   : > { %v2973_v20 = vmul.f32 0.01, %v2965_v13  ;;  %v2969_v21 = vadd.f32 %v2968_v19, %v2763_v10  ;;  %v2970_v22 = vpop.f32.mrb[19].mxu0 }
 0x767   : > { %v2974_v23 = vmul.f32 0.01, %v2967_v18  ;;  %v2971_v24 = vadd.f32 %v2970_v22, %v2767_v11 }
 0x768   : > { %v2975_v25 = vmul.f32 0.01, %v2969_v21  ;;  %v2977_v27 = vmax.f32 %v2965_v13, %v2973_v20 }
 0x769   : > { %v2976_v26 = vmul.f32 0.01, %v2971_v24  ;;  %v2978_v29 = vmax.f32 %v2967_v18, %v2974_v23  ;;  %v3432_v18 = vld [vmem:[%s5834_s2 + $0x1a] ss:$0 sm:$0xff] }
 0x76a   : > { %v2979_v28 = vmax.f32 %v2969_v21, %v2975_v25 }
 0x76b   : > { %v2980_v30 = vmax.f32 %v2971_v24, %v2976_v26 }
 0x76c   : > { %v3013_v31 = vpack.c.bf16 %v2979_v28, %v2977_v27 }
 0x76d   : > { %v3014_v32 = vpack.c.bf16 %v2980_v30, %v2978_v29 }
 0x76f   : > { %3220 = vmatprep.mubr.bf16.mxu0 %v3014_v32 }
 0x770   : > { %3221 = vmatmul.mubr.bf16.vlgmr.msra.gmra.mrb[20].mxu0 %v3013_v31 }
 0x843   : > { %v3222_v42 = vpop.f32.mrb[20].mxu0 }
 0x844   : > { %v3223_v43 = vadd.f32 %v3222_v42, %v3021_v40  ;;  %v3224_v44 = vpop.f32.mrb[21].mxu0 }
 0x845   : > { %v3225_v45 = vadd.f32 %v3224_v44, %v3025_v41  ;;  %v3226_v46 = vpop.f32.mrb[22].mxu0 }
 0x846   : > { %v3231_v47 = vmul.f32 0.01, %v3223_v43  ;;  %v3227_v2 = vadd.f32 %v3226_v46, %v3021_v40  ;;  %v3228_v48 = vpop.f32.mrb[23].mxu0 }
 0x847   : > { %v3232_v49 = vmul.f32 0.01, %v3225_v45  ;;  %v3229_v50 = vadd.f32 %v3228_v48, %v3025_v41 }
 0x848   : > { %v3233_v51 = vmul.f32 0.01, %v3227_v2  ;;  %v3235_v54 = vmax.f32 %v3223_v43, %v3231_v47 }
 0x849   : > { %v3234_v53 = vmul.f32 0.01, %v3229_v50  ;;  %v3236_v57 = vmax.f32 %v3225_v45, %v3232_v49 }
 0x84a   : > { %v3237_v56 = vmax.f32 %v3227_v2, %v3233_v51 }
 0x84b   : > { %v3238_v58 = vmax.f32 %v3229_v50, %v3234_v53 }
 0x84c   : > { %v3271_v59 = vpack.c.bf16 %v3237_v56, %v3235_v54 }
 0x84d   : > { %v3272_v15 = vpack.c.bf16 %v3238_v58, %v3236_v57 }
 0x84f   : > { %3402 = vmatprep.mubr.bf16.mxu1 %v3272_v15 }
 0x850   : > { %3403 = vmatmul.mubr.bf16.vlgmr.msra.gmra.mrb[20].mxu1 %v3271_v59 }
 0x851   : > { %4075 = vmatpush3.bf16.msra.mxu1 %v4594_v17  ;;  %4090 = vmatprep.mubr.msk.bf16.mxu1 %vm4620_vm0, %v4619_v55 }
 0x852   : > { %4076 = vmatprep.subr.bf16.mxu1 %v4619_v55 }
 0x855   : > { %4077 = vmatpush3.bf16.msra.mxu1 %v4595_v60 }
 0x856   : > { %4078 = vmatprep.subr.bf16.mxu1 %v4619_v55 }
 0x859   : > { %4079 = vmatpush3.bf16.msra.mxu1 %v4596_v61 }
 0x85a   : > { %4080 = vmatprep.subr.bf16.mxu1 %v4619_v55 }
 0x85d   : > { %4081 = vmatpush3.bf16.msra.mxu1 %v4597_v62 }
 0x85e   : > { %4082 = vmatprep.subr.bf16.mxu1 %v4619_v55 }
 0x861   : > { %4083 = vmatpush3.bf16.msra.mxu1 %v4598_v63 }
 0x862   : > { %4084 = vmatprep.subr.bf16.mxu1 %v4619_v55 }
 0x865   : > { %4085 = vmatpush3.bf16.msra.mxu1 %v4599_v0 }
 0x866   : > { %4086 = vmatprep.subr.bf16.mxu1 %v4619_v55 }
 0x869   : > { %4087 = vmatpush3.bf16.msra.mxu1 %v4600_v1 }
 0x86a   : > { %4088 = vmatprep.subr.bf16.mxu1 %v4619_v55 }
 0x86d   : > { %4089 = vmatpush3.bf16.msra.mxu1 %v4601_v14 }
 0x923   : > { %v4039_v52 = vpop.f32.mrb[20].mxu1 }
 0x924   : > { %v4040_v4 = vpop.f32.mrb[21].mxu1 }
 0x925   : > { %v4041_v5 = vadd.f32 %v4040_v4, %v4039_v52  ;;  %v4042_v6 = vpop.f32.mrb[22].mxu1 }
 0x926   : > { %v4043_v7 = vpop.f32.mrb[23].mxu1 }
 0x927   : > { %v3405_v8 = vadd.f32 %v4041_v5, %v3273_v3  ;;  %v4044_v9 = vadd.f32 %v4043_v7, %v4042_v6 }
 0x929   : > { %v3411_v10 = vmul.f32 0.01, %v3405_v8  ;;  %v3408_v11 = vadd.f32 %v4044_v9, %v3273_v3 }
 0x92b   : > { %v3412_v55 = vmul.f32 0.01, %v3408_v11  ;;  %v3413_v12 = vmax.f32 %v3405_v8, %v3411_v10 }
 0x92d   : > { %v3414_v13 = vmax.f32 %v3408_v11, %v3412_v55 }
 0x92f   : > { %v3431_v16 = vpack.c.bf16 %v3414_v13, %v3413_v12 }
 0x931   : > { %4091 = vmatmul.mubr.bf16.vlgmr.msra.gmra.mrb[24].mxu1 %v3431_v16 }
 0xa04   : > { %v3515_v19 = vpop.f32.mrb[24].mxu1 }
 0xa05   : > { %v3516_v20 = vadd.f32 %v3515_v19, %v3432_v18  ;;  %v4092_v21 = vpop.f32.mrb[25].mxu1 }
 0xa06   : > { %v3518_v22 = vpop.f32.mrb[26].mxu1 }
 0xa07   : > { %4606 = vtanh.f32 %v3516_v20  ;;  %v3519_v23 = vadd.f32 %v3518_v22, %v3432_v18  ;;  %v4093_v24 = vpop.f32.mrb[27].mxu1 }
 0xa09   : > { %4608 = vtanh.f32 %v3519_v23 }
 0xa11   : > { %v4607_v25 = vpop.eup %4606 }
 0xa12   : > { %3524 = vst [vmem:[%s527_s29] sm:$0xff] %v4607_v25 }
 0xa13   : > { %v4609_v26 = vpop.eup %4608 }
 0xa14   : > { %3525 = vst [vmem:[%s527_s29 + $0x8] sm:$0xff] %v4609_v26 }
 0xa15 PF: > { %s26_s18 = sadd.s32 1, %s4616_s18  }
 0xa16   : > { %p23_p4 = scmp.ge.s32.totalorder %s26_s18, 4  }
 0xa18   :  { %25 = sbr.rel (!%p23_p4) target bundleno = 1 (0x1), region = 129 }

// kernel: _lambda_.1
= control target key start
LH: loop header
LB: loop body
LE: loop exit
PB: predicated region body
PF: predicated region fallthrough
CT: control target
= control target key end

     0   :  { %s4701_s18 = smov 0   ;;  %s5832_s0 = inlined_call_operand.vmem [shape: bf16[32,128], index: 0, kind: input, shape index: {}]   ;;  %s5833_s1 = inlined_call_operand.vmem [shape: f32[32,128], index: 1, kind: input, shape index: {}]   ;;  %s5834_s2 = inlined_call_operand.vmem [shape: f32[11,384], index: 2, kind: input, shape index: {}]   ;;  %s5835_s3 = inlined_call_operand.vmem [shape: bf16[128,256], index: 3, kind: input, shape index: {}]   ;;  %s5836_s4 = inlined_call_operand.vmem [shape: bf16[256,256], index: 4, kind: input, shape index: {}]   ;;  %s5837_s5 = inlined_call_operand.vmem [shape: bf16[256,256], index: 5, kind: input, shape index: {}]   ;;  %s5838_s6 = inlined_call_operand.vmem [shape: bf16[256,384], index: 6, kind: input, shape index: {}]   ;;  %s5839_s7 = inlined_call_operand.vmem [shape: bf16[384,256], index: 7, kind: input, shape index: {}]   ;;  %s5840_s8 = inlined_call_operand.vmem [shape: bf16[128,384], index: 8, kind: input, shape index: {}]   ;;  %s5841_s9 = inlined_call_operand.vmem [shape: bf16[384,256], index: 9, kind: input, shape index: {}]   ;;  %s5842_s10 = inlined_call_operand.vmem [shape: bf16[256,256], index: 10, kind: input, shape index: {}]   ;;  %s5843_s11 = inlined_call_operand.vmem [shape: bf16[256,256], index: 11, kind: input, shape index: {}]   ;;  %s5844_s12 = inlined_call_operand.vmem [shape: bf16[256,128], index: 12, kind: input, shape index: {}]   ;;  %s5845_s13 = inlined_call_operand.vmem [shape: bf16[128,128], index: 13, kind: input, shape index: {}]   ;;  %s5846_s14 = inlined_call_operand.vmem [shape: f32[32,128], index: 14, kind: output, shape index: {0}]   ;;  %s5847_s15 = inlined_call_operand.vmem [shape: f32[32,256], index: 15, kind: output, shape index: {1}]  }
   0x1 LB: > { %s3630_s19 = sadd.s32 4294967295, %s4616_s18   ;;  %p3634_p0 = scmp.ge.s32.totalorder %s4616_s18, 1  ;;  %s4616_s18 = sphi %s4701_s18, %s26_s18  }
   0x2   : > { %p452_p1 = scmp.lt.s32.totalorder %s4616_s18, 3 }
   0x4   : > { %p453_p2 = pnand %p3634_p0, %p452_p1 }
   0x5   : > { %v4121_v0 = vld [vmem:[%s5835_s3 + $0x4] ss:$8 sps:$4 sm:$0xff] (!%p453_p2)   ;;  %s3635_s22 = sshll.u32 (!%p453_p2), %s3630_s19, 1  ;;  %v4123_v1 = vld [vmem:[%s5835_s3] ss:$8 sps:$4 sm:$0xff] (!%p453_p2)   ;;  %v4618_v2 = vmov (!%p453_p2), 0  }
   0x6   : > { %456 = sbr.rel (%p453_p2) target bundleno = 2581 (0xa15), region = 76  ;;  %685 = vmatprep.mubr.bf16.mxu0 (!%p453_p2), %v4618_v2  ;;  %p512_p3 = scmp.lt.s32.totalorder (!%p453_p2), %s3635_s22, 3  ;;  %653 = vmatprep.subr.bf16.mxu0 (!%p453_p2), %v4121_v0  ;;  %v4124_v3 = vld [vmem:[%s5835_s3 + $0x14] ss:$8 sps:$4 sm:$0xff] (!%p453_p2)   ;;  %v4126_v4 = vld [vmem:[%s5835_s3 + $0x10] ss:$8 sps:$4 sm:$0xff] (!%p453_p2)  }
   0x7   : > { %654 = vmatpush1.bf16.msra.mxu0 (!%p453_p2), %v4123_v1  ;;  %v4127_v5 = vld [vmem:[%s5835_s3 + $0x24] ss:$8 sps:$4 sm:$0xff] (!%p453_p2)   ;;  %v4129_v6 = vld [vmem:[%s5835_s3 + $0x20] ss:$8 sps:$4 sm:$0xff] (!%p453_p2)   ;;  %v4130_v7 = vld [vmem:[%s5835_s3 + $0x34] ss:$8 sps:$4 sm:$0xff] (!%p453_p2)  }
   0x8   : > { %655 = vmatprep.subr.bf16.mxu0 (!%p453_p2), %v4124_v3  ;;  %v4132_v8 = vld [vmem:[%s5835_s3 + $0x30] ss:$8 sps:$4 sm:$0xff] (!%p453_p2)   ;;  %v4133_v9 = vld [vmem:[%s5835_s3 + $0x44] ss:$8 sps:$4 sm:$0xff] (!%p453_p2)   ;;  %v4148_v11 = vld [vmem:[%s5836_s4] ss:$8 sps:$4 sm:$0xff] (!%p453_p2)  }
   0x9   : > { %v4146_v10 = vld [vmem:[%s5836_s4 + $0x4] ss:$8 sps:$4 sm:$0xff] (!%p453_p2)   ;;  %v4149_v12 = vld [vmem:[%s5836_s4 + $0x14] ss:$8 sps:$4 sm:$0xff] (!%p453_p2)   ;;  %v4135_v13 = vld [vmem:[%s5835_s3 + $0x40] ss:$8 sps:$4 sm:$0xff] (!%p453_p2)  }
   0xa   : > { %911 = vmatprep.subr.bf16.mxu1 (!%p453_p2), %v4146_v10  ;;  %v4151_v14 = vld [vmem:[%s5836_s4 + $0x10] ss:$8 sps:$4 sm:$0xff] (!%p453_p2)   ;;  %v4136_v15 = vld [vmem:[%s5835_s3 + $0x54] ss:$8 sps:$4 sm:$0xff] (!%p453_p2)   ;;  %v4152_v16 = vld [vmem:[%s5836_s4 + $0x24] ss:$8 sps:$4 sm:$0xff] (!%p453_p2)  }
   0xb   : > { %656 = vmatpush1.bf16.msra.mxu0 (!%p453_p2), %v4126_v4  ;;  %912 = vmatpush1.bf16.msra.mxu1 (!%p453_p2), %v4148_v11  ;;  %v4138_v17 = vld [vmem:[%s5835_s3 + $0x50] ss:$8 sps:$4 sm:$0xff] (!%p453_p2)   ;;  %v4154_v18 = vld [vmem:[%s5836_s4 + $0x20] ss:$8 sps:$4 sm:$0xff] (!%p453_p2)   ;;  %v4139_v19 = vld [vmem:[%s5835_s3 + $0x64] ss:$8 sps:$4 sm:$0xff] (!%p453_p2)  }
   0xc   : > { %657 = vmatprep.subr.bf16.mxu0 (!%p453_p2), %v4127_v5  ;;  %913 = vmatprep.subr.bf16.mxu1 (!%p453_p2), %v4149_v12  ;;  %v4155_v20 = vld [vmem:[%s5836_s4 + $0x34] ss:$8 sps:$4 sm:$0xff] (!%p453_p2)   ;;  %v4141_v21 = vld [vmem:[%s5835_s3 + $0x60] ss:$8 sps:$4 sm:$0xff] (!%p453_p2)   ;;  %v4157_v22 = vld [vmem:[%s5836_s4 + $0x30] ss:$8 sps:$4 sm:$0xff] (!%p453_p2)  }
   0xd   : > { %s5849_s22 = smov (!%p512_p3, %s3635_s22), 3  ;;  %v4142_v23 = vld [vmem:[%s5835_s3 + $0x74] ss:$8 sps:$4 sm:$0xff]   ;;  %v4158_v24 = vld [vmem:[%s5836_s4 + $0x44] ss:$8 sps:$4 sm:$0xff]   ;;  %vm4620_vm0 = vmmov 0  }
   0xe   : > { %s3636_s16 = sshll.u32 %s5849_s22, 2  ;;  %v4144_v25 = vld [vmem:[%s5835_s3 + $0x70] ss:$8 sps:$4 sm:$0xff]   ;;  %v4160_v26 = vld [vmem:[%s5836_s4 + $0x40] ss:$8 sps:$4 sm:$0xff]   ;;  %s3991_s19 = sshll.u32 %s5849_s22, 4 }
   0xf   : > { %s4737_s25 = scalar_lea.vmem %s5832_s0, %s3636_s16  ;;  %658 = vmatpush1.bf16.msra.mxu0 %v4129_v6  ;;  %914 = vmatpush1.bf16.msra.mxu1 %v4151_v14  ;;  %v4161_v28 = vld [vmem:[%s5836_s4 + $0x54] ss:$8 sps:$4 sm:$0xff]   ;;  %v4163_v29 = vld [vmem:[%s5836_s4 + $0x50] ss:$8 sps:$4 sm:$0xff]   ;;  %v4164_v30 = vld [vmem:[%s5836_s4 + $0x64] ss:$8 sps:$4 sm:$0xff]   ;;  %s534_s21 = scalar_lea.vmem %s5847_s15, %s3991_s19 }
  0x10   : > { %659 = vmatprep.subr.bf16.mxu0 %v4130_v7  ;;  %915 = vmatprep.subr.bf16.mxu1 %v4152_v16  ;;  %v4145_v27 = vld [vmem:[%s4737_s25] sm:$0xff]   ;;  %v4167_v32 = vld [vmem:[%s5836_s4 + $0x74] ss:$8 sps:$4 sm:$0xff]   ;;  %v4169_v33 = vld [vmem:[%s5836_s4 + $0x70] ss:$8 sps:$4 sm:$0xff]   ;;  %s3638_s25 = sshll.u32 %s5849_s22, 3 }
  0x11   : > { %v4166_v31 = vld [vmem:[%s5836_s4 + $0x60] ss:$8 sps:$4 sm:$0xff]   ;;  %v4170_v34 = vld [vmem:[%s5836_s4 + $0x84] ss:$8 sps:$4 sm:$0xff]   ;;  %v4173_v36 = vld [vmem:[%s5836_s4 + $0x94] ss:$8 sps:$4 sm:$0xff]   ;;  %s521_s26 = scalar_lea.vmem %s5833_s1, %s3638_s25  ;;  %s527_s29 = scalar_lea.vmem %s5846_s14, %s3638_s25 }
  0x12   : > { %v4172_v35 = vld [vmem:[%s5836_s4 + $0x80] ss:$8 sps:$4 sm:$0xff]   ;;  %v4175_v37 = vld [vmem:[%s5836_s4 + $0x90] ss:$8 sps:$4 sm:$0xff]   ;;  %v4176_v38 = vld [vmem:[%s5836_s4 + $0xa4] ss:$8 sps:$4 sm:$0xff]  }
  0x13   : > { %660 = vmatpush1.bf16.msra.mxu0 %v4132_v8  ;;  %916 = vmatpush1.bf16.msra.mxu1 %v4154_v18  ;;  %v4178_v39 = vld [vmem:[%s5836_s4 + $0xa0] ss:$8 sps:$4 sm:$0xff]   ;;  %v4179_v40 = vld [vmem:[%s5836_s4 + $0xb4] ss:$8 sps:$4 sm:$0xff]   ;;  %v4181_v41 = vld [vmem:[%s5836_s4 + $0xb0] ss:$8 sps:$4 sm:$0xff]  }
  0x14   : > { %661 = vmatprep.subr.bf16.mxu0 %v4133_v9  ;;  %917 = vmatprep.subr.bf16.mxu1 %v4155_v20  ;;  %v4182_v42 = vld [vmem:[%s5836_s4 + $0xc4] ss:$8 sps:$4 sm:$0xff]   ;;  %v4184_v43 = vld [vmem:[%s5836_s4 + $0xc0] ss:$8 sps:$4 sm:$0xff]   ;;  %v4185_v44 = vld [vmem:[%s5836_s4 + $0xd4] ss:$8 sps:$4 sm:$0xff]  }
  0x15   : > { %v4187_v45 = vld [vmem:[%s5836_s4 + $0xd0] ss:$8 sps:$4 sm:$0xff]   ;;  %v4188_v46 = vld [vmem:[%s5836_s4 + $0xe4] ss:$8 sps:$4 sm:$0xff]   ;;  %v4190_v47 = vld [vmem:[%s5836_s4 + $0xe0] ss:$8 sps:$4 sm:$0xff]  }
  0x16   : > { %v4191_v48 = vld [vmem:[%s5836_s4 + $0xf4] ss:$8 sps:$4 sm:$0xff]   ;;  %v4193_v49 = vld [vmem:[%s5836_s4 + $0xf0] ss:$8 sps:$4 sm:$0xff]   ;;  %v4194_v50 = vld [vmem:[%s5837_s5] ss:$8 sps:$4 sm:$0xff]  }
  0x17   : > { %662 = vmatpush1.bf16.msra.mxu0 %v4135_v13  ;;  %918 = vmatpush1.bf16.msra.mxu1 %v4157_v22  ;;  %v4196_v51 = vld [vmem:[%s5837_s5 + $0x4] ss:$8 sps:$4 sm:$0xff]   ;;  %v4199_v52 = vld [vmem:[%s5837_s5 + $0x14] ss:$8 sps:$4 sm:$0xff]   ;;  %v4197_v53 = vld [vmem:[%s5837_s5 + $0x10] ss:$8 sps:$4 sm:$0xff]   ;;  %v557_v13 = vlaneseq }
  0x18   : > { %663 = vmatprep.subr.bf16.mxu0 %v4136_v15  ;;  %919 = vmatprep.subr.bf16.mxu1 %v4158_v24  ;;  %v4202_v54 = vld [vmem:[%s5837_s5 + $0x24] ss:$8 sps:$4 sm:$0xff]   ;;  %v4200_v55 = vld [vmem:[%s5837_s5 + $0x20] ss:$8 sps:$4 sm:$0xff]   ;;  %v4205_v56 = vld [vmem:[%s5837_s5 + $0x34] ss:$8 sps:$4 sm:$0xff]  }
  0x19   : > { %v4203_v57 = vld [vmem:[%s5837_s5 + $0x30] ss:$8 sps:$4 sm:$0xff]   ;;  %v4208_v58 = vld [vmem:[%s5837_s5 + $0x44] ss:$8 sps:$4 sm:$0xff]   ;;  %v4206_v59 = vld [vmem:[%s5837_s5 + $0x40] ss:$8 sps:$4 sm:$0xff]  }
  0x1a   : > { %v4211_v60 = vld [vmem:[%s5837_s5 + $0x54] ss:$8 sps:$4 sm:$0xff]   ;;  %v4209_v61 = vld [vmem:[%s5837_s5 + $0x50] ss:$8 sps:$4 sm:$0xff]   ;;  %v4214_v62 = vld [vmem:[%s5837_s5 + $0x64] ss:$8 sps:$4 sm:$0xff]  }
  0x1b   : > { %664 = vmatpush1.bf16.msra.mxu0 %v4138_v17  ;;  %920 = vmatpush1.bf16.msra.mxu1 %v4160_v26  ;;  %v4212_v63 = vld [vmem:[%s5837_s5 + $0x60] ss:$8 sps:$4 sm:$0xff]   ;;  %v4217_v0 = vld [vmem:[%s5837_s5 + $0x74] ss:$8 sps:$4 sm:$0xff]   ;;  %v4215_v1 = vld [vmem:[%s5837_s5 + $0x70] ss:$8 sps:$4 sm:$0xff]  }
  0x1c   : > { %665 = vmatprep.subr.bf16.mxu0 %v4139_v19  ;;  %921 = vmatprep.subr.bf16.mxu1 %v4161_v28  ;;  %v4220_v3 = vld [vmem:[%s5837_s5 + $0x84] ss:$8 sps:$4 sm:$0xff]   ;;  %v4218_v4 = vld [vmem:[%s5837_s5 + $0x80] ss:$8 sps:$4 sm:$0xff]   ;;  %v4223_v5 = vld [vmem:[%s5837_s5 + $0x94] ss:$8 sps:$4 sm:$0xff]  }
  0x1d   : > { %v4221_v6 = vld [vmem:[%s5837_s5 + $0x90] ss:$8 sps:$4 sm:$0xff]   ;;  %v4226_v7 = vld [vmem:[%s5837_s5 + $0xa4] ss:$8 sps:$4 sm:$0xff]   ;;  %v4224_v8 = vld [vmem:[%s5837_s5 + $0xa0] ss:$8 sps:$4 sm:$0xff]  }
  0x1e   : > { %v4229_v9 = vld [vmem:[%s5837_s5 + $0xb4] ss:$8 sps:$4 sm:$0xff]   ;;  %v4227_v10 = vld [vmem:[%s5837_s5 + $0xb0] ss:$8 sps:$4 sm:$0xff]   ;;  %v4232_v11 = vld [vmem:[%s5837_s5 + $0xc4] ss:$8 sps:$4 sm:$0xff]  }
  0x1f   : > { %666 = vmatpush1.bf16.msra.mxu0 %v4141_v21  ;;  %922 = vmatpush1.bf16.msra.mxu1 %v4163_v29  ;;  %v4230_v12 = vld [vmem:[%s5837_s5 + $0xc0] ss:$8 sps:$4 sm:$0xff]   ;;  %v4941_v14 = vshrl.u32 %v557_v13, 7 }
  0x20   : > { %667 = vmatprep.subr.bf16.mxu0 %v4142_v23  ;;  %923 = vmatprep.subr.bf16.mxu1 %v4164_v30  ;;  %v555_v16 = vld [vmem:[%s5834_s2] ss:$8 sm:$0x3] }
  0x21   : > { %v4944_v15 = vsub.s32 0, %v4941_v14  ;;  %v4950_v17 = vsub.s32 1, %v4941_v14 }
  0x23   : > { %668 = vmatpush1.bf16.msra.mxu0 %v4144_v25  ;;  %924 = vmatpush1.bf16.msra.mxu1 %v4166_v31  ;;  %v560_v18 = vrot.slane %v555_v16, %v4944_v15  ;;  %v564_v19 = vrot.slane %v555_v16, %v4950_v17 }
  0x24   : > { %925 = vmatprep.subr.bf16.mxu1 %v4167_v32  ;;  %1169 = vmatprep.subr.bf16.mxu0 %v4196_v51  ;;  %v4253_v51 = vld [vmem:[%s5838_s6 + $0x4c] ss:$12 sps:$4 sm:$0xff]  }
  0x26   : > { %686 = vmatmul.mubr.bf16.vlgmr.msra.gmra.mrb[0].mxu0 %v4145_v27 }
  0x27   : > { %926 = vmatpush1.bf16.msra.mxu1 %v4169_v33  ;;  %1170 = vmatpush1.bf16.msra.mxu0 %v4194_v50  ;;  %v4248_v50 = vld [vmem:[%s5838_s6 + $0x30] ss:$12 sps:$4 sm:$0xff]  }
  0x28   : > { %927 = vmatprep.subr.bf16.mxu1 %v4170_v34  ;;  %1171 = vmatprep.subr.bf16.mxu0 %v4199_v52  ;;  %v4251_v52 = vld [vmem:[%s5838_s6 + $0x48] ss:$12 sps:$4 sm:$0xff]  }
  0x2b   : > { %928 = vmatpush1.bf16.msra.mxu1 %v4172_v35  ;;  %1172 = vmatpush1.bf16.msra.mxu0 %v4197_v53  ;;  %v4256_v53 = vld [vmem:[%s5838_s6 + $0x64] ss:$12 sps:$4 sm:$0xff]  }
  0x2c   : > { %929 = vmatprep.subr.bf16.mxu1 %v4173_v36  ;;  %1173 = vmatprep.subr.bf16.mxu0 %v4202_v54  ;;  %v4254_v54 = vld [vmem:[%s5838_s6 + $0x60] ss:$12 sps:$4 sm:$0xff]  }
  0x2f   : > { %930 = vmatpush1.bf16.msra.mxu1 %v4175_v37  ;;  %1174 = vmatpush1.bf16.msra.mxu0 %v4200_v55  ;;  %v4259_v55 = vld [vmem:[%s5838_s6 + $0x7c] ss:$12 sps:$4 sm:$0xff]  }
  0x30   : > { %931 = vmatprep.subr.bf16.mxu1 %v4176_v38  ;;  %1175 = vmatprep.subr.bf16.mxu0 %v4205_v56  ;;  %v4235_v38 = vld [vmem:[%s5837_s5 + $0xd4] ss:$8 sps:$4 sm:$0xff]   ;;  %v4257_v56 = vld [vmem:[%s5838_s6 + $0x78] ss:$12 sps:$4 sm:$0xff]  }
  0x33   : > { %932 = vmatpush1.bf16.msra.mxu1 %v4178_v39  ;;  %1176 = vmatpush1.bf16.msra.mxu0 %v4203_v57  ;;  %v4233_v39 = vld [vmem:[%s5837_s5 + $0xd0] ss:$8 sps:$4 sm:$0xff]   ;;  %v4262_v57 = vld [vmem:[%s5838_s6 + $0x94] ss:$12 sps:$4 sm:$0xff]  }
  0x34   : > { %933 = vmatprep.subr.bf16.mxu1 %v4179_v40  ;;  %1177 = vmatprep.subr.bf16.mxu0 %v4208_v58  ;;  %v4238_v40 = vld [vmem:[%s5837_s5 + $0xe4] ss:$8 sps:$4 sm:$0xff]   ;;  %v4260_v58 = vld [vmem:[%s5838_s6 + $0x90] ss:$12 sps:$4 sm:$0xff]  }
  0x37   : > { %934 = vmatpush1.bf16.msra.mxu1 %v4181_v41  ;;  %1178 = vmatpush1.bf16.msra.mxu0 %v4206_v59  ;;  %v4236_v41 = vld [vmem:[%s5837_s5 + $0xe0] ss:$8 sps:$4 sm:$0xff]   ;;  %v4265_v59 = vld [vmem:[%s5838_s6 + $0xac] ss:$12 sps:$4 sm:$0xff]  }
  0x38   : > { %935 = vmatprep.subr.bf16.mxu1 %v4182_v42  ;;  %1179 = vmatprep.subr.bf16.mxu0 %v4211_v60  ;;  %v4241_v42 = vld [vmem:[%s5837_s5 + $0xf4] ss:$8 sps:$4 sm:$0xff]  }
  0x39   : > { %v4263_v60 = vld [vmem:[%s5838_s6 + $0xa8] ss:$12 sps:$4 sm:$0xff]  }
  0x3b   : > { %936 = vmatpush1.bf16.msra.mxu1 %v4184_v43  ;;  %1180 = vmatpush1.bf16.msra.mxu0 %v4209_v61  ;;  %v4239_v43 = vld [vmem:[%s5837_s5 + $0xf0] ss:$8 sps:$4 sm:$0xff]  }
  0x3c   : > { %937 = vmatprep.subr.bf16.mxu1 %v4185_v44  ;;  %1181 = vmatprep.subr.bf16.mxu0 %v4214_v62  ;;  %v4242_v44 = vld [vmem:[%s5838_s6] ss:$12 sps:$4 sm:$0xff]   ;;  %v4268_v61 = vld [vmem:[%s5838_s6 + $0xc4] ss:$12 sps:$4 sm:$0xff]  }
  0x3d   : > { %v4266_v62 = vld [vmem:[%s5838_s6 + $0xc0] ss:$12 sps:$4 sm:$0xff]  }
  0x3f   : > { %938 = vmatpush1.bf16.msra.mxu1 %v4187_v45  ;;  %1182 = vmatpush1.bf16.msra.mxu0 %v4212_v63  ;;  %v4244_v45 = vld [vmem:[%s5838_s6 + $0x4] ss:$12 sps:$4 sm:$0xff]   ;;  %v4273_v63 = vld [vmem:[%s5838_s6 + $0xdc] ss:$12 sps:$4 sm:$0xff]  }
  0x40   : > { %939 = vmatprep.subr.bf16.mxu1 %v4188_v46  ;;  %1183 = vmatprep.subr.bf16.mxu0 %v4217_v0  ;;  %v4247_v46 = vld [vmem:[%s5838_s6 + $0x1c] ss:$12 sps:$4 sm:$0xff]   ;;  %v4271_v0 = vld [vmem:[%s5838_s6 + $0xd8] ss:$12 sps:$4 sm:$0xff]  }
  0x43   : > { %940 = vmatpush1.bf16.msra.mxu1 %v4190_v47  ;;  %1184 = vmatpush1.bf16.msra.mxu0 %v4215_v1  ;;  %v4245_v47 = vld [vmem:[%s5838_s6 + $0x18] ss:$12 sps:$4 sm:$0xff]   ;;  %v4278_v1 = vld [vmem:[%s5838_s6 + $0xf4] ss:$12 sps:$4 sm:$0xff]  }
  0x44   : > { %941 = vmatprep.subr.bf16.mxu1 %v4191_v48  ;;  %1185 = vmatprep.subr.bf16.mxu0 %v4220_v3  ;;  %v4250_v48 = vld [vmem:[%s5838_s6 + $0x34] ss:$12 sps:$4 sm:$0xff]   ;;  %v4276_v3 = vld [vmem:[%s5838_s6 + $0xf0] ss:$12 sps:$4 sm:$0xff]  }
  0x47   : > { %942 = vmatpush1.bf16.msra.mxu1 %v4193_v49  ;;  %1186 = vmatpush1.bf16.msra.mxu0 %v4218_v4  ;;  %v4269_v49 = vld [vmem:[%s5838_s6 + $0xc8] ss:$12 sps:$4 sm:$0xff]   ;;  %v4283_v4 = vld [vmem:[%s5838_s6 + $0x10c] ss:$12 sps:$4 sm:$0xff]  }
  0x48   : > { %1187 = vmatprep.subr.bf16.mxu0 %v4223_v5  ;;  %1560 = vmatprep.subr.bf16.mxu1 %v4244_v45  ;;  %v4281_v5 = vld [vmem:[%s5838_s6 + $0x108] ss:$12 sps:$4 sm:$0xff]  }
  0x49   : > { %v4298_v45 = vld [vmem:[%s5838_s6 + $0x154] ss:$12 sps:$4 sm:$0xff]  }
  0x4b   : > { %1188 = vmatpush1.bf16.msra.mxu0 %v4221_v6  ;;  %v4288_v6 = vld [vmem:[%s5838_s6 + $0x124] ss:$12 sps:$4 sm:$0xff]  }
  0x4c   : > { %1189 = vmatprep.subr.bf16.mxu0 %v4226_v7  ;;  %v4286_v7 = vld [vmem:[%s5838_s6 + $0x120] ss:$12 sps:$4 sm:$0xff]  }
  0x4f   : > { %1190 = vmatpush1.bf16.msra.mxu0 %v4224_v8  ;;  %v3661_v8 = vld [vmem:[%s5834_s2 + $0x1] ss:$8 sm:$0x3] }
  0x50   : > { %1191 = vmatprep.subr.bf16.mxu0 %v4229_v9  ;;  %v744_v9 = vrot.slane %v3661_v8, %v4944_v15 }
  0x53   : > { %1192 = vmatpush1.bf16.msra.mxu0 %v4227_v10  ;;  %v748_v10 = vrot.slane %v3661_v8, %v4950_v17 }
  0x54   : > { %1193 = vmatprep.subr.bf16.mxu0 %v4232_v11 }
  0x57   : > { %1194 = vmatpush1.bf16.msra.mxu0 %v4230_v12 }
  0x58   : > { %1195 = vmatprep.subr.bf16.mxu0 %v4235_v38  ;;  %v4285_v38 = vld [vmem:[%s5838_s6 + $0x50] ss:$12 sps:$4 sm:$0xff]  }
  0x5b   : > { %1196 = vmatpush1.bf16.msra.mxu0 %v4233_v39  ;;  %v4289_v39 = vld [vmem:[%s5838_s6 + $0x128] ss:$12 sps:$4 sm:$0xff]  }
  0x5c   : > { %1197 = vmatprep.subr.bf16.mxu0 %v4238_v40  ;;  %v4290_v40 = vld [vmem:[%s5838_s6 + $0x68] ss:$12 sps:$4 sm:$0xff]  }
  0x5f   : > { %1198 = vmatpush1.bf16.msra.mxu0 %v4236_v41  ;;  %v4293_v41 = vld [vmem:[%s5838_s6 + $0x13c] ss:$12 sps:$4 sm:$0xff]  }
  0x60   : > { %1199 = vmatprep.subr.bf16.mxu0 %v4241_v42  ;;  %v4294_v42 = vld [vmem:[%s5838_s6 + $0x140] ss:$12 sps:$4 sm:$0xff]  }
  0x63   : > { %1200 = vmatpush1.bf16.msra.mxu0 %v4239_v43  ;;  %v4291_v43 = vld [vmem:[%s5838_s6 + $0x138] ss:$12 sps:$4 sm:$0xff]  }
  0x64   : > { %3992 = vmatprep.subr.bf16.mxu0 %v4269_v49  ;;  %v4303_v49 = vld [vmem:[%s5838_s6 + $0x16c] ss:$12 sps:$4 sm:$0xff]  }
  0xf9   : > { %v687_v20 = vpop.f32.mrb[0].mxu0 }
  0xfa   : > { %v688_v21 = vadd.f32 %v687_v20, %v560_v18  ;;  %v689_v22 = vpop.f32.mrb[1].mxu0 }
  0xfb   : > { %v690_v23 = vadd.f32 %v689_v22, %v564_v19  ;;  %v691_v24 = vpop.f32.mrb[2].mxu0 }
  0xfc   : > { %v696_v25 = vmul.f32 0.01, %v688_v21  ;;  %v692_v26 = vadd.f32 %v691_v24, %v560_v18  ;;  %v693_v27 = vpop.f32.mrb[3].mxu0 }
  0xfd   : > { %v697_v28 = vmul.f32 0.01, %v690_v23  ;;  %v694_v29 = vadd.f32 %v693_v27, %v564_v19 }
  0xfe   : > { %v698_v30 = vmul.f32 0.01, %v692_v26  ;;  %v700_v32 = vmax.f32 %v688_v21, %v696_v25 }
  0xff   : > { %v699_v31 = vmul.f32 0.01, %v694_v29  ;;  %v701_v34 = vmax.f32 %v690_v23, %v697_v28 }
 0x100   : > { %v702_v33 = vmax.f32 %v692_v26, %v698_v30 }
 0x101   : > { %v703_v35 = vmax.f32 %v694_v29, %v699_v31 }
 0x102   : > { %v736_v36 = vpack.c.bf16 %v702_v33, %v700_v32  ;;  %v4270_v32 = vld [vmem:[%s5838_s6 + $0x8] ss:$12 sps:$4 sm:$0xff]   ;;  %v4274_v33 = vld [vmem:[%s5838_s6 + $0xe0] ss:$12 sps:$4 sm:$0xff]  }
 0x103   : > { %v737_v37 = vpack.c.bf16 %v703_v35, %v701_v34  ;;  %v4275_v34 = vld [vmem:[%s5838_s6 + $0x20] ss:$12 sps:$4 sm:$0xff]   ;;  %v4279_v35 = vld [vmem:[%s5838_s6 + $0xf8] ss:$12 sps:$4 sm:$0xff]  }
 0x105   : > { %943 = vmatprep.mubr.bf16.mxu1 %v737_v37  ;;  %v4284_v37 = vld [vmem:[%s5838_s6 + $0x110] ss:$12 sps:$4 sm:$0xff]  }
 0x106   : > { %944 = vmatmul.mubr.bf16.vlgmr.msra.gmra.mrb[0].mxu1 %v736_v36  ;;  %v4280_v36 = vld [vmem:[%s5838_s6 + $0x38] ss:$12 sps:$4 sm:$0xff]  }
 0x107   : > { %1561 = vmatpush1.bf16.msra.mxu1 %v4242_v44  ;;  %v4295_v44 = vld [vmem:[%s5838_s6 + $0x80] ss:$12 sps:$4 sm:$0xff]  }
 0x108   : > { %1562 = vmatprep.subr.bf16.mxu1 %v4247_v46  ;;  %v4299_v46 = vld [vmem:[%s5838_s6 + $0x158] ss:$12 sps:$4 sm:$0xff]  }
 0x10b   : > { %1563 = vmatpush1.bf16.msra.mxu1 %v4245_v47  ;;  %v4296_v47 = vld [vmem:[%s5838_s6 + $0x150] ss:$12 sps:$4 sm:$0xff]  }
 0x10c   : > { %1564 = vmatprep.subr.bf16.mxu1 %v4250_v48  ;;  %v4300_v48 = vld [vmem:[%s5838_s6 + $0x98] ss:$12 sps:$4 sm:$0xff]  }
 0x10f   : > { %1565 = vmatpush1.bf16.msra.mxu1 %v4248_v50  ;;  %v4304_v50 = vld [vmem:[%s5838_s6 + $0x170] ss:$12 sps:$4 sm:$0xff]  }
 0x110   : > { %1566 = vmatprep.subr.bf16.mxu1 %v4253_v51  ;;  %v4301_v51 = vld [vmem:[%s5838_s6 + $0x168] ss:$12 sps:$4 sm:$0xff]  }
 0x113   : > { %1567 = vmatpush1.bf16.msra.mxu1 %v4251_v52  ;;  %v4305_v52 = vld [vmem:[%s5838_s6 + $0xb0] ss:$12 sps:$4 sm:$0xff]  }
 0x114   : > { %1568 = vmatprep.subr.bf16.mxu1 %v4256_v53  ;;  %v4308_v53 = vld [vmem:[%s5839_s7 + $0x4] ss:$8 sps:$4 sm:$0xff]  }
 0x117   : > { %1569 = vmatpush1.bf16.msra.mxu1 %v4254_v54  ;;  %v3694_v54 = vld [vmem:[%s5834_s2 + $0x2] ss:$8 sm:$0x3] }
 0x118   : > { %1570 = vmatprep.subr.bf16.mxu1 %v4259_v55  ;;  %v1002_v55 = vrot.slane %v3694_v54, %v4944_v15 }
 0x11b   : > { %1571 = vmatpush1.bf16.msra.mxu1 %v4257_v56  ;;  %v1006_v56 = vrot.slane %v3694_v54, %v4950_v17 }
 0x11c   : > { %1572 = vmatprep.subr.bf16.mxu1 %v4262_v57 }
 0x11f   : > { %1573 = vmatpush1.bf16.msra.mxu1 %v4260_v58 }
 0x120   : > { %1574 = vmatprep.subr.bf16.mxu1 %v4265_v59 }
 0x123   : > { %1575 = vmatpush1.bf16.msra.mxu1 %v4263_v60 }
 0x124   : > { %1576 = vmatprep.subr.bf16.mxu1 %v4268_v61 }
 0x127   : > { %1577 = vmatpush1.bf16.msra.mxu1 %v4266_v62 }
 0x128   : > { %1578 = vmatprep.subr.bf16.mxu1 %v4273_v63 }
 0x12b   : > { %1579 = vmatpush1.bf16.msra.mxu1 %v4271_v0 }
 0x12c   : > { %1580 = vmatprep.subr.bf16.mxu1 %v4278_v1 }
 0x12f   : > { %1581 = vmatpush1.bf16.msra.mxu1 %v4276_v3 }
 0x130   : > { %1582 = vmatprep.subr.bf16.mxu1 %v4283_v4 }
 0x133   : > { %1583 = vmatpush1.bf16.msra.mxu1 %v4281_v5 }
 0x134   : > { %1584 = vmatprep.subr.bf16.mxu1 %v4288_v6 }
 0x137   : > { %1585 = vmatpush1.bf16.msra.mxu1 %v4286_v7 }
 0x138   : > { %1586 = vmatprep.subr.bf16.mxu1 %v4293_v41  ;;  %v4345_v41 = vld [vmem:[%s5839_s7 + $0xd0] ss:$8 sps:$4 sm:$0xff]  }
 0x13b   : > { %1587 = vmatpush1.bf16.msra.mxu1 %v4291_v43  ;;  %v4348_v43 = vld [vmem:[%s5839_s7 + $0xe0] ss:$8 sps:$4 sm:$0xff]  }
 0x13c   : > { %1588 = vmatprep.subr.bf16.mxu1 %v4298_v45  ;;  %v4351_v45 = vld [vmem:[%s5839_s7 + $0xf0] ss:$8 sps:$4 sm:$0xff]  }
 0x13f   : > { %1589 = vmatpush1.bf16.msra.mxu1 %v4296_v47  ;;  %v4378_v47 = vld [vmem:[%s5840_s8] ss:$12 sps:$4 sm:$0xff]  }
 0x140   : > { %1590 = vmatprep.subr.bf16.mxu1 %v4303_v49  ;;  %v4383_v49 = vld [vmem:[%s5840_s8 + $0x1c] ss:$12 sps:$4 sm:$0xff]  }
 0x143   : > { %1591 = vmatpush1.bf16.msra.mxu1 %v4301_v51  ;;  %v3727_v51 = vld [vmem:[%s5834_s2 + $0x3] ss:$8 sm:$0x7] }
 0x144   : > { %v1296_v54 = vrot.slane %v3727_v51, %v4950_v17 }
 0x1d9   : > { %v945_v11 = vpop.f32.mrb[0].mxu1 }
 0x1da   : > { %v946_v12 = vadd.f32 %v945_v11, %v744_v9  ;;  %v947_v13 = vpop.f32.mrb[1].mxu1 }
 0x1db   : > { %v948_v16 = vadd.f32 %v947_v13, %v748_v10  ;;  %v949_v18 = vpop.f32.mrb[2].mxu1  ;;  %v4311_v13 = vld [vmem:[%s5839_s7 + $0x14] ss:$8 sps:$4 sm:$0xff]  }
 0x1dc   : > { %v954_v19 = vmul.f32 0.01, %v946_v12  ;;  %v950_v20 = vadd.f32 %v949_v18, %v744_v9  ;;  %v951_v21 = vpop.f32.mrb[3].mxu1  ;;  %v4314_v18 = vld [vmem:[%s5839_s7 + $0x24] ss:$8 sps:$4 sm:$0xff]  }
 0x1dd   : > { %v955_v22 = vmul.f32 0.01, %v948_v16  ;;  %v952_v23 = vadd.f32 %v951_v21, %v748_v10  ;;  %v4315_v21 = vld [vmem:[%s5839_s7 + $0x30] ss:$8 sps:$4 sm:$0xff]  }
 0x1de   : > { %v956_v24 = vmul.f32 0.01, %v950_v20  ;;  %v958_v26 = vmax.f32 %v946_v12, %v954_v19  ;;  %v4306_v12 = vld [vmem:[%s5839_s7] ss:$8 sps:$4 sm:$0xff]  }
 0x1df   : > { %v957_v25 = vmul.f32 0.01, %v952_v23  ;;  %v959_v28 = vmax.f32 %v948_v16, %v955_v22  ;;  %v4309_v16 = vld [vmem:[%s5839_s7 + $0x10] ss:$8 sps:$4 sm:$0xff]   ;;  %v4312_v19 = vld [vmem:[%s5839_s7 + $0x20] ss:$8 sps:$4 sm:$0xff]  }
 0x1e0   : > { %v960_v27 = vmax.f32 %v950_v20, %v956_v24  ;;  %v4317_v20 = vld [vmem:[%s5839_s7 + $0x34] ss:$8 sps:$4 sm:$0xff]   ;;  %v4320_v22 = vld [vmem:[%s5839_s7 + $0x44] ss:$8 sps:$4 sm:$0xff]  }
 0x1e1   : > { %v961_v29 = vmax.f32 %v952_v23, %v957_v25  ;;  %v4318_v23 = vld [vmem:[%s5839_s7 + $0x40] ss:$8 sps:$4 sm:$0xff]   ;;  %v4323_v24 = vld [vmem:[%s5839_s7 + $0x54] ss:$8 sps:$4 sm:$0xff]   ;;  %v4321_v25 = vld [vmem:[%s5839_s7 + $0x50] ss:$8 sps:$4 sm:$0xff]  }
 0x1e2   : > { %v994_v30 = vpack.c.bf16 %v960_v27, %v958_v26  ;;  %v4326_v26 = vld [vmem:[%s5839_s7 + $0x64] ss:$8 sps:$4 sm:$0xff]   ;;  %v4324_v27 = vld [vmem:[%s5839_s7 + $0x60] ss:$8 sps:$4 sm:$0xff]  }
 0x1e3   : > { %v995_v31 = vpack.c.bf16 %v961_v29, %v959_v28  ;;  %v4329_v28 = vld [vmem:[%s5839_s7 + $0x74] ss:$8 sps:$4 sm:$0xff]   ;;  %v4327_v29 = vld [vmem:[%s5839_s7 + $0x70] ss:$8 sps:$4 sm:$0xff]  }
 0x1e5   : > { %1201 = vmatprep.mubr.bf16.mxu0 %v995_v31  ;;  %v4330_v31 = vld [vmem:[%s5839_s7 + $0x80] ss:$8 sps:$4 sm:$0xff]  }
 0x1e6   : > { %1202 = vmatmul.mubr.bf16.vlgmr.msra.gmra.mrb[4].mxu0 %v994_v30  ;;  %v4332_v30 = vld [vmem:[%s5839_s7 + $0x84] ss:$8 sps:$4 sm:$0xff]  }
 0x1e7   : > { %3993 = vmatpush3.bf16.msra.mxu0 %v4270_v32  ;;  %v4335_v32 = vld [vmem:[%s5839_s7 + $0x94] ss:$8 sps:$4 sm:$0xff]  }
 0x1e8   : > { %3994 = vmatprep.subr.bf16.mxu0 %v4274_v33  ;;  %v4333_v33 = vld [vmem:[%s5839_s7 + $0x90] ss:$8 sps:$4 sm:$0xff]  }
 0x1eb   : > { %3995 = vmatpush3.bf16.msra.mxu0 %v4275_v34  ;;  %v4338_v34 = vld [vmem:[%s5839_s7 + $0xa4] ss:$8 sps:$4 sm:$0xff]  }
 0x1ec   : > { %3996 = vmatprep.subr.bf16.mxu0 %v4279_v35  ;;  %v4336_v35 = vld [vmem:[%s5839_s7 + $0xa0] ss:$8 sps:$4 sm:$0xff]  }
 0x1ef   : > { %3997 = vmatpush3.bf16.msra.mxu0 %v4280_v36  ;;  %v4341_v36 = vld [vmem:[%s5839_s7 + $0xb4] ss:$8 sps:$4 sm:$0xff]  }
 0x1f0   : > { %3998 = vmatprep.subr.bf16.mxu0 %v4284_v37  ;;  %v4339_v37 = vld [vmem:[%s5839_s7 + $0xb0] ss:$8 sps:$4 sm:$0xff]  }
 0x1f3   : > { %3999 = vmatpush3.bf16.msra.mxu0 %v4285_v38  ;;  %v4344_v38 = vld [vmem:[%s5839_s7 + $0xc4] ss:$8 sps:$4 sm:$0xff]  }
 0x1f4   : > { %4000 = vmatprep.subr.bf16.mxu0 %v4289_v39  ;;  %v4342_v39 = vld [vmem:[%s5839_s7 + $0xc0] ss:$8 sps:$4 sm:$0xff]  }
 0x1f7   : > { %4001 = vmatpush3.bf16.msra.mxu0 %v4290_v40  ;;  %v4347_v40 = vld [vmem:[%s5839_s7 + $0xd4] ss:$8 sps:$4 sm:$0xff]  }
 0x1f8   : > { %4002 = vmatprep.subr.bf16.mxu0 %v4294_v42  ;;  %v4350_v42 = vld [vmem:[%s5839_s7 + $0xe4] ss:$8 sps:$4 sm:$0xff]  }
 0x1fb   : > { %4003 = vmatpush3.bf16.msra.mxu0 %v4295_v44  ;;  %v4353_v44 = vld [vmem:[%s5839_s7 + $0xf4] ss:$8 sps:$4 sm:$0xff]  }
 0x1fc   : > { %4004 = vmatprep.subr.bf16.mxu0 %v4299_v46  ;;  %v4356_v46 = vld [vmem:[%s5839_s7 + $0x104] ss:$8 sps:$4 sm:$0xff]  }
 0x1ff   : > { %4005 = vmatpush3.bf16.msra.mxu0 %v4300_v48  ;;  %v4380_v48 = vld [vmem:[%s5840_s8 + $0x4] ss:$12 sps:$4 sm:$0xff]  }
 0x200   : > { %4006 = vmatprep.subr.bf16.mxu0 %v4304_v50  ;;  %2241 = vmatprep.subr.bf16.mxu1 %v4380_v48  ;;  %v4381_v50 = vld [vmem:[%s5840_s8 + $0x18] ss:$12 sps:$4 sm:$0xff]   ;;  %v4395_v48 = vld [vmem:[%s5840_s8 + $0x7c] ss:$12 sps:$4 sm:$0xff]  }
 0x203   : > { %4007 = vmatpush3.bf16.msra.mxu0 %v4305_v52  ;;  %v1299_v52 = vsub.s32 2, %v4941_v14  ;;  %v4523_v14 = vld [vmem:[%s5842_s10 + $0xd4] ss:$8 sps:$4 sm:$0xff]  }
 0x204   : > { %1960 = vmatprep.subr.bf16.mxu0 %v4308_v53  ;;  %v1292_v53 = vrot.slane %v3727_v51, %v4944_v15 }
 0x2b9   : > { %v1203_v57 = vpop.f32.mrb[4].mxu0 }
 0x2ba   : > { %v1204_v58 = vadd.f32 %v1203_v57, %v1002_v55  ;;  %v1205_v59 = vpop.f32.mrb[5].mxu0  ;;  %v1300_v57 = vrot.slane %v3727_v51, %v1299_v52  ;;  %v4396_v51 = vld [vmem:[%s5840_s8 + $0x90] ss:$12 sps:$4 sm:$0xff]  }
 0x2bb   : > { %v1206_v60 = vadd.f32 %v1205_v59, %v1006_v56  ;;  %v1207_v61 = vpop.f32.mrb[6].mxu0 }
 0x2bc   : > { %v1212_v62 = vmul.f32 0.01, %v1204_v58  ;;  %v1208_v63 = vadd.f32 %v1207_v61, %v1002_v55  ;;  %v1209_v0 = vpop.f32.mrb[7].mxu0 }
 0x2bd   : > { %v1213_v1 = vmul.f32 0.01, %v1206_v60  ;;  %v1210_v3 = vadd.f32 %v1209_v0, %v1006_v56 }
 0x2be   : > { %v1214_v4 = vmul.f32 0.01, %v1208_v63  ;;  %v1216_v6 = vmax.f32 %v1204_v58, %v1212_v62 }
 0x2bf   : > { %v1215_v5 = vmul.f32 0.01, %v1210_v3  ;;  %v1217_v8 = vmax.f32 %v1206_v60, %v1213_v1 }
 0x2c0   : > { %v1218_v7 = vmax.f32 %v1208_v63, %v1214_v4 }
 0x2c1   : > { %v1219_v9 = vmax.f32 %v1210_v3, %v1215_v5 }
 0x2c2   : > { %v1284_v10 = vpack.c.bf16 %v1218_v7, %v1216_v6 }
 0x2c3   : > { %v1285_v11 = vpack.c.bf16 %v1219_v9, %v1217_v8 }
 0x2c5   : > { %1592 = vmatprep.mubr.bf16.mxu1 %v1285_v11  ;;  %1635 = vmatprep.mubr.bf16.mxu0 %v1285_v11 }
 0x2c6   : > { %1593 = vmatmul.mubr.bf16.vlgmr.msra.gmra.mrb[4].mxu1 %v1284_v10  ;;  %1636 = vmatmul.mubr.bf16.vlgmr.msra.gmra.mrb[8].mxu0 %v1284_v10 }
 0x2c7   : > { %1961 = vmatpush1.bf16.msra.mxu0 %v4306_v12  ;;  %2273 = vmatprep.mubr.bf16.mxu1 %v4618_v2 }
 0x2c8   : > { %1962 = vmatprep.subr.bf16.mxu0 %v4311_v13  ;;  %2242 = vmatpush1.bf16.msra.mxu1 %v4378_v47  ;;  %v4390_v47 = vld [vmem:[%s5840_s8 + $0x60] ss:$12 sps:$4 sm:$0xff]  }
 0x2c9   : > { %2243 = vmatprep.subr.bf16.mxu1 %v4383_v49  ;;  %v4393_v49 = vld [vmem:[%s5840_s8 + $0x78] ss:$12 sps:$4 sm:$0xff]  }
 0x2cb   : > { %1963 = vmatpush1.bf16.msra.mxu0 %v4309_v16 }
 0x2cc   : > { %1964 = vmatprep.subr.bf16.mxu0 %v4314_v18  ;;  %2244 = vmatpush1.bf16.msra.mxu1 %v4381_v50  ;;  %v4398_v50 = vld [vmem:[%s5840_s8 + $0x94] ss:$12 sps:$4 sm:$0xff]  }
 0x2cf   : > { %1965 = vmatpush1.bf16.msra.mxu0 %v4312_v19 }
 0x2d0   : > { %1966 = vmatprep.subr.bf16.mxu0 %v4317_v20 }
 0x2d3   : > { %1967 = vmatpush1.bf16.msra.mxu0 %v4315_v21 }
 0x2d4   : > { %1968 = vmatprep.subr.bf16.mxu0 %v4320_v22 }
 0x2d7   : > { %1969 = vmatpush1.bf16.msra.mxu0 %v4318_v23 }
 0x2d8   : > { %1970 = vmatprep.subr.bf16.mxu0 %v4323_v24 }
 0x2db   : > { %1971 = vmatpush1.bf16.msra.mxu0 %v4321_v25 }
 0x2dc   : > { %1972 = vmatprep.subr.bf16.mxu0 %v4326_v26  ;;  %v4354_v26 = vld [vmem:[%s5839_s7 + $0x100] ss:$8 sps:$4 sm:$0xff]  }
 0x2df   : > { %1973 = vmatpush1.bf16.msra.mxu0 %v4324_v27  ;;  %v4359_v27 = vld [vmem:[%s5839_s7 + $0x114] ss:$8 sps:$4 sm:$0xff]  }
 0x2e0   : > { %1974 = vmatprep.subr.bf16.mxu0 %v4329_v28 }
 0x2e3   : > { %1975 = vmatpush1.bf16.msra.mxu0 %v4327_v29  ;;  %v4357_v29 = vld [vmem:[%s5839_s7 + $0x110] ss:$8 sps:$4 sm:$0xff]  }
 0x2e4   : > { %1976 = vmatprep.subr.bf16.mxu0 %v4332_v30  ;;  %v4362_v30 = vld [vmem:[%s5839_s7 + $0x124] ss:$8 sps:$4 sm:$0xff]  }
 0x2e7   : > { %1977 = vmatpush1.bf16.msra.mxu0 %v4330_v31  ;;  %v4360_v31 = vld [vmem:[%s5839_s7 + $0x120] ss:$8 sps:$4 sm:$0xff]  }
 0x2e8   : > { %1978 = vmatprep.subr.bf16.mxu0 %v4335_v32  ;;  %v4365_v32 = vld [vmem:[%s5839_s7 + $0x134] ss:$8 sps:$4 sm:$0xff]  }
 0x2eb   : > { %1979 = vmatpush1.bf16.msra.mxu0 %v4333_v33  ;;  %v4363_v33 = vld [vmem:[%s5839_s7 + $0x130] ss:$8 sps:$4 sm:$0xff]  }
 0x2ec   : > { %1980 = vmatprep.subr.bf16.mxu0 %v4338_v34  ;;  %v4368_v34 = vld [vmem:[%s5839_s7 + $0x144] ss:$8 sps:$4 sm:$0xff]  }
 0x2ef   : > { %1981 = vmatpush1.bf16.msra.mxu0 %v4336_v35  ;;  %v4366_v35 = vld [vmem:[%s5839_s7 + $0x140] ss:$8 sps:$4 sm:$0xff]  }
 0x2f0   : > { %1982 = vmatprep.subr.bf16.mxu0 %v4341_v36  ;;  %v4371_v36 = vld [vmem:[%s5839_s7 + $0x154] ss:$8 sps:$4 sm:$0xff]  }
 0x2f3   : > { %1983 = vmatpush1.bf16.msra.mxu0 %v4339_v37  ;;  %v4369_v37 = vld [vmem:[%s5839_s7 + $0x150] ss:$8 sps:$4 sm:$0xff]  }
 0x2f4   : > { %1984 = vmatprep.subr.bf16.mxu0 %v4344_v38  ;;  %v4374_v38 = vld [vmem:[%s5839_s7 + $0x164] ss:$8 sps:$4 sm:$0xff]  }
 0x2f7   : > { %1985 = vmatpush1.bf16.msra.mxu0 %v4342_v39  ;;  %v4372_v39 = vld [vmem:[%s5839_s7 + $0x160] ss:$8 sps:$4 sm:$0xff]  }
 0x2f8   : > { %1986 = vmatprep.subr.bf16.mxu0 %v4347_v40  ;;  %v4377_v40 = vld [vmem:[%s5839_s7 + $0x174] ss:$8 sps:$4 sm:$0xff]  }
 0x2fb   : > { %1987 = vmatpush1.bf16.msra.mxu0 %v4345_v41  ;;  %v4375_v41 = vld [vmem:[%s5839_s7 + $0x170] ss:$8 sps:$4 sm:$0xff]  }
 0x2fc   : > { %1988 = vmatprep.subr.bf16.mxu0 %v4350_v42  ;;  %v4386_v42 = vld [vmem:[%s5840_s8 + $0x34] ss:$12 sps:$4 sm:$0xff]  }
 0x2fd   : > { %2245 = vmatprep.subr.bf16.mxu1 %v4386_v42  ;;  %v4433_v42 = vld [vmem:[%s5841_s9 + $0x74] ss:$8 sps:$4 sm:$0xff]  }
 0x2ff   : > { %1989 = vmatpush1.bf16.msra.mxu0 %v4348_v43  ;;  %v4384_v43 = vld [vmem:[%s5840_s8 + $0x30] ss:$12 sps:$4 sm:$0xff]  }
 0x300   : > { %1990 = vmatprep.subr.bf16.mxu0 %v4353_v44  ;;  %2246 = vmatpush1.bf16.msra.mxu1 %v4384_v43  ;;  %v4389_v44 = vld [vmem:[%s5840_s8 + $0x4c] ss:$12 sps:$4 sm:$0xff]  }
 0x301   : > { %2247 = vmatprep.subr.bf16.mxu1 %v4389_v44  ;;  %v4431_v43 = vld [vmem:[%s5841_s9 + $0x70] ss:$8 sps:$4 sm:$0xff]   ;;  %v4436_v44 = vld [vmem:[%s5841_s9 + $0x84] ss:$8 sps:$4 sm:$0xff]  }
 0x303   : > { %1991 = vmatpush1.bf16.msra.mxu0 %v4351_v45  ;;  %v4387_v45 = vld [vmem:[%s5840_s8 + $0x48] ss:$12 sps:$4 sm:$0xff]  }
 0x304   : > { %2003 = vmatprep.subr.bf16.mxu0 %v4356_v46  ;;  %2248 = vmatpush1.bf16.msra.mxu1 %v4387_v45  ;;  %v4392_v46 = vld [vmem:[%s5840_s8 + $0x64] ss:$12 sps:$4 sm:$0xff]   ;;  %v4434_v45 = vld [vmem:[%s5841_s9 + $0x80] ss:$8 sps:$4 sm:$0xff]  }
 0x305   : > { %2249 = vmatprep.subr.bf16.mxu1 %v4392_v46  ;;  %v4439_v46 = vld [vmem:[%s5841_s9 + $0x94] ss:$8 sps:$4 sm:$0xff]  }
 0x308   : > { %2250 = vmatpush1.bf16.msra.mxu1 %v4390_v47  ;;  %v4437_v47 = vld [vmem:[%s5841_s9 + $0x90] ss:$8 sps:$4 sm:$0xff]  }
 0x309   : > { %2251 = vmatprep.subr.bf16.mxu1 %v4395_v48  ;;  %v4442_v48 = vld [vmem:[%s5841_s9 + $0xa4] ss:$8 sps:$4 sm:$0xff]  }
 0x30c   : > { %2252 = vmatpush1.bf16.msra.mxu1 %v4393_v49  ;;  %v4440_v49 = vld [vmem:[%s5841_s9 + $0xa0] ss:$8 sps:$4 sm:$0xff]  }
 0x30d   : > { %2253 = vmatprep.subr.bf16.mxu1 %v4398_v50  ;;  %v4445_v50 = vld [vmem:[%s5841_s9 + $0xb4] ss:$8 sps:$4 sm:$0xff]  }
 0x310   : > { %2254 = vmatpush1.bf16.msra.mxu1 %v4396_v51  ;;  %v4443_v51 = vld [vmem:[%s5841_s9 + $0xb0] ss:$8 sps:$4 sm:$0xff]  }
 0x399   : > { %v1594_v55 = vpop.f32.mrb[4].mxu1  ;;  %v4008_v56 = vpop.f32.mrb[8].mxu0 }
 0x39a   : > { %v1595_v58 = vadd.f32 %v1594_v55, %v1292_v53  ;;  %v1596_v59 = vpop.f32.mrb[5].mxu1  ;;  %v4009_v60 = vpop.f32.mrb[9].mxu0  ;;  %v4619_v55 = vmov 0.0  }
 0x39b   : > { %v1597_v61 = vadd.f32 %v1596_v59, %v1296_v54  ;;  %v4010_v62 = vadd.f32 %v4009_v60, %v4008_v56  ;;  %v1598_v63 = vpop.f32.mrb[6].mxu1  ;;  %v4011_v0 = vpop.f32.mrb[10].mxu0  ;;  %v3776_v56 = vld [vmem:[%s5834_s2 + $0x4] ss:$8 sm:$0x3] }
 0x39c   : > { %v1644_v1 = vmul.f32 0.01, %v1595_v58  ;;  %v1599_v3 = vadd.f32 %v1598_v63, %v1292_v53  ;;  %v1600_v4 = vpop.f32.mrb[7].mxu1  ;;  %v4012_v5 = vpop.f32.mrb[11].mxu0  ;;  %v4401_v53 = vld [vmem:[%s5840_s8 + $0xac] ss:$12 sps:$4 sm:$0xff]  }
 0x39d   : > { %v1645_v6 = vmul.f32 0.01, %v1597_v61  ;;  %v1638_v7 = vadd.f32 %v4010_v62, %v1300_v57  ;;  %v1601_v8 = vadd.f32 %v1600_v4, %v1296_v54  ;;  %v4013_v9 = vadd.f32 %v4012_v5, %v4011_v0  ;;  %v4399_v54 = vld [vmem:[%s5840_s8 + $0xa8] ss:$12 sps:$4 sm:$0xff]   ;;  %2255 = vmatprep.subr.bf16.mxu1 %v4401_v53  ;;  %v4448_v53 = vld [vmem:[%s5841_s9 + $0xc4] ss:$8 sps:$4 sm:$0xff]  }
 0x39e   : > { %v1647_v10 = vmul.f32 0.01, %v1599_v3  ;;  %v1650_v16 = vmax.f32 %v1595_v58, %v1644_v1  ;;  %2256 = vmatpush1.bf16.msra.mxu1 %v4399_v54  ;;  %v1717_v58 = vrot.slane %v3776_v56, %v4950_v17  ;;  %v4446_v54 = vld [vmem:[%s5841_s9 + $0xc0] ss:$8 sps:$4 sm:$0xff]  }
 0x39f   : > { %v1646_v11 = vmul.f32 0.01, %v1638_v7  ;;  %v1648_v12 = vmul.f32 0.01, %v1601_v8  ;;  %v1641_v13 = vadd.f32 %v4013_v9, %v1300_v57  ;;  %v1651_v19 = vmax.f32 %v1597_v61, %v1645_v6  ;;  %4054 = vmatprep.subr.bf16.mxu1 %v4619_v55 }
 0x3a0   : > { %v1653_v18 = vmax.f32 %v1599_v3, %v1647_v10  ;;  %v1713_v57 = vrot.slane %v3776_v56, %v4944_v15  ;;  %v2051_v10 = vld [vmem:[%s521_s26 + $0x8] sm:$0xff]  ;;  %v4451_v56 = vld [vmem:[%s5841_s9 + $0xd4] ss:$8 sps:$4 sm:$0xff]  }
 0x3a1   : > { %v1654_v20 = vmax.f32 %v1601_v8, %v1648_v12  ;;  %v1649_v21 = vmul.f32 0.01, %v1641_v13  ;;  %v1652_v23 = vmax.f32 %v1638_v7, %v1646_v11  ;;  %v2050_v8 = vld [vmem:[%s521_s26] sm:$0xff] }
 0x3a2   : > { %v1704_v22 = vpack.c.bf16 %v1653_v18, %v1650_v16 }
 0x3a3   : > { %v1655_v24 = vmax.f32 %v1641_v13, %v1649_v21  ;;  %v1705_v25 = vpack.c.bf16 %v1654_v20, %v1651_v19  ;;  %v4402_v19 = vld [vmem:[%s5840_s8 + $0x8] ss:$12 sps:$4 sm:$0xff]   ;;  %v4403_v21 = vld [vmem:[%s5840_s8 + $0x20] ss:$12 sps:$4 sm:$0xff]  }
 0x3a5   : > { %v1706_v28 = vpack.c.bf16 %v1655_v24, %v1652_v23  ;;  %1992 = vmatprep.mubr.bf16.mxu0 %v1705_v25  ;;  %v4405_v23 = vld [vmem:[%s5840_s8 + $0x50] ss:$12 sps:$4 sm:$0xff]   ;;  %v4406_v24 = vld [vmem:[%s5840_s8 + $0x68] ss:$12 sps:$4 sm:$0xff]   ;;  %v4407_v25 = vld [vmem:[%s5840_s8 + $0x80] ss:$12 sps:$4 sm:$0xff]  }
 0x3a6   : > { %1993 = vmatmul.mubr.bf16.vlgmr.msra.gmra.mrb[12].mxu0 %v1704_v22  ;;  %v4404_v22 = vld [vmem:[%s5840_s8 + $0x38] ss:$12 sps:$4 sm:$0xff]  }
 0x3a7   : > { %2004 = vmatpush1.bf16.msra.mxu0 %v4354_v26  ;;  %2035 = vmatprep.mubr.bf16.mxu0 %v4618_v2  ;;  %v4408_v26 = vld [vmem:[%s5840_s8 + $0x98] ss:$12 sps:$4 sm:$0xff]  }
 0x3a8   : > { %2005 = vmatprep.subr.bf16.mxu0 %v4359_v27  ;;  %v4409_v27 = vld [vmem:[%s5840_s8 + $0xb0] ss:$12 sps:$4 sm:$0xff]  }
 0x3ab   : > { %2006 = vmatpush1.bf16.msra.mxu0 %v4357_v29  ;;  %v4410_v29 = vld [vmem:[%s5841_s9] ss:$8 sps:$4 sm:$0xff]  }
 0x3ac   : > { %2007 = vmatprep.subr.bf16.mxu0 %v4362_v30  ;;  %v4415_v30 = vld [vmem:[%s5841_s9 + $0x14] ss:$8 sps:$4 sm:$0xff]  }
 0x3af   : > { %2008 = vmatpush1.bf16.msra.mxu0 %v4360_v31  ;;  %v4413_v31 = vld [vmem:[%s5841_s9 + $0x10] ss:$8 sps:$4 sm:$0xff]  }
 0x3b0   : > { %2009 = vmatprep.subr.bf16.mxu0 %v4365_v32  ;;  %v4418_v32 = vld [vmem:[%s5841_s9 + $0x24] ss:$8 sps:$4 sm:$0xff]  }
 0x3b3   : > { %2010 = vmatpush1.bf16.msra.mxu0 %v4363_v33  ;;  %v4416_v33 = vld [vmem:[%s5841_s9 + $0x20] ss:$8 sps:$4 sm:$0xff]  }
 0x3b4   : > { %2011 = vmatprep.subr.bf16.mxu0 %v4368_v34  ;;  %v4421_v34 = vld [vmem:[%s5841_s9 + $0x34] ss:$8 sps:$4 sm:$0xff]  }
 0x3b7   : > { %2012 = vmatpush1.bf16.msra.mxu0 %v4366_v35  ;;  %v4419_v35 = vld [vmem:[%s5841_s9 + $0x30] ss:$8 sps:$4 sm:$0xff]  }
 0x3b8   : > { %2013 = vmatprep.subr.bf16.mxu0 %v4371_v36  ;;  %v4424_v36 = vld [vmem:[%s5841_s9 + $0x44] ss:$8 sps:$4 sm:$0xff]  }
 0x3bb   : > { %2014 = vmatpush1.bf16.msra.mxu0 %v4369_v37  ;;  %v4422_v37 = vld [vmem:[%s5841_s9 + $0x40] ss:$8 sps:$4 sm:$0xff]  }
 0x3bc   : > { %2015 = vmatprep.subr.bf16.mxu0 %v4374_v38  ;;  %v4427_v38 = vld [vmem:[%s5841_s9 + $0x54] ss:$8 sps:$4 sm:$0xff]  }
 0x3bf   : > { %2016 = vmatpush1.bf16.msra.mxu0 %v4372_v39  ;;  %v4425_v39 = vld [vmem:[%s5841_s9 + $0x50] ss:$8 sps:$4 sm:$0xff]  }
 0x3c0   : > { %2017 = vmatprep.subr.bf16.mxu0 %v4377_v40  ;;  %v4430_v40 = vld [vmem:[%s5841_s9 + $0x64] ss:$8 sps:$4 sm:$0xff]  }
 0x3c3   : > { %2018 = vmatpush1.bf16.msra.mxu0 %v4375_v41  ;;  %v4428_v41 = vld [vmem:[%s5841_s9 + $0x60] ss:$8 sps:$4 sm:$0xff]  }
 0x3c6   : > { %2036 = vmatmul.mubr.bf16.vlgmr.msra.gmra.mrb[12].mxu0 %v1706_v28  ;;  %v4412_v28 = vld [vmem:[%s5841_s9 + $0x4] ss:$8 sps:$4 sm:$0xff]  }
 0x499   : > { %v2037_v59 = vpop.f32.mrb[12].mxu0 }
 0x49a   : > { %v4094_v60 = vadd.f32 %v2037_v59, %v1713_v57  ;;  %v2039_v61 = vpop.f32.mrb[13].mxu0  ;;  %v4452_v59 = vld [vmem:[%s5841_s9 + $0xe0] ss:$8 sps:$4 sm:$0xff]  }
 0x49b   : > { %v4095_v62 = vadd.f32 %v2039_v61, %v1717_v58  ;;  %v2041_v63 = vpop.f32.mrb[14].mxu0  ;;  %v4455_v61 = vld [vmem:[%s5841_s9 + $0xf0] ss:$8 sps:$4 sm:$0xff]  }
 0x49c   : > { %2046 = vst [vmem:[%s534_s21] sm:$0xff] %v4094_v60  ;;  %v4096_v0 = vadd.f32 %v2041_v63, %v1713_v57  ;;  %v2043_v1 = vpop.f32.mrb[15].mxu0  ;;  %v4449_v57 = vld [vmem:[%s5841_s9 + $0xd0] ss:$8 sps:$4 sm:$0xff]   ;;  %v4482_v63 = vld [vmem:[%s5842_s10] ss:$8 sps:$4 sm:$0xff]  }
 0x49d   : > { %2047 = vst [vmem:[%s534_s21 + $0x8] sm:$0xff] %v4095_v62  ;;  %v2052_v3 = vmul.f32 0.5, %v4095_v62  ;;  %v4097_v4 = vadd.f32 %v2043_v1, %v1717_v58  ;;  %v4454_v58 = vld [vmem:[%s5841_s9 + $0xe4] ss:$8 sps:$4 sm:$0xff]   ;;  %v4487_v1 = vld [vmem:[%s5842_s10 + $0x14] ss:$8 sps:$4 sm:$0xff]  }
 0x49e   : > { %2048 = vst [vmem:[%s534_s21 + $0x10] sm:$0xff] %v4096_v0  ;;  %v4460_v62 = vld [vmem:[%s5841_s9 + $0x104] ss:$8 sps:$4 sm:$0xff]  }
 0x49f   : > { %v2054_v5 = vmul.f32 1.442695, %v2052_v3  ;;  %2049 = vst [vmem:[%s534_s21 + $0x18] sm:$0xff] %v4097_v4  ;;  %v2053_v6 = vmul.f32 0.5, %v4097_v4  ;;  %v4485_v3 = vld [vmem:[%s5842_s10 + $0x10] ss:$8 sps:$4 sm:$0xff]  }
 0x4a0   : > { %v4490_v4 = vld [vmem:[%s5842_s10 + $0x24] ss:$8 sps:$4 sm:$0xff]  }
 0x4a1   : > { %4602 = vpow2.f32 %v2054_v5  ;;  %v2056_v7 = vmul.f32 1.442695, %v2053_v6  ;;  %v4488_v5 = vld [vmem:[%s5842_s10 + $0x20] ss:$8 sps:$4 sm:$0xff]   ;;  %v4493_v6 = vld [vmem:[%s5842_s10 + $0x34] ss:$8 sps:$4 sm:$0xff]  }
 0x4a3   : > { %4604 = vpow2.f32 %v2056_v7  ;;  %v4491_v7 = vld [vmem:[%s5842_s10 + $0x30] ss:$8 sps:$4 sm:$0xff]  }
 0x4ab   : > { %v4603_v9 = vpop.eup %4602 }
 0x4ac   : > { %v2058_v11 = vmul.f32 %v4603_v9, %v2050_v8  ;;  %v4496_v8 = vld [vmem:[%s5842_s10 + $0x44] ss:$8 sps:$4 sm:$0xff]   ;;  %v4494_v9 = vld [vmem:[%s5842_s10 + $0x40] ss:$8 sps:$4 sm:$0xff]  }
 0x4ad   : > { %v4605_v12 = vpop.eup %4604 }
 0x4ae   : > { %v2059_v13 = vmul.f32 %v4605_v12, %v2051_v10  ;;  %v2060_v16 = vadd.f32 %v4094_v60, %v2058_v11  ;;  %v4457_v60 = vld [vmem:[%s5841_s9 + $0xf4] ss:$8 sps:$4 sm:$0xff]   ;;  %v4497_v11 = vld [vmem:[%s5842_s10 + $0x50] ss:$8 sps:$4 sm:$0xff]   ;;  %v4502_v12 = vld [vmem:[%s5842_s10 + $0x64] ss:$8 sps:$4 sm:$0xff]  }
 0x4af   : > { %v4499_v10 = vld [vmem:[%s5842_s10 + $0x54] ss:$8 sps:$4 sm:$0xff]  }
 0x4b0   : > { %v2061_v18 = vadd.f32 %v4096_v0, %v2059_v13  ;;  %v4484_v0 = vld [vmem:[%s5842_s10 + $0x4] ss:$8 sps:$4 sm:$0xff]   ;;  %v4500_v13 = vld [vmem:[%s5842_s10 + $0x60] ss:$8 sps:$4 sm:$0xff]  }
 0x4b1   : > { %2930 = vmatprep.subr.bf16.mxu0 %v4484_v0 }
 0x4b2   : > { %v2094_v20 = vpack.c.bf16 %v2061_v18, %v2060_v16  ;;  %2931 = vmatpush1.bf16.msra.mxu0 %v4482_v63  ;;  %v4505_v16 = vld [vmem:[%s5842_s10 + $0x74] ss:$8 sps:$4 sm:$0xff]   ;;  %v4503_v18 = vld [vmem:[%s5842_s10 + $0x70] ss:$8 sps:$4 sm:$0xff]  }
 0x4b3   : > { %2932 = vmatprep.subr.bf16.mxu0 %v4487_v1 }
 0x4b4   : > { %2274 = vmatmul.mubr.bf16.vlgmr.msra.gmra.mrb[8].mxu1 %v2094_v20 }
 0x4b5   : > { %4055 = vmatpush3.bf16.msra.mxu1 %v4402_v19  ;;  %4070 = vmatprep.mubr.msk.bf16.mxu1 %vm4620_vm0, %v4619_v55  ;;  %v4508_v19 = vld [vmem:[%s5842_s10 + $0x84] ss:$8 sps:$4 sm:$0xff]  }
 0x4b6   : > { %4056 = vmatprep.subr.bf16.mxu1 %v4619_v55  ;;  %2933 = vmatpush1.bf16.msra.mxu0 %v4485_v3  ;;  %v4526_v3 = vld [vmem:[%s5842_s10 + $0xe4] ss:$8 sps:$4 sm:$0xff]  }
 0x4b7   : > { %2934 = vmatprep.subr.bf16.mxu0 %v4490_v4  ;;  %v4524_v4 = vld [vmem:[%s5842_s10 + $0xe0] ss:$8 sps:$4 sm:$0xff]  }
 0x4b9   : > { %4057 = vmatpush3.bf16.msra.mxu1 %v4403_v21  ;;  %v4511_v21 = vld [vmem:[%s5842_s10 + $0x94] ss:$8 sps:$4 sm:$0xff]  }
 0x4ba   : > { %4058 = vmatprep.subr.bf16.mxu1 %v4619_v55  ;;  %2935 = vmatpush1.bf16.msra.mxu0 %v4488_v5  ;;  %v4529_v5 = vld [vmem:[%s5842_s10 + $0xf4] ss:$8 sps:$4 sm:$0xff]  }
 0x4bb   : > { %2936 = vmatprep.subr.bf16.mxu0 %v4493_v6  ;;  %v4527_v6 = vld [vmem:[%s5842_s10 + $0xf0] ss:$8 sps:$4 sm:$0xff]  }
 0x4bd   : > { %4059 = vmatpush3.bf16.msra.mxu1 %v4404_v22  ;;  %v4509_v22 = vld [vmem:[%s5842_s10 + $0x90] ss:$8 sps:$4 sm:$0xff]  }
 0x4be   : > { %4060 = vmatprep.subr.bf16.mxu1 %v4619_v55  ;;  %2937 = vmatpush1.bf16.msra.mxu0 %v4491_v7  ;;  %v4532_v7 = vld [vmem:[%s5843_s11 + $0x4] ss:$8 sps:$4 sm:$0xff]  }
 0x4bf   : > { %2938 = vmatprep.subr.bf16.mxu0 %v4496_v8  ;;  %v3850_v8 = vld [vmem:[%s5834_s2 + $0x6] ss:$8 sm:$0x3] }
 0x4c1   : > { %4061 = vmatpush3.bf16.msra.mxu1 %v4405_v23  ;;  %v4514_v23 = vld [vmem:[%s5842_s10 + $0xa4] ss:$8 sps:$4 sm:$0xff]  }
 0x4c2   : > { %4062 = vmatprep.subr.bf16.mxu1 %v4619_v55  ;;  %2939 = vmatpush1.bf16.msra.mxu0 %v4494_v9  ;;  %v2382_v9 = vrot.slane %v3850_v8, %v4944_v15 }
 0x4c3   : > { %2940 = vmatprep.subr.bf16.mxu0 %v4499_v10  ;;  %v2386_v10 = vrot.slane %v3850_v8, %v4950_v17  ;;  %v4587_v8 = vld [vmem:[%s5844_s12 + $0x20] sm:$0xff]  }
 0x4c5   : > { %4063 = vmatpush3.bf16.msra.mxu1 %v4406_v24  ;;  %v4512_v24 = vld [vmem:[%s5842_s10 + $0xa0] ss:$8 sps:$4 sm:$0xff]  }
 0x4c6   : > { %4064 = vmatprep.subr.bf16.mxu1 %v4619_v55  ;;  %2941 = vmatpush1.bf16.msra.mxu0 %v4497_v11 }
 0x4c7   : > { %2942 = vmatprep.subr.bf16.mxu0 %v4502_v12 }
 0x4c9   : > { %4065 = vmatpush3.bf16.msra.mxu1 %v4407_v25  ;;  %v4517_v25 = vld [vmem:[%s5842_s10 + $0xb4] ss:$8 sps:$4 sm:$0xff]  }
 0x4ca   : > { %4066 = vmatprep.subr.bf16.mxu1 %v4619_v55  ;;  %2943 = vmatpush1.bf16.msra.mxu0 %v4500_v13 }
 0x4cb   : > { %2944 = vmatprep.subr.bf16.mxu0 %v4505_v16 }
 0x4cd   : > { %4067 = vmatpush3.bf16.msra.mxu1 %v4408_v26  ;;  %v4515_v26 = vld [vmem:[%s5842_s10 + $0xb0] ss:$8 sps:$4 sm:$0xff]  }
 0x4ce   : > { %4068 = vmatprep.subr.bf16.mxu1 %v4619_v55  ;;  %2945 = vmatpush1.bf16.msra.mxu0 %v4503_v18 }
 0x4cf   : > { %2946 = vmatprep.subr.bf16.mxu0 %v4508_v19 }
 0x4d1   : > { %4069 = vmatpush3.bf16.msra.mxu1 %v4409_v27  ;;  %v4520_v27 = vld [vmem:[%s5842_s10 + $0xc4] ss:$8 sps:$4 sm:$0xff]  }
 0x4d2   : > { %2629 = vmatprep.subr.bf16.mxu1 %v4412_v28  ;;  %v4518_v28 = vld [vmem:[%s5842_s10 + $0xc0] ss:$8 sps:$4 sm:$0xff]  }
 0x4d4   : > { %4071 = vmatmul.mubr.bf16.vlgmr.msra.gmra.mrb[12].mxu1 %v2094_v20  ;;  %v4506_v20 = vld [vmem:[%s5842_s10 + $0x80] ss:$8 sps:$4 sm:$0xff]  }
 0x4d5   : > { %2630 = vmatpush1.bf16.msra.mxu1 %v4410_v29  ;;  %2947 = vmatpush1.bf16.msra.mxu0 %v4506_v20  ;;  %v3825_v29 = vld [vmem:[%s5834_s2 + $0x5] ss:$8 sm:$0x7] }
 0x4d6   : > { %2631 = vmatprep.subr.bf16.mxu1 %v4415_v30  ;;  %2948 = vmatprep.subr.bf16.mxu0 %v4511_v21  ;;  %v2101_v30 = vrot.slane %v3825_v29, %v4944_v15 }
 0x4d9   : > { %2632 = vmatpush1.bf16.msra.mxu1 %v4413_v31  ;;  %2949 = vmatpush1.bf16.msra.mxu0 %v4509_v22 }
 0x4da   : > { %2633 = vmatprep.subr.bf16.mxu1 %v4418_v32  ;;  %2950 = vmatprep.subr.bf16.mxu0 %v4514_v23  ;;  %v2105_v32 = vrot.slane %v3825_v29, %v4950_v17 }
 0x4dd   : > { %2634 = vmatpush1.bf16.msra.mxu1 %v4416_v33  ;;  %2951 = vmatpush1.bf16.msra.mxu0 %v4512_v24 }
 0x4de   : > { %2635 = vmatprep.subr.bf16.mxu1 %v4421_v34  ;;  %2952 = vmatprep.subr.bf16.mxu0 %v4517_v25 }
 0x4e1   : > { %2636 = vmatpush1.bf16.msra.mxu1 %v4419_v35  ;;  %2953 = vmatpush1.bf16.msra.mxu0 %v4515_v26 }
 0x4e2   : > { %2637 = vmatprep.subr.bf16.mxu1 %v4424_v36  ;;  %2954 = vmatprep.subr.bf16.mxu0 %v4520_v27 }
 0x4e5   : > { %2638 = vmatpush1.bf16.msra.mxu1 %v4422_v37  ;;  %2955 = vmatpush1.bf16.msra.mxu0 %v4518_v28 }
 0x4e6   : > { %2639 = vmatprep.subr.bf16.mxu1 %v4427_v38  ;;  %2956 = vmatprep.subr.bf16.mxu0 %v4523_v14  ;;  %v4580_v14 = vld [vmem:[%s5844_s12 + $0x48] sm:$0xff]  }
 0x4e9   : > { %2640 = vmatpush1.bf16.msra.mxu1 %v4425_v39 }
 0x4ea   : > { %2641 = vmatprep.subr.bf16.mxu1 %v4430_v40 }
 0x4ed   : > { %2642 = vmatpush1.bf16.msra.mxu1 %v4428_v41 }
 0x4ee   : > { %2643 = vmatprep.subr.bf16.mxu1 %v4433_v42  ;;  %v4458_v42 = vld [vmem:[%s5841_s9 + $0x100] ss:$8 sps:$4 sm:$0xff]  }
 0x4f1   : > { %2644 = vmatpush1.bf16.msra.mxu1 %v4431_v43  ;;  %v4463_v43 = vld [vmem:[%s5841_s9 + $0x114] ss:$8 sps:$4 sm:$0xff]  }
 0x4f2   : > { %2645 = vmatprep.subr.bf16.mxu1 %v4436_v44  ;;  %v4461_v44 = vld [vmem:[%s5841_s9 + $0x110] ss:$8 sps:$4 sm:$0xff]  }
 0x4f5   : > { %2646 = vmatpush1.bf16.msra.mxu1 %v4434_v45  ;;  %v4466_v45 = vld [vmem:[%s5841_s9 + $0x124] ss:$8 sps:$4 sm:$0xff]  }
 0x4f6   : > { %2647 = vmatprep.subr.bf16.mxu1 %v4439_v46  ;;  %v4464_v46 = vld [vmem:[%s5841_s9 + $0x120] ss:$8 sps:$4 sm:$0xff]  }
 0x4f9   : > { %2648 = vmatpush1.bf16.msra.mxu1 %v4437_v47  ;;  %v4469_v47 = vld [vmem:[%s5841_s9 + $0x134] ss:$8 sps:$4 sm:$0xff]  }
 0x4fa   : > { %2649 = vmatprep.subr.bf16.mxu1 %v4442_v48  ;;  %v4472_v48 = vld [vmem:[%s5841_s9 + $0x144] ss:$8 sps:$4 sm:$0xff]  }
 0x4fd   : > { %2650 = vmatpush1.bf16.msra.mxu1 %v4440_v49  ;;  %v4470_v49 = vld [vmem:[%s5841_s9 + $0x140] ss:$8 sps:$4 sm:$0xff]  }
 0x4fe   : > { %2651 = vmatprep.subr.bf16.mxu1 %v4445_v50  ;;  %v4475_v50 = vld [vmem:[%s5841_s9 + $0x154] ss:$8 sps:$4 sm:$0xff]  }
 0x501   : > { %2652 = vmatpush1.bf16.msra.mxu1 %v4443_v51  ;;  %v4473_v51 = vld [vmem:[%s5841_s9 + $0x150] ss:$8 sps:$4 sm:$0xff]  }
 0x502   : > { %2653 = vmatprep.subr.bf16.mxu1 %v4448_v53  ;;  %v4478_v53 = vld [vmem:[%s5841_s9 + $0x164] ss:$8 sps:$4 sm:$0xff]  }
 0x505   : > { %2654 = vmatpush1.bf16.msra.mxu1 %v4446_v54  ;;  %v4476_v54 = vld [vmem:[%s5841_s9 + $0x160] ss:$8 sps:$4 sm:$0xff]  }
 0x506   : > { %2655 = vmatprep.subr.bf16.mxu1 %v4451_v56  ;;  %v2109_v56 = vrot.slane %v3825_v29, %v1299_v52  ;;  %v4521_v52 = vld [vmem:[%s5842_s10 + $0xd0] ss:$8 sps:$4 sm:$0xff]  }
 0x507   : > { %2957 = vmatpush1.bf16.msra.mxu0 %v4521_v52  ;;  %v4581_v52 = vld [vmem:[%s5844_s12 + $0x8] sm:$0xff]  }
 0x508   : > { %2958 = vmatprep.subr.bf16.mxu0 %v4526_v3  ;;  %v4582_v3 = vld [vmem:[%s5844_s12 + $0x50] sm:$0xff]  }
 0x509   : > { %2656 = vmatpush1.bf16.msra.mxu1 %v4449_v57  ;;  %v4481_v57 = vld [vmem:[%s5841_s9 + $0x174] ss:$8 sps:$4 sm:$0xff]  }
 0x50a   : > { %2657 = vmatprep.subr.bf16.mxu1 %v4454_v58 }
 0x50b   : > { %2959 = vmatpush1.bf16.msra.mxu0 %v4524_v4  ;;  %v4583_v4 = vld [vmem:[%s5844_s12 + $0x10] sm:$0xff]  }
 0x50c   : > { %2960 = vmatprep.subr.bf16.mxu0 %v4529_v5  ;;  %v4584_v5 = vld [vmem:[%s5844_s12 + $0x58] sm:$0xff]  }
 0x50d   : > { %2658 = vmatpush1.bf16.msra.mxu1 %v4452_v59 }
 0x50e   : > { %2659 = vmatprep.subr.bf16.mxu1 %v4457_v60 }
 0x50f   : > { %2961 = vmatpush1.bf16.msra.mxu0 %v4527_v6  ;;  %v4585_v6 = vld [vmem:[%s5844_s12 + $0x18] sm:$0xff]  }
 0x510   : > { %3188 = vmatprep.subr.bf16.mxu0 %v4532_v7  ;;  %v4586_v7 = vld [vmem:[%s5844_s12 + $0x60] sm:$0xff]  }
 0x511   : > { %2660 = vmatpush1.bf16.msra.mxu1 %v4455_v61  ;;  %v4479_v61 = vld [vmem:[%s5841_s9 + $0x170] ss:$8 sps:$4 sm:$0xff]  }
 0x512   : > { %2672 = vmatprep.subr.bf16.mxu1 %v4460_v62 }
 0x587   : > { %v2275_v31 = vpop.f32.mrb[8].mxu1 }
 0x588   : > { %v2277_v33 = vpop.f32.mrb[9].mxu1  ;;  %v2276_v35 = vadd.f32 %v2275_v31, %v2101_v30 }
 0x589   : > { %v2279_v34 = vpop.f32.mrb[10].mxu1  ;;  %v2278_v38 = vadd.f32 %v2277_v33, %v2105_v32  ;;  %v4535_v33 = vld [vmem:[%s5843_s11 + $0x14] ss:$8 sps:$4 sm:$0xff]  }
 0x58a   : > { %v2280_v36 = vadd.f32 %v2279_v34, %v2101_v30  ;;  %v2281_v37 = vpop.f32.mrb[11].mxu1  ;;  %v4533_v34 = vld [vmem:[%s5843_s11 + $0x10] ss:$8 sps:$4 sm:$0xff]  }
 0x58b   : > { %v2282_v39 = vadd.f32 %v2281_v37, %v2105_v32  ;;  %v4530_v32 = vld [vmem:[%s5843_s11] ss:$8 sps:$4 sm:$0xff]   ;;  %v4541_v37 = vld [vmem:[%s5843_s11 + $0x34] ss:$8 sps:$4 sm:$0xff]  }
 0x58c   : > { %v2373_v40 = vpack.c.bf16 %v2280_v36, %v2276_v35  ;;  %v4538_v35 = vld [vmem:[%s5843_s11 + $0x24] ss:$8 sps:$4 sm:$0xff]   ;;  %v4536_v36 = vld [vmem:[%s5843_s11 + $0x20] ss:$8 sps:$4 sm:$0xff]  }
 0x58d   : > { %v2374_v41 = vpack.c.bf16 %v2282_v39, %v2278_v38  ;;  %v4539_v38 = vld [vmem:[%s5843_s11 + $0x30] ss:$8 sps:$4 sm:$0xff]   ;;  %v4544_v39 = vld [vmem:[%s5843_s11 + $0x44] ss:$8 sps:$4 sm:$0xff]  }
 0x58f   : > { %2661 = vmatprep.mubr.bf16.mxu1 %v2374_v41  ;;  %v4547_v41 = vld [vmem:[%s5843_s11 + $0x54] ss:$8 sps:$4 sm:$0xff]  }
 0x590   : > { %2662 = vmatmul.mubr.bf16.vlgmr.msra.gmra.mrb[16].mxu1 %v2373_v40  ;;  %v4542_v40 = vld [vmem:[%s5843_s11 + $0x40] ss:$8 sps:$4 sm:$0xff]  }
 0x591   : > { %2673 = vmatpush1.bf16.msra.mxu1 %v4458_v42  ;;  %2704 = vmatprep.mubr.bf16.mxu1 %v4618_v2  ;;  %v4467_v2 = vld [vmem:[%s5841_s9 + $0x130] ss:$8 sps:$4 sm:$0xff]  }
 0x592   : > { %2674 = vmatprep.subr.bf16.mxu1 %v4463_v43  ;;  %v4545_v42 = vld [vmem:[%s5843_s11 + $0x50] ss:$8 sps:$4 sm:$0xff]   ;;  %v4550_v43 = vld [vmem:[%s5843_s11 + $0x64] ss:$8 sps:$4 sm:$0xff]  }
 0x595   : > { %2675 = vmatpush1.bf16.msra.mxu1 %v4461_v44  ;;  %v4548_v44 = vld [vmem:[%s5843_s11 + $0x60] ss:$8 sps:$4 sm:$0xff]  }
 0x596   : > { %2676 = vmatprep.subr.bf16.mxu1 %v4466_v45  ;;  %v4553_v45 = vld [vmem:[%s5843_s11 + $0x74] ss:$8 sps:$4 sm:$0xff]  }
 0x599   : > { %2677 = vmatpush1.bf16.msra.mxu1 %v4464_v46  ;;  %v4551_v46 = vld [vmem:[%s5843_s11 + $0x70] ss:$8 sps:$4 sm:$0xff]  }
 0x59a   : > { %2678 = vmatprep.subr.bf16.mxu1 %v4469_v47  ;;  %v4556_v47 = vld [vmem:[%s5843_s11 + $0x84] ss:$8 sps:$4 sm:$0xff]  }
 0x59d   : > { %2679 = vmatpush1.bf16.msra.mxu1 %v4467_v2  ;;  %v4554_v2 = vld [vmem:[%s5843_s11 + $0x80] ss:$8 sps:$4 sm:$0xff]  }
 0x59e   : > { %2680 = vmatprep.subr.bf16.mxu1 %v4472_v48  ;;  %v4559_v48 = vld [vmem:[%s5843_s11 + $0x94] ss:$8 sps:$4 sm:$0xff]  }
 0x5a1   : > { %2681 = vmatpush1.bf16.msra.mxu1 %v4470_v49  ;;  %v4557_v49 = vld [vmem:[%s5843_s11 + $0x90] ss:$8 sps:$4 sm:$0xff]  }
 0x5a2   : > { %2682 = vmatprep.subr.bf16.mxu1 %v4475_v50  ;;  %v4562_v50 = vld [vmem:[%s5843_s11 + $0xa4] ss:$8 sps:$4 sm:$0xff]  }
 0x5a5   : > { %2683 = vmatpush1.bf16.msra.mxu1 %v4473_v51  ;;  %v4560_v51 = vld [vmem:[%s5843_s11 + $0xa0] ss:$8 sps:$4 sm:$0xff]  }
 0x5a6   : > { %2684 = vmatprep.subr.bf16.mxu1 %v4478_v53  ;;  %v4565_v53 = vld [vmem:[%s5843_s11 + $0xb4] ss:$8 sps:$4 sm:$0xff]  }
 0x5a7   : > { %v2318_v58 = vpop.f32.mrb[12].mxu1 }
 0x5a8   : > { %v4072_v59 = vpop.f32.mrb[13].mxu1  ;;  %v2319_v62 = vadd.f32 %v2318_v58, %v2109_v56  ;;  %v4571_v58 = vld [vmem:[%s5843_s11 + $0xd4] ss:$8 sps:$4 sm:$0xff]  }
 0x5a9   : > { %v2321_v60 = vpop.f32.mrb[14].mxu1  ;;  %2685 = vmatpush1.bf16.msra.mxu1 %v4476_v54  ;;  %v4563_v54 = vld [vmem:[%s5843_s11 + $0xb0] ss:$8 sps:$4 sm:$0xff]  }
 0x5aa   : > { %v2322_v63 = vadd.f32 %v2321_v60, %v2109_v56  ;;  %v4073_v0 = vpop.f32.mrb[15].mxu1  ;;  %2686 = vmatprep.subr.bf16.mxu1 %v4481_v57  ;;  %v4568_v56 = vld [vmem:[%s5843_s11 + $0xc4] ss:$8 sps:$4 sm:$0xff]   ;;  %v4566_v57 = vld [vmem:[%s5843_s11 + $0xc0] ss:$8 sps:$4 sm:$0xff]  }
 0x5ab   : > { %v4569_v59 = vld [vmem:[%s5843_s11 + $0xd0] ss:$8 sps:$4 sm:$0xff]   ;;  %v4574_v60 = vld [vmem:[%s5843_s11 + $0xe4] ss:$8 sps:$4 sm:$0xff]  }
 0x5ac   : > { %v2375_v1 = vpack.c.bf16 %v2322_v63, %v2319_v62  ;;  %v4577_v62 = vld [vmem:[%s5843_s11 + $0xf4] ss:$8 sps:$4 sm:$0xff]   ;;  %v4575_v63 = vld [vmem:[%s5843_s11 + $0xf0] ss:$8 sps:$4 sm:$0xff]   ;;  %v4578_v0 = vld [vmem:[%s5844_s12 + $0x40] sm:$0xff]  }
 0x5ad   : > { %2687 = vmatpush1.bf16.msra.mxu1 %v4479_v61  ;;  %v4572_v61 = vld [vmem:[%s5843_s11 + $0xe0] ss:$8 sps:$4 sm:$0xff]  }
 0x5ae   : > { %4023 = vmatprep.subr.bf16.mxu1 %v4578_v0  ;;  %v4599_v0 = vld [vmem:[%s5845_s13 + $0x28] sm:$0xff]  }
 0x5b0   : > { %2705 = vmatmul.mubr.bf16.vlgmr.msra.gmra.mrb[16].mxu1 %v2375_v1  ;;  %v4579_v1 = vld [vmem:[%s5844_s12] sm:$0xff]  }
 0x5b1   : > { %4024 = vmatpush3.bf16.msra.mxu1 %v4579_v1  ;;  %v4600_v1 = vld [vmem:[%s5845_s13 + $0x30] sm:$0xff]  }
 0x5b2   : > { %4025 = vmatprep.subr.bf16.mxu1 %v4580_v14  ;;  %v4601_v14 = vld [vmem:[%s5845_s13 + $0x38] sm:$0xff]  }
 0x5b5   : > { %4026 = vmatpush3.bf16.msra.mxu1 %v4581_v52 }
 0x5b6   : > { %4027 = vmatprep.subr.bf16.mxu1 %v4582_v3  ;;  %v3273_v3 = vld [vmem:[%s5834_s2 + $0x19] ss:$0 sm:$0xff] }
 0x5b9   : > { %4028 = vmatpush3.bf16.msra.mxu1 %v4583_v4 }
 0x5ba   : > { %4029 = vmatprep.subr.bf16.mxu1 %v4584_v5 }
 0x5bd   : > { %4030 = vmatpush3.bf16.msra.mxu1 %v4585_v6 }
 0x5be   : > { %4031 = vmatprep.subr.bf16.mxu1 %v4586_v7 }
 0x5c1   : > { %4032 = vmatpush3.bf16.msra.mxu1 %v4587_v8 }
 0x683   : > { %v2706_v11 = vpop.f32.mrb[16].mxu1 }
 0x684   : > { %v4098_v12 = vadd.f32 %v2706_v11, %v2382_v9  ;;  %v2708_v13 = vpop.f32.mrb[17].mxu1 }
 0x685   : > { %v4099_v16 = vadd.f32 %v2708_v13, %v2386_v10  ;;  %v2710_v18 = vpop.f32.mrb[18].mxu1 }
 0x686   : > { %v2715_v19 = vmul.f32 0.01, %v4098_v12  ;;  %v4100_v20 = vadd.f32 %v2710_v18, %v2382_v9  ;;  %v2712_v21 = vpop.f32.mrb[19].mxu1  ;;  %v3899_v9 = vld [vmem:[%s5834_s2 + $0x7] ss:$8 sm:$0x3] }
 0x687   : > { %v2716_v22 = vmul.f32 0.01, %v4099_v16  ;;  %v4101_v23 = vadd.f32 %v2712_v21, %v2386_v10  ;;  %v2763_v10 = vrot.slane %v3899_v9, %v4944_v15  ;;  %v2767_v11 = vrot.slane %v3899_v9, %v4950_v17 }
 0x688   : > { %v2717_v24 = vmul.f32 0.01, %v4100_v20  ;;  %v2719_v26 = vmax.f32 %v4098_v12, %v2715_v19 }
 0x689   : > { %v2718_v25 = vmul.f32 0.01, %v4101_v23  ;;  %v2720_v28 = vmax.f32 %v4099_v16, %v2716_v22 }
 0x68a   : > { %v2721_v27 = vmax.f32 %v4100_v20, %v2717_v24 }
 0x68b   : > { %v2722_v29 = vmax.f32 %v4101_v23, %v2718_v25 }
 0x68c   : > { %v2755_v30 = vpack.c.bf16 %v2721_v27, %v2719_v26 }
 0x68d   : > { %v2756_v31 = vpack.c.bf16 %v2722_v29, %v2720_v28 }
 0x68f   : > { %2962 = vmatprep.mubr.bf16.mxu0 %v2756_v31 }
 0x690   : > { %2963 = vmatmul.mubr.bf16.vlgmr.msra.gmra.mrb[16].mxu0 %v2755_v30 }
 0x691   : > { %3189 = vmatpush1.bf16.msra.mxu0 %v4530_v32 }
 0x692   : > { %3190 = vmatprep.subr.bf16.mxu0 %v4535_v33  ;;  %v4588_v33 = vld [vmem:[%s5844_s12 + $0x68] sm:$0xff]  }
 0x693   : > { %4033 = vmatprep.subr.bf16.mxu1 %v4588_v33 }
 0x695   : > { %3191 = vmatpush1.bf16.msra.mxu0 %v4533_v34  ;;  %v4589_v34 = vld [vmem:[%s5844_s12 + $0x28] sm:$0xff]  }
 0x696   : > { %3192 = vmatprep.subr.bf16.mxu0 %v4538_v35  ;;  %4034 = vmatpush3.bf16.msra.mxu1 %v4589_v34  ;;  %v4590_v35 = vld [vmem:[%s5844_s12 + $0x70] sm:$0xff]  }
 0x697   : > { %4035 = vmatprep.subr.bf16.mxu1 %v4590_v35 }
 0x699   : > { %3193 = vmatpush1.bf16.msra.mxu0 %v4536_v36  ;;  %v4591_v36 = vld [vmem:[%s5844_s12 + $0x30] sm:$0xff]  }
 0x69a   : > { %3194 = vmatprep.subr.bf16.mxu0 %v4541_v37  ;;  %4036 = vmatpush3.bf16.msra.mxu1 %v4591_v36  ;;  %v4592_v37 = vld [vmem:[%s5844_s12 + $0x78] sm:$0xff]  }
 0x69b   : > { %4037 = vmatprep.subr.bf16.mxu1 %v4592_v37 }
 0x69d   : > { %3195 = vmatpush1.bf16.msra.mxu0 %v4539_v38  ;;  %v4593_v38 = vld [vmem:[%s5844_s12 + $0x38] sm:$0xff]  }
 0x69e   : > { %3196 = vmatprep.subr.bf16.mxu0 %v4544_v39  ;;  %4038 = vmatpush3.bf16.msra.mxu1 %v4593_v38  ;;  %v3932_v39 = vld [vmem:[%s5834_s2 + $0x18] ss:$8 sm:$0x3] }
 0x69f   : > { %4074 = vmatprep.subr.bf16.mxu1 %v4619_v55 }
 0x6a1   : > { %3197 = vmatpush1.bf16.msra.mxu0 %v4542_v40  ;;  %v3021_v40 = vrot.slane %v3932_v39, %v4944_v15 }
 0x6a2   : > { %3198 = vmatprep.subr.bf16.mxu0 %v4547_v41  ;;  %v3025_v41 = vrot.slane %v3932_v39, %v4950_v17  ;;  %v4594_v17 = vld [vmem:[%s5845_s13] sm:$0xff]  }
 0x6a5   : > { %3199 = vmatpush1.bf16.msra.mxu0 %v4545_v42 }
 0x6a6   : > { %3200 = vmatprep.subr.bf16.mxu0 %v4550_v43 }
 0x6a9   : > { %3201 = vmatpush1.bf16.msra.mxu0 %v4548_v44 }
 0x6aa   : > { %3202 = vmatprep.subr.bf16.mxu0 %v4553_v45 }
 0x6ad   : > { %3203 = vmatpush1.bf16.msra.mxu0 %v4551_v46 }
 0x6ae   : > { %3204 = vmatprep.subr.bf16.mxu0 %v4556_v47 }
 0x6b1   : > { %3205 = vmatpush1.bf16.msra.mxu0 %v4554_v2 }
 0x6b2   : > { %3206 = vmatprep.subr.bf16.mxu0 %v4559_v48 }
 0x6b5   : > { %3207 = vmatpush1.bf16.msra.mxu0 %v4557_v49 }
 0x6b6   : > { %3208 = vmatprep.subr.bf16.mxu0 %v4562_v50 }
 0x6b9   : > { %3209 = vmatpush1.bf16.msra.mxu0 %v4560_v51 }
 0x6ba   : > { %3210 = vmatprep.subr.bf16.mxu0 %v4565_v53 }
 0x6bd   : > { %3211 = vmatpush1.bf16.msra.mxu0 %v4563_v54 }
 0x6be   : > { %3212 = vmatprep.subr.bf16.mxu0 %v4568_v56 }
 0x6c1   : > { %3213 = vmatpush1.bf16.msra.mxu0 %v4566_v57 }
 0x6c2   : > { %3214 = vmatprep.subr.bf16.mxu0 %v4571_v58 }
 0x6c5   : > { %3215 = vmatpush1.bf16.msra.mxu0 %v4569_v59 }
 0x6c6   : > { %3216 = vmatprep.subr.bf16.mxu0 %v4574_v60  ;;  %v4595_v60 = vld [vmem:[%s5845_s13 + $0x8] sm:$0xff]  }
 0x6c9   : > { %3217 = vmatpush1.bf16.msra.mxu0 %v4572_v61  ;;  %v4596_v61 = vld [vmem:[%s5845_s13 + $0x10] sm:$0xff]  }
 0x6ca   : > { %3218 = vmatprep.subr.bf16.mxu0 %v4577_v62  ;;  %v4597_v62 = vld [vmem:[%s5845_s13 + $0x18] sm:$0xff]  }
 0x6cd   : > { %3219 = vmatpush1.bf16.msra.mxu0 %v4575_v63  ;;  %v4598_v63 = vld [vmem:[%s5845_s13 + $0x20] sm:$0xff]  }
 0x763   : > { %v2964_v12 = vpop.f32.mrb[16].mxu0 }
 0x764   : > { %v2965_v13 = vadd.f32 %v2964_v12, %v2763_v10  ;;  %v2966_v16 = vpop.f32.mrb[17].mxu0 }
 0x765   : > { %v2967_v18 = vadd.f32 %v2966_v16, %v2767_v11  ;;  %v2968_v19 = vpop.f32.mrb[18].mxu0 }
 0x766   : > { %v2973_v20 = vmul.f32 0.01, %v2965_v13  ;;  %v2969_v21 = vadd.f32 %v2968_v19, %v2763_v10  ;;  %v2970_v22 = vpop.f32.mrb[19].mxu0 }
 0x767   : > { %v2974_v23 = vmul.f32 0.01, %v2967_v18  ;;  %v2971_v24 = vadd.f32 %v2970_v22, %v2767_v11 }
 0x768   : > { %v2975_v25 = vmul.f32 0.01, %v2969_v21  ;;  %v2977_v27 = vmax.f32 %v2965_v13, %v2973_v20 }
 0x769   : > { %v2976_v26 = vmul.f32 0.01, %v2971_v24  ;;  %v2978_v29 = vmax.f32 %v2967_v18, %v2974_v23  ;;  %v3432_v18 = vld [vmem:[%s5834_s2 + $0x1a] ss:$0 sm:$0xff] }
 0x76a   : > { %v2979_v28 = vmax.f32 %v2969_v21, %v2975_v25 }
 0x76b   : > { %v2980_v30 = vmax.f32 %v2971_v24, %v2976_v26 }
 0x76c   : > { %v3013_v31 = vpack.c.bf16 %v2979_v28, %v2977_v27 }
 0x76d   : > { %v3014_v32 = vpack.c.bf16 %v2980_v30, %v2978_v29 }
 0x76f   : > { %3220 = vmatprep.mubr.bf16.mxu0 %v3014_v32 }
 0x770   : > { %3221 = vmatmul.mubr.bf16.vlgmr.msra.gmra.mrb[20].mxu0 %v3013_v31 }
 0x843   : > { %v3222_v42 = vpop.f32.mrb[20].mxu0 }
 0x844   : > { %v3223_v43 = vadd.f32 %v3222_v42, %v3021_v40  ;;  %v3224_v44 = vpop.f32.mrb[21].mxu0 }
 0x845   : > { %v3225_v45 = vadd.f32 %v3224_v44, %v3025_v41  ;;  %v3226_v46 = vpop.f32.mrb[22].mxu0 }
 0x846   : > { %v3231_v47 = vmul.f32 0.01, %v3223_v43  ;;  %v3227_v2 = vadd.f32 %v3226_v46, %v3021_v40  ;;  %v3228_v48 = vpop.f32.mrb[23].mxu0 }
 0x847   : > { %v3232_v49 = vmul.f32 0.01, %v3225_v45  ;;  %v3229_v50 = vadd.f32 %v3228_v48, %v3025_v41 }
 0x848   : > { %v3233_v51 = vmul.f32 0.01, %v3227_v2  ;;  %v3235_v54 = vmax.f32 %v3223_v43, %v3231_v47 }
 0x849   : > { %v3234_v53 = vmul.f32 0.01, %v3229_v50  ;;  %v3236_v57 = vmax.f32 %v3225_v45, %v3232_v49 }
 0x84a   : > { %v3237_v56 = vmax.f32 %v3227_v2, %v3233_v51 }
 0x84b   : > { %v3238_v58 = vmax.f32 %v3229_v50, %v3234_v53 }
 0x84c   : > { %v3271_v59 = vpack.c.bf16 %v3237_v56, %v3235_v54 }
 0x84d   : > { %v3272_v15 = vpack.c.bf16 %v3238_v58, %v3236_v57 }
 0x84f   : > { %3402 = vmatprep.mubr.bf16.mxu1 %v3272_v15 }
 0x850   : > { %3403 = vmatmul.mubr.bf16.vlgmr.msra.gmra.mrb[20].mxu1 %v3271_v59 }
 0x851   : > { %4075 = vmatpush3.bf16.msra.mxu1 %v4594_v17  ;;  %4090 = vmatprep.mubr.msk.bf16.mxu1 %vm4620_vm0, %v4619_v55 }
 0x852   : > { %4076 = vmatprep.subr.bf16.mxu1 %v4619_v55 }
 0x855   : > { %4077 = vmatpush3.bf16.msra.mxu1 %v4595_v60 }
 0x856   : > { %4078 = vmatprep.subr.bf16.mxu1 %v4619_v55 }
 0x859   : > { %4079 = vmatpush3.bf16.msra.mxu1 %v4596_v61 }
 0x85a   : > { %4080 = vmatprep.subr.bf16.mxu1 %v4619_v55 }
 0x85d   : > { %4081 = vmatpush3.bf16.msra.mxu1 %v4597_v62 }
 0x85e   : > { %4082 = vmatprep.subr.bf16.mxu1 %v4619_v55 }
 0x861   : > { %4083 = vmatpush3.bf16.msra.mxu1 %v4598_v63 }
 0x862   : > { %4084 = vmatprep.subr.bf16.mxu1 %v4619_v55 }
 0x865   : > { %4085 = vmatpush3.bf16.msra.mxu1 %v4599_v0 }
 0x866   : > { %4086 = vmatprep.subr.bf16.mxu1 %v4619_v55 }
 0x869   : > { %4087 = vmatpush3.bf16.msra.mxu1 %v4600_v1 }
 0x86a   : > { %4088 = vmatprep.subr.bf16.mxu1 %v4619_v55 }
 0x86d   : > { %4089 = vmatpush3.bf16.msra.mxu1 %v4601_v14 }
 0x923   : > { %v4039_v52 = vpop.f32.mrb[20].mxu1 }
 0x924   : > { %v4040_v4 = vpop.f32.mrb[21].mxu1 }
 0x925   : > { %v4041_v5 = vadd.f32 %v4040_v4, %v4039_v52  ;;  %v4042_v6 = vpop.f32.mrb[22].mxu1 }
 0x926   : > { %v4043_v7 = vpop.f32.mrb[23].mxu1 }
 0x927   : > { %v3405_v8 = vadd.f32 %v4041_v5, %v3273_v3  ;;  %v4044_v9 = vadd.f32 %v4043_v7, %v4042_v6 }
 0x929   : > { %v3411_v10 = vmul.f32 0.01, %v3405_v8  ;;  %v3408_v11 = vadd.f32 %v4044_v9, %v3273_v3 }
 0x92b   : > { %v3412_v55 = vmul.f32 0.01, %v3408_v11  ;;  %v3413_v12 = vmax.f32 %v3405_v8, %v3411_v10 }
 0x92d   : > { %v3414_v13 = vmax.f32 %v3408_v11, %v3412_v55 }
 0x92f   : > { %v3431_v16 = vpack.c.bf16 %v3414_v13, %v3413_v12 }
 0x931   : > { %4091 = vmatmul.mubr.bf16.vlgmr.msra.gmra.mrb[24].mxu1 %v3431_v16 }
 0xa04   : > { %v3515_v19 = vpop.f32.mrb[24].mxu1 }
 0xa05   : > { %v3516_v20 = vadd.f32 %v3515_v19, %v3432_v18  ;;  %v4092_v21 = vpop.f32.mrb[25].mxu1 }
 0xa06   : > { %v3518_v22 = vpop.f32.mrb[26].mxu1 }
 0xa07   : > { %4606 = vtanh.f32 %v3516_v20  ;;  %v3519_v23 = vadd.f32 %v3518_v22, %v3432_v18  ;;  %v4093_v24 = vpop.f32.mrb[27].mxu1 }
 0xa09   : > { %4608 = vtanh.f32 %v3519_v23 }
 0xa11   : > { %v4607_v25 = vpop.eup %4606 }
 0xa12   : > { %3524 = vst [vmem:[%s527_s29] sm:$0xff] %v4607_v25 }
 0xa13   : > { %v4609_v26 = vpop.eup %4608 }
 0xa14   : > { %3525 = vst [vmem:[%s527_s29 + $0x8] sm:$0xff] %v4609_v26 }
 0xa15 PF: > { %s26_s18 = sadd.s32 1, %s4616_s18  }
 0xa16   : > { %p23_p4 = scmp.ge.s32.totalorder %s26_s18, 4  }
 0xa18   :  { %25 = sbr.rel (!%p23_p4) target bundleno = 1 (0x1), region = 129 }

</bundles_post_ra>
